<compile_context>
chip_gen: v7x
topology: tpu7x:2x2x1
jax: 0.10.0
libtpu: 0.0.40
codegen_flags: <defaults>
</compile_context>

<pallas_src>
import functools
import math

import jax
import jax.numpy as jnp
from jax import lax
from jax.experimental import pallas as pl
from jax.experimental.pallas import tpu as pltpu

# Above the scoped defaults (16 MiB v5e / 32 MiB v6e+v7x) but below v7x's 64 MiB physical
# VMEM so the tiled kernels compile on every generation.
_VMEM_LIMIT = 48 * 1024 * 1024

# Flip to jnp.bfloat16 on v6e/v7x to halve HBM/VMEM traffic of the matmuls (accumulation
# stays f32).  Kept f32 here for bit-closer parity with the PyTorch reference.
_MXU_DTYPE = jnp.float32


def _round_up(x, m):
    return ((x + m - 1) // m) * m


# ----------------------------- tiled Linear -----------------------------

def _linear_kernel(x_ref, w_ref, b_ref, o_ref, acc_ref, *, activation):
    @pl.when(pl.program_id(2) == 0)
    def _init():
        acc_ref[...] = jnp.zeros_like(acc_ref)

    acc_ref[...] += jnp.dot(x_ref[...].astype(_MXU_DTYPE),
                            w_ref[...].astype(_MXU_DTYPE),
                            preferred_element_type=jnp.float32)

    @pl.when(pl.program_id(2) == pl.num_programs(2) - 1)
    def _finalize():
        y = acc_ref[...] + b_ref[...]
        if activation == "relu":
            y = jnp.maximum(y, 0.0)
        o_ref[...] = y.astype(o_ref.dtype)


def pallas_linear(x2d, w, b, activation=None, *, tm_max=256, tn_max=256, tk_max=512):
    """y = act(x @ w + b), tiled over (rows, out-features, reduction)."""
    M, K = x2d.shape
    N = w.shape[1]

    Mp = _round_up(M, 8)
    tm = Mp if Mp <= tm_max else tm_max
    Mp = _round_up(Mp, tm)
    if K <= tk_max:
        tk, Kp = K, K
    else:
        tk, Kp = tk_max, _round_up(K, tk_max)
    if N <= tn_max:
        tn, Np = N, N
    else:
        tn, Np = tn_max, _round_up(N, tn_max)

    xp = x2d if (Mp, Kp) == (M, K) else jnp.pad(x2d, ((0, Mp - M), (0, Kp - K)))
    wp = w if (Kp, Np) == (K, N) else jnp.pad(w, ((0, Kp - K), (0, Np - N)))
    bp = b.reshape(1, N)
    if Np != N:
        bp = jnp.pad(bp, ((0, 0), (0, Np - N)))

    grid = (Mp // tm, Np // tn, Kp // tk)
    out = pl.pallas_call(
        functools.partial(_linear_kernel, activation=activation),
        out_shape=jax.ShapeDtypeStruct((Mp, Np), jnp.float32),
        grid_spec=pltpu.PrefetchScalarGridSpec(
            num_scalar_prefetch=0,
            grid=grid,
            in_specs=[
                pl.BlockSpec((tm, tk), lambda i, j, k: (i, k)),
                pl.BlockSpec((tk, tn), lambda i, j, k: (k, j)),
                pl.BlockSpec((1, tn), lambda i, j, k: (0, j)),
            ],
            out_specs=pl.BlockSpec((tm, tn), lambda i, j, k: (i, j)),
            scratch_shapes=[pltpu.VMEM((tm, tn), jnp.float32)],
        ),
        compiler_params=pltpu.CompilerParams(
            dimension_semantics=("parallel", "parallel", "arbitrary"),
            vmem_limit_bytes=_VMEM_LIMIT),
    )(xp, wp, bp)
    if (Mp, Np) != (M, N):
        out = out[:M, :N]
    return out


# -------------------- fused Linear + residual add + LayerNorm --------------------

def _linear_addnorm_kernel(x_ref, w_ref, b_ref, r_ref, g_ref, bln_ref, o_ref, acc_ref, *, eps):
    @pl.when(pl.program_id(1) == 0)
    def _init():
        acc_ref[...] = jnp.zeros_like(acc_ref)

    acc_ref[...] += jnp.dot(x_ref[...].astype(_MXU_DTYPE),
                            w_ref[...].astype(_MXU_DTYPE),
                            preferred_element_type=jnp.float32)

    @pl.when(pl.program_id(1) == pl.num_programs(1) - 1)
    def _finalize():
        z = acc_ref[...] + b_ref[...] + r_ref[...]
        mean = jnp.mean(z, axis=-1, keepdims=True)
        var = jnp.mean(jnp.square(z - mean), axis=-1, keepdims=True)   # biased (PyTorch)
        o_ref[...] = ((z - mean) * lax.rsqrt(var + eps) * g_ref[...]
                      + bln_ref[...]).astype(o_ref.dtype)


def pallas_linear_addnorm(x2d, w, b, resid2d, gamma, beta, eps=1e-5,
                          *, tm_max=256, tk_max=512):
    """y = LayerNorm(resid + x @ w + b).

    The full output width (d_model) stays in one tile so the row statistics, the bias add
    and the residual add are all computed in VMEM; only the normalized result goes to HBM.
    """
    M, K = x2d.shape
    N = w.shape[1]

    Mp = _round_up(M, 8)
    tm = Mp if Mp <= tm_max else tm_max
    Mp = _round_up(Mp, tm)
    if K <= tk_max:
        tk, Kp = K, K
    else:
        tk, Kp = tk_max, _round_up(K, tk_max)

    xp = x2d if (Mp, Kp) == (M, K) else jnp.pad(x2d, ((0, Mp - M), (0, Kp - K)))
    rp = resid2d if Mp == M else jnp.pad(resid2d, ((0, Mp - M), (0, 0)))
    wp = w if Kp == K else jnp.pad(w, ((0, Kp - K), (0, 0)))

    grid = (Mp // tm, Kp // tk)
    out = pl.pallas_call(
        functools.partial(_linear_addnorm_kernel, eps=eps),
        out_shape=jax.ShapeDtypeStruct((Mp, N), jnp.float32),
        grid_spec=pltpu.PrefetchScalarGridSpec(
            num_scalar_prefetch=0,
            grid=grid,
            in_specs=[
                pl.BlockSpec((tm, tk), lambda i, k: (i, k)),
                pl.BlockSpec((tk, N), lambda i, k: (k, 0)),
                pl.BlockSpec((1, N), lambda i, k: (0, 0)),
                pl.BlockSpec((tm, N), lambda i, k: (i, 0)),
                pl.BlockSpec((1, N), lambda i, k: (0, 0)),
                pl.BlockSpec((1, N), lambda i, k: (0, 0)),
            ],
            out_specs=pl.BlockSpec((tm, N), lambda i, k: (i, 0)),
            scratch_shapes=[pltpu.VMEM((tm, N), jnp.float32)],
        ),
        compiler_params=pltpu.CompilerParams(
            dimension_semantics=("parallel", "arbitrary"),
            vmem_limit_bytes=_VMEM_LIMIT),
    )(xp, wp, b.reshape(1, N), rp, gamma.reshape(1, N), beta.reshape(1, N))
    return out if Mp == M else out[:M]


# -------------------- fused FFN + residual add + LayerNorm --------------------

def _ffn_addnorm_kernel(x_ref, w1_ref, b1_ref, w2_ref, b2_ref, g_ref, bln_ref, o_ref, *, eps):
    x = x_ref[...]
    h = jnp.dot(x.astype(_MXU_DTYPE), w1_ref[...].astype(_MXU_DTYPE),
                preferred_element_type=jnp.float32) + b1_ref[...]
    h = jnp.maximum(h, 0.0)                              # ReLU; d_ff intermediate stays in VMEM
    z = x + jnp.dot(h.astype(_MXU_DTYPE), w2_ref[...].astype(_MXU_DTYPE),
                    preferred_element_type=jnp.float32) + b2_ref[...]
    mean = jnp.mean(z, axis=-1, keepdims=True)
    var = jnp.mean(jnp.square(z - mean), axis=-1, keepdims=True)       # biased (PyTorch)
    o_ref[...] = ((z - mean) * lax.rsqrt(var + eps) * g_ref[...]
                  + bln_ref[...]).astype(o_ref.dtype)


def pallas_ffn_addnorm(x2d, w1, b1, w2, b2, gamma, beta, eps=1e-5, *, tm_max=256):
    """y = LayerNorm(x + relu(x @ w1 + b1) @ w2 + b2), row-tiled.

    TODO(synk): tile d_ff on an inner accumulation axis (or emit_pipeline) for large d_ff;
    at these sizes both weight slabs fit comfortably in VMEM.
    """
    M, D = x2d.shape
    d_ff = w1.shape[1]
    Mp = _round_up(M, 8)
    tm = Mp if Mp <= tm_max else tm_max
    Mp = _round_up(Mp, tm)
    xp = x2d if Mp == M else jnp.pad(x2d, ((0, Mp - M), (0, 0)))

    out = pl.pallas_call(
        functools.partial(_ffn_addnorm_kernel, eps=eps),
        out_shape=jax.ShapeDtypeStruct((Mp, D), jnp.float32),
        grid_spec=pltpu.PrefetchScalarGridSpec(
            num_scalar_prefetch=0,
            grid=(Mp // tm,),
            in_specs=[
                pl.BlockSpec((tm, D), lambda i: (i, 0)),
                pl.BlockSpec((D, d_ff), lambda i: (0, 0)),
                pl.BlockSpec((1, d_ff), lambda i: (0, 0)),
                pl.BlockSpec((d_ff, D), lambda i: (0, 0)),
                pl.BlockSpec((1, D), lambda i: (0, 0)),
                pl.BlockSpec((1, D), lambda i: (0, 0)),
                pl.BlockSpec((1, D), lambda i: (0, 0)),
            ],
            out_specs=pl.BlockSpec((tm, D), lambda i: (i, 0)),
        ),
        compiler_params=pltpu.CompilerParams(
            dimension_semantics=("parallel",),
            vmem_limit_bytes=_VMEM_LIMIT),
    )(xp, w1, b1.reshape(1, d_ff), w2, b2.reshape(1, D),
      gamma.reshape(1, D), beta.reshape(1, D))
    return out if Mp == M else out[:M]


# ----------------------------- flash attention -----------------------------

def _flash_mha_kernel(q_ref, k_ref, v_ref, qm_ref, km_ref, o_ref,
                      m_sc, l_sc, acc_sc, *, num_heads, d_k, scale, causal, tq, tk):
    kv_idx = pl.program_id(2)

    @pl.when(kv_idx == 0)
    def _init():
        m_sc[...] = jnp.full_like(m_sc, -jnp.inf)
        l_sc[...] = jnp.zeros_like(l_sc)
        acc_sc[...] = jnp.zeros_like(acc_sc)

    q2 = q_ref[0] * scale                # (tq, D); 1/sqrt(d_k) folded into Q once
    k2 = k_ref[0]                        # (tk, D)
    v2 = v_ref[0]                        # (tk, D)

    # Mask built in-kernel: per-position validity bits + causal iota (no [B*H,Sq,Sk] HBM mask).
    valid = (qm_ref[0] != 0) & (km_ref[0] != 0)               # (tq,1) & (1,tk) -> (tq,tk)
    if causal:
        q_pos = pl.program_id(1) * tq + lax.broadcasted_iota(jnp.int32, (tq, tk), 0)
        k_pos = kv_idx * tk + lax.broadcasted_iota(jnp.int32, (tq, tk), 1)
        valid = valid & (k_pos <= q_pos)

    # Heads stay packed in the lane (feature) dimension; each head is a static d_k-wide
    # column window -> no head split/merge transposes through HBM.
    for h in range(num_heads):
        cols = slice(h * d_k, (h + 1) * d_k)
        s = lax.dot_general(q2[:, cols], k2[:, cols],
                            (((1,), (1,)), ((), ())),
                            preferred_element_type=jnp.float32)          # (tq, tk)
        s = jnp.where(valid, s, -1000000000.0)                           # PyTorch masked_fill
        m_prev = m_sc[h]                                                 # (tq, 1)
        m_new = jnp.maximum(m_prev, jnp.max(s, axis=-1, keepdims=True))
        alpha = jnp.exp(m_prev - m_new)
        p = jnp.exp(s - m_new)                                           # (tq, tk)
        l_sc[h] = alpha * l_sc[h] + jnp.sum(p, axis=-1, keepdims=True)
        acc_sc[h] = alpha * acc_sc[h] + jnp.dot(p, v2[:, cols],
                                                preferred_element_type=jnp.float32)
        m_sc[h] = m_new

    @pl.when(kv_idx == pl.num_programs(2) - 1)
    def _finalize():
        pieces = []
        for h in range(num_heads):
            pieces.append(acc_sc[h] * pl.reciprocal(l_sc[h], approx=True))
        o_ref[0] = jnp.concatenate(pieces, axis=-1).astype(o_ref.dtype)  # one lane-dense store


def pallas_attention(q, k, v, q_valid, k_valid, *, num_heads, causal,
                     tq_max=128, tk_max=128):
    """q,k,v: (B, S, D); q_valid: (B, Sq), k_valid: (B, Sk) int validity bits."""
    B, Sq, D = q.shape
    Sk = k.shape[1]
    d_k = D // num_heads
    scale = 1.0 / math.sqrt(d_k)

    if Sq <= tq_max:
        tq, Sqp = Sq, Sq
    else:
        tq, Sqp = tq_max, _round_up(Sq, tq_max)
    if Sk <= tk_max:
        tk, Skp = Sk, Sk
    else:
        tk, Skp = tk_max, _round_up(Sk, tk_max)

    qp = q if Sqp == Sq else jnp.pad(q, ((0, 0), (0, Sqp - Sq), (0, 0)))
    kp = k if Skp == Sk else jnp.pad(k, ((0, 0), (0, Skp - Sk), (0, 0)))
    vp = v if Skp == Sk else jnp.pad(v, ((0, 0), (0, Skp - Sk), (0, 0)))
    qm = q_valid.astype(jnp.int32)
    km = k_valid.astype(jnp.int32)
    if Sqp != Sq:
        qm = jnp.pad(qm, ((0, 0), (0, Sqp - Sq)))
    if Skp != Sk:
        km = jnp.pad(km, ((0, 0), (0, Skp - Sk)))      # padded keys are masked out
    qm = qm[:, :, None]                                # (B, Sqp, 1)
    km = km[:, None, :]                                # (B, 1, Skp)

    grid = (B, Sqp // tq, Skp // tk)
    out = pl.pallas_call(
        functools.partial(_flash_mha_kernel, num_heads=num_heads, d_k=d_k,
                          scale=scale, causal=causal, tq=tq, tk=tk),
        out_shape=jax.ShapeDtypeStruct((B, Sqp, D), jnp.float32),
        grid_spec=pltpu.PrefetchScalarGridSpec(
            num_scalar_prefetch=0,
            grid=grid,
            in_specs=[
                pl.BlockSpec((1, tq, D), lambda b, i, j: (b, i, 0)),
                pl.BlockSpec((1, tk, D), lambda b, i, j: (b, j, 0)),
                pl.BlockSpec((1, tk, D), lambda b, i, j: (b, j, 0)),
                pl.BlockSpec((1, tq, 1), lambda b, i, j: (b, i, 0)),
                pl.BlockSpec((1, 1, tk), lambda b, i, j: (b, 0, j)),
            ],
            out_specs=pl.BlockSpec((1, tq, D), lambda b, i, j: (b, i, 0)),
            scratch_shapes=[
                pltpu.VMEM((num_heads, tq, 1), jnp.float32),    # running max
                pltpu.VMEM((num_heads, tq, 1), jnp.float32),    # running denominator
                pltpu.VMEM((num_heads, tq, d_k), jnp.float32),  # output accumulator
            ],
        ),
        compiler_params=pltpu.CompilerParams(
            dimension_semantics=("parallel", "parallel", "arbitrary"),
            vmem_limit_bytes=_VMEM_LIMIT),
    )(qp, kp, vp, qm, km)
    if Sqp != Sq:
        out = out[:, :Sq, :]
    return out


# ----------------------------- model pieces -----------------------------

def attention_sublayer(p, x, kv_in, q_valid, k_valid, gamma, beta,
                       *, num_heads, causal, self_attn):
    """Full PyTorch sub-layer: LayerNorm(x + W_o(MHA(x, kv_in, kv_in)))."""
    B, Sq, D = x.shape
    Sk = kv_in.shape[1]

    if self_attn:
        # fused QKV projection: one matmul with a 3*d_model lane-dense output tile
        qkv = pallas_linear(x.reshape(B * Sq, D), p["w_qkv"], p["b_qkv"])
        q = qkv[:, :D].reshape(B, Sq, D)
        k = qkv[:, D:2 * D].reshape(B, Sk, D)
        v = qkv[:, 2 * D:].reshape(B, Sk, D)
    else:
        # cross-attention: Q from the decoder stream, fused KV from the encoder output
        q = pallas_linear(x.reshape(B * Sq, D), p["wq"], p["bq"]).reshape(B, Sq, D)
        kv = pallas_linear(kv_in.reshape(B * Sk, D), p["w_kv"], p["b_kv"])
        k = kv[:, :D].reshape(B, Sk, D)
        v = kv[:, D:].reshape(B, Sk, D)

    attn = pallas_attention(q, k, v, q_valid, k_valid, num_heads=num_heads, causal=causal)
    # fused output projection + residual add + LayerNorm: LN(x + attn @ W_o + b_o)
    out = pallas_linear_addnorm(attn.reshape(B * Sq, D), p["wo"], p["bo"],
                                x.reshape(B * Sq, D), gamma, beta).reshape(B, Sq, D)
    return out


def ffn_sublayer(p, x, gamma, beta):
    """LayerNorm(x + FFN(x)) in one kernel."""
    B, S, D = x.shape
    return pallas_ffn_addnorm(x.reshape(B * S, D), p["w1"], p["b1"], p["w2"], p["b2"],
                              gamma, beta).reshape(B, S, D)


def encoder_layer(p, x, src_valid, num_heads):
    ones_q = jnp.ones_like(src_valid)
    # encoder self-attention: key-padding mask from the source (matches src_mask)
    x = attention_sublayer(p["self_attn"], x, x, ones_q, src_valid,
                           p["ln1_g"], p["ln1_b"],
                           num_heads=num_heads, causal=False, self_attn=True)
    x = ffn_sublayer(p["ffn"], x, p["ln2_g"], p["ln2_b"])
    return x


def decoder_layer(p, x, enc_out, src_valid, tgt_valid, num_heads):
    ones_tgt = jnp.ones_like(tgt_valid)
    # decoder self-attention: query-padding mask + causal (matches PyTorch generate_mask)
    x = attention_sublayer(p["self_attn"], x, x, tgt_valid, ones_tgt,
                           p["ln1_g"], p["ln1_b"],
                           num_heads=num_heads, causal=True, self_attn=True)
    # cross-attention: key-padding mask from the source
    x = attention_sublayer(p["cross_attn"], x, enc_out, ones_tgt, src_valid,
                           p["ln2_g"], p["ln2_b"],
                           num_heads=num_heads, causal=False, self_attn=False)
    x = ffn_sublayer(p["ffn"], x, p["ln3_g"], p["ln3_b"])
    return x


def positional_encoding(d_model, max_len):
    pos = jnp.arange(max_len, dtype=jnp.float32)[:, None]
    div = jnp.exp(jnp.arange(0, d_model, 2, dtype=jnp.float32)
                  * (-math.log(10000.0) / d_model))
    pe = jnp.zeros((max_len, d_model), jnp.float32)
    pe = pe.at[:, 0::2].set(jnp.sin(pos * div))
    pe = pe.at[:, 1::2].set(jnp.cos(pos * div))
    return pe[None]  # (1, max_len, d_model)


def transformer_forward(params, src, tgt, *, num_heads):
    # per-position validity bits (replace the materialized boolean mask tensors)
    src_valid = (src != 0).astype(jnp.int32)   # (B, S_src)
    tgt_valid = (tgt != 0).astype(jnp.int32)   # (B, S_tgt)

    # embeddings + positional encoding (dropout == identity)
    src_emb = jnp.take(params["enc_emb"], src, axis=0) + params["pe"][:, :src.shape[1]]
    tgt_emb = jnp.take(params["dec_emb"], tgt, axis=0) + params["pe"][:, :tgt.shape[1]]

    enc = src_emb
    for lp in params["enc_layers"]:
        enc = encoder_layer(lp, enc, src_valid, num_heads)

    dec = tgt_emb
    for lp in params["dec_layers"]:
        dec = decoder_layer(lp, dec, enc, src_valid, tgt_valid, num_heads)

    B, S, D = dec.shape
    out = pallas_linear(dec.reshape(B * S, D), params["fc_w"], params["fc_b"])
    return out.reshape(B, S, -1)


# ----------------------------- parameter init -----------------------------

def _init_linear(key, din, dout):
    kw, kb = jax.random.split(key)
    w = jax.random.normal(kw, (din, dout), jnp.float32) * 0.02
    b = jax.random.normal(kb, (dout,), jnp.float32) * 0.02
    return w, b


def _init_mha(key, d_model):
    ks = jax.random.split(key, 4)
    wq, bq = _init_linear(ks[0], d_model, d_model)
    wk, bk = _init_linear(ks[1], d_model, d_model)
    wv, bv = _init_linear(ks[2], d_model, d_model)
    wo, bo = _init_linear(ks[3], d_model, d_model)
    return dict(
        wq=wq, bq=bq, wk=wk, bk=bk, wv=wv, bv=bv, wo=wo, bo=bo,
        # fused projection slabs, concatenated once at init (no per-forward concat ops)
        w_qkv=jnp.concatenate([wq, wk, wv], axis=1),
        b_qkv=jnp.concatenate([bq, bk, bv], axis=0),
        w_kv=jnp.concatenate([wk, wv], axis=1),
        b_kv=jnp.concatenate([bk, bv], axis=0),
    )


def _init_ffn(key, d_model, d_ff):
    k1, k2 = jax.random.split(key)
    w1, b1 = _init_linear(k1, d_model, d_ff)
    w2, b2 = _init_linear(k2, d_ff, d_model)
    return dict(w1=w1, b1=b1, w2=w2, b2=b2)


def init_params(key, src_vocab, tgt_vocab, d_model, num_layers, d_ff, max_seq_length):
    keys = jax.random.split(key, 4 + 2 * num_layers)
    params = {
        "enc_emb": jax.random.normal(keys[0], (src_vocab, d_model), jnp.float32) * 0.02,
        "dec_emb": jax.random.normal(keys[1], (tgt_vocab, d_model), jnp.float32) * 0.02,
        "pe": positional_encoding(d_model, max_seq_length),
        "enc_layers": [],
        "dec_layers": [],
    }
    fc_w, fc_b = _init_linear(keys[2], d_model, tgt_vocab)
    params["fc_w"], params["fc_b"] = fc_w, fc_b

    for i in range(num_layers):
        k = jax.random.split(keys[3 + i], 2)
        params["enc_layers"].append(dict(
            self_attn=_init_mha(k[0], d_model),
            ffn=_init_ffn(k[1], d_model, d_ff),
            ln1_g=jnp.ones((d_model,), jnp.float32), ln1_b=jnp.zeros((d_model,), jnp.float32),
            ln2_g=jnp.ones((d_model,), jnp.float32), ln2_b=jnp.zeros((d_model,), jnp.float32),
        ))
    for i in range(num_layers):
        k = jax.random.split(keys[3 + num_layers + i], 3)
        params["dec_layers"].append(dict(
            self_attn=_init_mha(k[0], d_model),
            cross_attn=_init_mha(k[1], d_model),
            ffn=_init_ffn(k[2], d_model, d_ff),
            ln1_g=jnp.ones((d_model,), jnp.float32), ln1_b=jnp.zeros((d_model,), jnp.float32),
            ln2_g=jnp.ones((d_model,), jnp.float32), ln2_b=jnp.zeros((d_model,), jnp.float32),
            ln3_g=jnp.ones((d_model,), jnp.float32), ln3_b=jnp.zeros((d_model,), jnp.float32),
        ))
    return params


# ----------------------------- main -----------------------------

if __name__ == "__main__":
    # small, module-consistent sizes
    src_vocab_size = 16
    tgt_vocab_size = 16
    d_model = 32
    num_heads = 4
    num_layers = 2
    d_ff = 64
    max_seq_length = 16
    # dropout == 0.0 (identity); TODO(synk): training-mode dropout (stateful RNG) not implemented

    B, S_src, S_tgt = 2, 8, 8

    root = jax.random.PRNGKey(0)
    k_params, k_src, k_tgt = jax.random.split(root, 3)

    params = init_params(k_params, src_vocab_size, tgt_vocab_size,
                         d_model, num_layers, d_ff, max_seq_length)

    # token ids in [0, vocab); zeros exercise the padding masks
    src = jax.random.randint(k_src, (B, S_src), 0, src_vocab_size, dtype=jnp.int32)
    tgt = jax.random.randint(k_tgt, (B, S_tgt), 0, tgt_vocab_size, dtype=jnp.int32)

    fwd = jax.jit(functools.partial(transformer_forward, num_heads=num_heads))
    out = jax.block_until_ready(fwd(params, src, tgt))

    assert out.shape == (B, S_tgt, tgt_vocab_size)
    assert out.dtype == jnp.float32
    assert bool(jnp.all(jnp.isfinite(out)))
    print("KERNEL_OK")
</pallas_src>

<mosaic_0001>
module attributes {stable_mosaic.version = 11 : i64} {
  func.func @_linear_kernel(%arg0: i32, %arg1: i32, %arg2: i32, %arg3: memref<16x32xf32, #tpu.memory_space<vmem>>, %arg4: memref<32x96xf32, #tpu.memory_space<vmem>>, %arg5: memref<1x96xf32, #tpu.memory_space<vmem>>, %arg6: memref<16x96xf32, #tpu.memory_space<vmem>>, %arg7: memref<16x96xf32, #tpu.memory_space<vmem>>) attributes {dimension_semantics = [#tpu.dimension_semantics<parallel>, #tpu.dimension_semantics<parallel>, #tpu.dimension_semantics<arbitrary>], iteration_bounds = array<i64: 1, 1, 1>, scalar_prefetch = 0 : i64, scratch_operands = 1 : i64, tpu.core_type = #tpu.core_type<tc>, window_params = [{transform_indices = @transform_0, window_bounds = array<i64: 16, 32>}, {transform_indices = @transform_1, window_bounds = array<i64: 32, 96>}, {transform_indices = @transform_2, window_bounds = array<i64: 1, 96>}, {transform_indices = @transform_3, window_bounds = array<i64: 16, 96>}]} {
    %c0_i32 = arith.constant 0 : i32
    %0 = arith.cmpi eq, %arg2, %c0_i32 : i32
    %1 = arith.extui %0 : i1 to i32
    %c0_i32_0 = arith.constant 0 : i32
    %2 = arith.cmpi ne, %1, %c0_i32_0 : i32
    scf.if %2 {
      %cst_10 = arith.constant 0.000000e+00 : f32
      %12 = vector.broadcast %cst_10 : f32 to vector<16x96xf32>
      %c0_11 = arith.constant 0 : index
      %c0_12 = arith.constant 0 : index
      %13 = vector.load %arg7[%c0_11, %c0_12] : memref<16x96xf32, #tpu.memory_space<vmem>>, vector<16x96xf32>
      tpu.vector_store %arg7[%c0_11, %c0_12], %12 {strides = array<i32>} : memref<16x96xf32, #tpu.memory_space<vmem>>, vector<16x96xf32>,
    } else {
    }
    %c0 = arith.constant 0 : index
    %c0_1 = arith.constant 0 : index
    %3 = vector.load %arg7[%c0, %c0_1] : memref<16x96xf32, #tpu.memory_space<vmem>>, vector<16x96xf32>
    %c0_2 = arith.constant 0 : index
    %c0_3 = arith.constant 0 : index
    %4 = vector.load %arg3[%c0_2, %c0_3] : memref<16x32xf32, #tpu.memory_space<vmem>>, vector<16x32xf32>
    %c0_4 = arith.constant 0 : index
    %c0_5 = arith.constant 0 : index
    %5 = vector.load %arg4[%c0_4, %c0_5] : memref<32x96xf32, #tpu.memory_space<vmem>>, vector<32x96xf32>
    %cst = arith.constant dense<0.000000e+00> : vector<16x96xf32>
    %6 = tpu.matmul %4, %5, %cst {dimension_numbers = #tpu.dot_dimension_numbers<[1], [0], [0], [1], [0, 0, 1, 1], [], []>} : vector<16x32xf32>, vector<32x96xf32>, vector<16x96xf32> -> vector<16x96xf32>
    %7 = arith.addf %3, %6 : vector<16x96xf32>
    %c0_6 = arith.constant 0 : index
    %c0_7 = arith.constant 0 : index
    %8 = vector.load %arg7[%c0_6, %c0_7] : memref<16x96xf32, #tpu.memory_space<vmem>>, vector<16x96xf32>
    tpu.vector_store %arg7[%c0_6, %c0_7], %7 {strides = array<i32>} : memref<16x96xf32, #tpu.memory_space<vmem>>, vector<16x96xf32>,
    %c0_i32_8 = arith.constant 0 : i32
    %9 = arith.cmpi eq, %arg2, %c0_i32_8 : i32
    %10 = arith.extui %9 : i1 to i32
    %c0_i32_9 = arith.constant 0 : i32
    %11 = arith.cmpi ne, %10, %c0_i32_9 : i32
    scf.if %11 {
      %c0_10 = arith.constant 0 : index
      %c0_11 = arith.constant 0 : index
      %12 = vector.load %arg7[%c0_10, %c0_11] : memref<16x96xf32, #tpu.memory_space<vmem>>, vector<16x96xf32>
      %c0_12 = arith.constant 0 : index
      %c0_13 = arith.constant 0 : index
      %13 = vector.load %arg5[%c0_12, %c0_13] : memref<1x96xf32, #tpu.memory_space<vmem>>, vector<1x96xf32>
      %14 = vector.broadcast %13 : vector<1x96xf32> to vector<16x96xf32>
      %15 = arith.addf %12, %14 : vector<16x96xf32>
      %c0_14 = arith.constant 0 : index
      %c0_15 = arith.constant 0 : index
      %16 = vector.load %arg6[%c0_14, %c0_15] : memref<16x96xf32, #tpu.memory_space<vmem>>, vector<16x96xf32>
      tpu.vector_store %arg6[%c0_14, %c0_15], %15 {strides = array<i32>} : memref<16x96xf32, #tpu.memory_space<vmem>>, vector<16x96xf32>,
    } else {
    }
    return
  }
  func.func @transform_0(%arg0: i32, %arg1: i32, %arg2: i32) -> (i32, i32) {
    %c0_i32 = arith.constant 0 : i32
    return %arg0, %arg2 : i32, i32
  }
  func.func @transform_1(%arg0: i32, %arg1: i32, %arg2: i32) -> (i32, i32) {
    %c0_i32 = arith.constant 0 : i32
    return %arg2, %arg1 : i32, i32
  }
  func.func @transform_2(%arg0: i32, %arg1: i32, %arg2: i32) -> (i32, i32) {
    %c0_i32 = arith.constant 0 : i32
    %c0_i32_0 = arith.constant 0 : i32
    return %c0_i32, %arg1 : i32, i32
  }
  func.func @transform_3(%arg0: i32, %arg1: i32, %arg2: i32) -> (i32, i32) {
    %c0_i32 = arith.constant 0 : i32
    return %arg0, %arg1 : i32, i32
  }
}

module attributes {stable_mosaic.version = 11 : i64} {
  func.func @_linear_addnorm_kernel(%arg0: i32, %arg1: i32, %arg2: memref<16x32xf32, #tpu.memory_space<vmem>>, %arg3: memref<32x32xf32, #tpu.memory_space<vmem>>, %arg4: memref<1x32xf32, #tpu.memory_space<vmem>>, %arg5: memref<16x32xf32, #tpu.memory_space<vmem>>, %arg6: memref<1x32xf32, #tpu.memory_space<vmem>>, %arg7: memref<1x32xf32, #tpu.memory_space<vmem>>, %arg8: memref<16x32xf32, #tpu.memory_space<vmem>>, %arg9: memref<16x32xf32, #tpu.memory_space<vmem>>) attributes {dimension_semantics = [#tpu.dimension_semantics<parallel>, #tpu.dimension_semantics<arbitrary>], iteration_bounds = array<i64: 1, 1>, scalar_prefetch = 0 : i64, scratch_operands = 1 : i64, tpu.core_type = #tpu.core_type<tc>, window_params = [{transform_indices = @transform_0, window_bounds = array<i64: 16, 32>}, {transform_indices = @transform_1, window_bounds = array<i64: 32, 32>}, {pipeline_mode = #tpu.pipeline_mode<synchronous>, transform_indices = @transform_2, window_bounds = array<i64: 1, 32>}, {transform_indices = @transform_3, window_bounds = array<i64: 16, 32>}, {pipeline_mode = #tpu.pipeline_mode<synchronous>, transform_indices = @transform_4, window_bounds = array<i64: 1, 32>}, {pipeline_mode = #tpu.pipeline_mode<synchronous>, transform_indices = @transform_5, window_bounds = array<i64: 1, 32>}, {transform_indices = @transform_6, window_bounds = array<i64: 16, 32>}]} {
    %c0_i32 = arith.constant 0 : i32
    %0 = arith.cmpi eq, %arg1, %c0_i32 : i32
    %1 = arith.extui %0 : i1 to i32
    %c0_i32_0 = arith.constant 0 : i32
    %2 = arith.cmpi ne, %1, %c0_i32_0 : i32
    scf.if %2 {
      %cst_10 = arith.constant 0.000000e+00 : f32
      %12 = vector.broadcast %cst_10 : f32 to vector<16x32xf32>
      %c0_11 = arith.constant 0 : index
      %c0_12 = arith.constant 0 : index
      %13 = vector.load %arg9[%c0_11, %c0_12] : memref<16x32xf32, #tpu.memory_space<vmem>>, vector<16x32xf32>
      tpu.vector_store %arg9[%c0_11, %c0_12], %12 {strides = array<i32>} : memref<16x32xf32, #tpu.memory_space<vmem>>, vector<16x32xf32>,
    } else {
    }
    %c0 = arith.constant 0 : index
    %c0_1 = arith.constant 0 : index
    %3 = vector.load %arg9[%c0, %c0_1] : memref<16x32xf32, #tpu.memory_space<vmem>>, vector<16x32xf32>
    %c0_2 = arith.constant 0 : index
    %c0_3 = arith.constant 0 : index
    %4 = vector.load %arg2[%c0_2, %c0_3] : memref<16x32xf32, #tpu.memory_space<vmem>>, vector<16x32xf32>
    %c0_4 = arith.constant 0 : index
    %c0_5 = arith.constant 0 : index
    %5 = vector.load %arg3[%c0_4, %c0_5] : memref<32x32xf32, #tpu.memory_space<vmem>>, vector<32x32xf32>
    %cst = arith.constant dense<0.000000e+00> : vector<16x32xf32>
    %6 = tpu.matmul %4, %5, %cst {dimension_numbers = #tpu.dot_dimension_numbers<[1], [0], [0], [1], [0, 0, 1, 1], [], []>} : vector<16x32xf32>, vector<32x32xf32>, vector<16x32xf32> -> vector<16x32xf32>
    %7 = arith.addf %3, %6 : vector<16x32xf32>
    %c0_6 = arith.constant 0 : index
    %c0_7 = arith.constant 0 : index
    %8 = vector.load %arg9[%c0_6, %c0_7] : memref<16x32xf32, #tpu.memory_space<vmem>>, vector<16x32xf32>
    tpu.vector_store %arg9[%c0_6, %c0_7], %7 {strides = array<i32>} : memref<16x32xf32, #tpu.memory_space<vmem>>, vector<16x32xf32>,
    %c0_i32_8 = arith.constant 0 : i32
    %9 = arith.cmpi eq, %arg1, %c0_i32_8 : i32
    %10 = arith.extui %9 : i1 to i32
    %c0_i32_9 = arith.constant 0 : i32
    %11 = arith.cmpi ne, %10, %c0_i32_9 : i32
    scf.if %11 {
      %c0_10 = arith.constant 0 : index
      %c0_11 = arith.constant 0 : index
      %12 = vector.load %arg9[%c0_10, %c0_11] : memref<16x32xf32, #tpu.memory_space<vmem>>, vector<16x32xf32>
      %c0_12 = arith.constant 0 : index
      %c0_13 = arith.constant 0 : index
      %13 = vector.load %arg4[%c0_12, %c0_13] : memref<1x32xf32, #tpu.memory_space<vmem>>, vector<1x32xf32>
      %14 = vector.broadcast %13 : vector<1x32xf32> to vector<16x32xf32>
      %15 = arith.addf %12, %14 : vector<16x32xf32>
      %c0_14 = arith.constant 0 : index
      %c0_15 = arith.constant 0 : index
      %16 = vector.load %arg5[%c0_14, %c0_15] : memref<16x32xf32, #tpu.memory_space<vmem>>, vector<16x32xf32>
      %17 = arith.addf %15, %16 : vector<16x32xf32>
      %cst_16 = arith.constant dense<0.000000e+00> : vector<16xf32>
      %18 = vector.multi_reduction <add>, %17, %cst_16 [1] : vector<16x32xf32> to vector<16xf32>
      %19 = vector.shape_cast %18 : vector<16xf32> to vector<16x1xf32>
      %cst_17 = arith.constant 3.200000e+01 : f32
      %20 = vector.broadcast %cst_17 : f32 to vector<16x1xf32>
      %21 = arith.divf %19, %20 : vector<16x1xf32>
      %22 = vector.broadcast %21 : vector<16x1xf32> to vector<16x32xf32>
      %23 = arith.subf %17, %22 : vector<16x32xf32>
      %24 = arith.mulf %23, %23 : vector<16x32xf32>
      %cst_18 = arith.constant dense<0.000000e+00> : vector<16xf32>
      %25 = vector.multi_reduction <add>, %24, %cst_18 [1] : vector<16x32xf32> to vector<16xf32>
      %26 = vector.shape_cast %25 : vector<16xf32> to vector<16x1xf32>
      %cst_19 = arith.constant 3.200000e+01 : f32
      %27 = vector.broadcast %cst_19 : f32 to vector<16x1xf32>
      %28 = arith.divf %26, %27 : vector<16x1xf32>
      %29 = vector.broadcast %21 : vector<16x1xf32> to vector<16x32xf32>
      %30 = arith.subf %17, %29 : vector<16x32xf32>
      %cst_20 = arith.constant 9.99999974E-6 : f32
      %31 = vector.broadcast %cst_20 : f32 to vector<16x1xf32>
      %32 = arith.addf %28, %31 : vector<16x1xf32>
      %33 = math.rsqrt %32 : vector<16x1xf32>
      %34 = vector.broadcast %33 : vector<16x1xf32> to vector<16x32xf32>
      %35 = arith.mulf %30, %34 : vector<16x32xf32>
      %c0_21 = arith.constant 0 : index
      %c0_22 = arith.constant 0 : index
      %36 = vector.load %arg6[%c0_21, %c0_22] : memref<1x32xf32, #tpu.memory_space<vmem>>, vector<1x32xf32>
      %37 = vector.broadcast %36 : vector<1x32xf32> to vector<16x32xf32>
      %38 = arith.mulf %35, %37 : vector<16x32xf32>
      %c0_23 = arith.constant 0 : index
      %c0_24 = arith.constant 0 : index
      %39 = vector.load %arg7[%c0_23, %c0_24] : memref<1x32xf32, #tpu.memory_space<vmem>>, vector<1x32xf32>
      %40 = vector.broadcast %39 : vector<1x32xf32> to vector<16x32xf32>
      %41 = arith.addf %38, %40 : vector<16x32xf32>
      %c0_25 = arith.constant 0 : index
      %c0_26 = arith.constant 0 : index
      %42 = vector.load %arg8[%c0_25, %c0_26] : memref<16x32xf32, #tpu.memory_space<vmem>>, vector<16x32xf32>
      tpu.vector_store %arg8[%c0_25, %c0_26], %41 {strides = array<i32>} : memref<16x32xf32, #tpu.memory_space<vmem>>, vector<16x32xf32>,
    } else {
    }
    return
  }
  func.func @transform_0(%arg0: i32, %arg1: i32) -> (i32, i32) {
    %c0_i32 = arith.constant 0 : i32
    return %arg0, %arg1 : i32, i32
  }
  func.func @transform_1(%arg0: i32, %arg1: i32) -> (i32, i32) {
    %c0_i32 = arith.constant 0 : i32
    %c0_i32_0 = arith.constant 0 : i32
    return %arg1, %c0_i32 : i32, i32
  }
  func.func @transform_2(%arg0: i32, %arg1: i32) -> (i32, i32) {
    %c0_i32 = arith.constant 0 : i32
    %c0_i32_0 = arith.constant 0 : i32
    %c0_i32_1 = arith.constant 0 : i32
    return %c0_i32, %c0_i32_0 : i32, i32
  }
  func.func @transform_3(%arg0: i32, %arg1: i32) -> (i32, i32) {
    %c0_i32 = arith.constant 0 : i32
    %c0_i32_0 = arith.constant 0 : i32
    return %arg0, %c0_i32 : i32, i32
  }
  func.func @transform_4(%arg0: i32, %arg1: i32) -> (i32, i32) {
    %c0_i32 = arith.constant 0 : i32
    %c0_i32_0 = arith.constant 0 : i32
    %c0_i32_1 = arith.constant 0 : i32
    return %c0_i32, %c0_i32_0 : i32, i32
  }
  func.func @transform_5(%arg0: i32, %arg1: i32) -> (i32, i32) {
    %c0_i32 = arith.constant 0 : i32
    %c0_i32_0 = arith.constant 0 : i32
    %c0_i32_1 = arith.constant 0 : i32
    return %c0_i32, %c0_i32_0 : i32, i32
  }
  func.func @transform_6(%arg0: i32, %arg1: i32) -> (i32, i32) {
    %c0_i32 = arith.constant 0 : i32
    %c0_i32_0 = arith.constant 0 : i32
    return %arg0, %c0_i32 : i32, i32
  }
}

module attributes {stable_mosaic.version = 11 : i64} {
  func.func @_flash_mha_kernel(%arg0: i32, %arg1: i32, %arg2: i32, %arg3: memref<1x8x32xf32, #tpu.memory_space<vmem>>, %arg4: memref<1x8x32xf32, #tpu.memory_space<vmem>>, %arg5: memref<1x8x32xf32, #tpu.memory_space<vmem>>, %arg6: memref<1x8x1xi32, #tpu.memory_space<vmem>>, %arg7: memref<1x1x8xi32, #tpu.memory_space<vmem>>, %arg8: memref<1x8x32xf32, #tpu.memory_space<vmem>>, %arg9: memref<4x8x1xf32, #tpu.memory_space<vmem>>, %arg10: memref<4x8x1xf32, #tpu.memory_space<vmem>>, %arg11: memref<4x8x8xf32, #tpu.memory_space<vmem>>) attributes {dimension_semantics = [#tpu.dimension_semantics<parallel>, #tpu.dimension_semantics<parallel>, #tpu.dimension_semantics<arbitrary>], iteration_bounds = array<i64: 2, 1, 1>, scalar_prefetch = 0 : i64, scratch_operands = 3 : i64, tpu.core_type = #tpu.core_type<tc>, window_params = [{transform_indices = @transform_0, window_bounds = array<i64: 1, 8, 32>}, {transform_indices = @transform_1, window_bounds = array<i64: 1, 8, 32>}, {transform_indices = @transform_2, window_bounds = array<i64: 1, 8, 32>}, {transform_indices = @transform_3, window_bounds = array<i64: 1, 8, 1>}, {transform_indices = @transform_4, window_bounds = array<i64: 1, 1, 8>}, {transform_indices = @transform_5, window_bounds = array<i64: 1, 8, 32>}]} {
    %c0_i32 = arith.constant 0 : i32
    %0 = arith.cmpi eq, %arg2, %c0_i32 : i32
    %1 = arith.extui %0 : i1 to i32
    %c0_i32_0 = arith.constant 0 : i32
    %2 = arith.cmpi ne, %1, %c0_i32_0 : i32
    scf.if %2 {
      %cst_108 = arith.constant 0xFF800000 : f32
      %173 = vector.broadcast %cst_108 : f32 to vector<4x8x1xf32>
      %c0_109 = arith.constant 0 : index
      %c0_110 = arith.constant 0 : index
      %c0_111 = arith.constant 0 : index
      %174 = vector.load %arg9[%c0_109, %c0_110, %c0_111] : memref<4x8x1xf32, #tpu.memory_space<vmem>>, vector<4x8x1xf32>
      tpu.vector_store %arg9[%c0_109, %c0_110, %c0_111], %173 {strides = array<i32>} : memref<4x8x1xf32, #tpu.memory_space<vmem>>, vector<4x8x1xf32>,
      %cst_112 = arith.constant 0.000000e+00 : f32
      %175 = vector.broadcast %cst_112 : f32 to vector<4x8x1xf32>
      %c0_113 = arith.constant 0 : index
      %c0_114 = arith.constant 0 : index
      %c0_115 = arith.constant 0 : index
      %176 = vector.load %arg10[%c0_113, %c0_114, %c0_115] : memref<4x8x1xf32, #tpu.memory_space<vmem>>, vector<4x8x1xf32>
      tpu.vector_store %arg10[%c0_113, %c0_114, %c0_115], %175 {strides = array<i32>} : memref<4x8x1xf32, #tpu.memory_space<vmem>>, vector<4x8x1xf32>,
      %cst_116 = arith.constant 0.000000e+00 : f32
      %177 = vector.broadcast %cst_116 : f32 to vector<4x8x8xf32>
      %c0_117 = arith.constant 0 : index
      %c0_118 = arith.constant 0 : index
      %c0_119 = arith.constant 0 : index
      %178 = vector.load %arg11[%c0_117, %c0_118, %c0_119] : memref<4x8x8xf32, #tpu.memory_space<vmem>>, vector<4x8x8xf32>
      tpu.vector_store %arg11[%c0_117, %c0_118, %c0_119], %177 {strides = array<i32>} : memref<4x8x8xf32, #tpu.memory_space<vmem>>, vector<4x8x8xf32>,
    } else {
    }
    %c0 = arith.constant 0 : index
    %c0_1 = arith.constant 0 : index
    %c0_2 = arith.constant 0 : index
    %3 = vector.load %arg3[%c0, %c0_1, %c0_2] : memref<1x8x32xf32, #tpu.memory_space<vmem>>, vector<1x8x32xf32>
    %4 = vector.shape_cast %3 : vector<1x8x32xf32> to vector<8x32xf32>
    %cst = arith.constant 0.353553385 : f32
    %5 = vector.broadcast %cst : f32 to vector<8x32xf32>
    %6 = arith.mulf %4, %5 : vector<8x32xf32>
    %c0_3 = arith.constant 0 : index
    %c0_4 = arith.constant 0 : index
    %c0_5 = arith.constant 0 : index
    %7 = vector.load %arg4[%c0_3, %c0_4, %c0_5] : memref<1x8x32xf32, #tpu.memory_space<vmem>>, vector<1x8x32xf32>
    %8 = vector.shape_cast %7 : vector<1x8x32xf32> to vector<8x32xf32>
    %c0_6 = arith.constant 0 : index
    %c0_7 = arith.constant 0 : index
    %c0_8 = arith.constant 0 : index
    %9 = vector.load %arg5[%c0_6, %c0_7, %c0_8] : memref<1x8x32xf32, #tpu.memory_space<vmem>>, vector<1x8x32xf32>
    %10 = vector.shape_cast %9 : vector<1x8x32xf32> to vector<8x32xf32>
    %c0_9 = arith.constant 0 : index
    %c0_10 = arith.constant 0 : index
    %c0_11 = arith.constant 0 : index
    %11 = vector.load %arg6[%c0_9, %c0_10, %c0_11] : memref<1x8x1xi32, #tpu.memory_space<vmem>>, vector<1x8x1xi32>
    %12 = vector.shape_cast %11 : vector<1x8x1xi32> to vector<8x1xi32>
    %c0_i32_12 = arith.constant 0 : i32
    %13 = vector.broadcast %c0_i32_12 : i32 to vector<8x1xi32>
    %14 = arith.cmpi ne, %12, %13 : vector<8x1xi32>
    %c0_13 = arith.constant 0 : index
    %c0_14 = arith.constant 0 : index
    %c0_15 = arith.constant 0 : index
    %15 = vector.load %arg7[%c0_13, %c0_14, %c0_15] : memref<1x1x8xi32, #tpu.memory_space<vmem>>, vector<1x1x8xi32>
    %16 = vector.shape_cast %15 : vector<1x1x8xi32> to vector<1x8xi32>
    %c0_i32_16 = arith.constant 0 : i32
    %17 = vector.broadcast %c0_i32_16 : i32 to vector<1x8xi32>
    %18 = arith.cmpi ne, %16, %17 : vector<1x8xi32>
    %19 = vector.broadcast %14 : vector<8x1xi1> to vector<8x8xi1>
    %20 = vector.broadcast %18 : vector<1x8xi1> to vector<8x8xi1>
    %21 = arith.andi %19, %20 : vector<8x8xi1>
    %22 = vector.extract_strided_slice %6 {offsets = [0, 0], sizes = [8, 8], strides = [1, 1]} : vector<8x32xf32> to vector<8x8xf32>
    %23 = vector.extract_strided_slice %8 {offsets = [0, 0], sizes = [8, 8], strides = [1, 1]} : vector<8x32xf32> to vector<8x8xf32>
    %cst_17 = arith.constant dense<0.000000e+00> : vector<8x8xf32>
    %24 = tpu.matmul %22, %23, %cst_17 {dimension_numbers = #tpu.dot_dimension_numbers<[1], [1], [0], [0], [0, 0, 1, 0], [], []>} : vector<8x8xf32>, vector<8x8xf32>, vector<8x8xf32> -> vector<8x8xf32>
    %cst_18 = arith.constant -1.000000e+09 : f32
    %25 = vector.broadcast %cst_18 : f32 to vector<8x8xf32>
    %26 = arith.select %21, %24, %25 : vector<8x8xi1>, vector<8x8xf32>
    %c0_19 = arith.constant 0 : index
    %c0_20 = arith.constant 0 : index
    %c0_21 = arith.constant 0 : index
    %27 = vector.load %arg9[%c0_19, %c0_20, %c0_21] : memref<4x8x1xf32, #tpu.memory_space<vmem>>, vector<1x8x1xf32>
    %28 = vector.shape_cast %27 : vector<1x8x1xf32> to vector<8x1xf32>
    %cst_22 = arith.constant dense<0xFF800000> : vector<8xf32>
    %29 = vector.multi_reduction <maximumf>, %26, %cst_22 [1] : vector<8x8xf32> to vector<8xf32>
    %30 = vector.shape_cast %29 : vector<8xf32> to vector<8x1xf32>
    %31 = arith.maximumf %28, %30 : vector<8x1xf32>
    %32 = arith.subf %28, %31 : vector<8x1xf32>
    %33 = math.exp %32 : vector<8x1xf32>
    %34 = vector.broadcast %31 : vector<8x1xf32> to vector<8x8xf32>
    %35 = arith.subf %26, %34 : vector<8x8xf32>
    %36 = math.exp %35 : vector<8x8xf32>
    %c0_23 = arith.constant 0 : index
    %c0_24 = arith.constant 0 : index
    %c0_25 = arith.constant 0 : index
    %37 = vector.load %arg10[%c0_23, %c0_24, %c0_25] : memref<4x8x1xf32, #tpu.memory_space<vmem>>, vector<1x8x1xf32>
    %38 = vector.shape_cast %37 : vector<1x8x1xf32> to vector<8x1xf32>
    %39 = arith.mulf %33, %38 : vector<8x1xf32>
    %cst_26 = arith.constant dense<0.000000e+00> : vector<8xf32>
    %40 = vector.multi_reduction <add>, %36, %cst_26 [1] : vector<8x8xf32> to vector<8xf32>
    %41 = vector.shape_cast %40 : vector<8xf32> to vector<8x1xf32>
    %42 = arith.addf %39, %41 : vector<8x1xf32>
    %c0_27 = arith.constant 0 : index
    %c0_28 = arith.constant 0 : index
    %c0_29 = arith.constant 0 : index
    %43 = vector.load %arg10[%c0_27, %c0_28, %c0_29] : memref<4x8x1xf32, #tpu.memory_space<vmem>>, vector<1x8x1xf32>
    %44 = vector.shape_cast %43 : vector<1x8x1xf32> to vector<8x1xf32>
    %45 = vector.shape_cast %42 : vector<8x1xf32> to vector<1x8x1xf32>
    tpu.vector_store %arg10[%c0_27, %c0_28, %c0_29], %45 {strides = array<i32>} : memref<4x8x1xf32, #tpu.memory_space<vmem>>, vector<1x8x1xf32>,
    %c0_30 = arith.constant 0 : index
    %c0_31 = arith.constant 0 : index
    %c0_32 = arith.constant 0 : index
    %46 = vector.load %arg11[%c0_30, %c0_31, %c0_32] : memref<4x8x8xf32, #tpu.memory_space<vmem>>, vector<1x8x8xf32>
    %47 = vector.shape_cast %46 : vector<1x8x8xf32> to vector<8x8xf32>
    %48 = vector.broadcast %33 : vector<8x1xf32> to vector<8x8xf32>
    %49 = arith.mulf %48, %47 : vector<8x8xf32>
    %50 = vector.extract_strided_slice %10 {offsets = [0, 0], sizes = [8, 8], strides = [1, 1]} : vector<8x32xf32> to vector<8x8xf32>
    %cst_33 = arith.constant dense<0.000000e+00> : vector<8x8xf32>
    %51 = tpu.matmul %36, %50, %cst_33 {dimension_numbers = #tpu.dot_dimension_numbers<[1], [0], [0], [1], [0, 0, 1, 1], [], []>} : vector<8x8xf32>, vector<8x8xf32>, vector<8x8xf32> -> vector<8x8xf32>
    %52 = arith.addf %49, %51 : vector<8x8xf32>
    %c0_34 = arith.constant 0 : index
    %c0_35 = arith.constant 0 : index
    %c0_36 = arith.constant 0 : index
    %53 = vector.load %arg11[%c0_34, %c0_35, %c0_36] : memref<4x8x8xf32, #tpu.memory_space<vmem>>, vector<1x8x8xf32>
    %54 = vector.shape_cast %53 : vector<1x8x8xf32> to vector<8x8xf32>
    %55 = vector.shape_cast %52 : vector<8x8xf32> to vector<1x8x8xf32>
    tpu.vector_store %arg11[%c0_34, %c0_35, %c0_36], %55 {strides = array<i32>} : memref<4x8x8xf32, #tpu.memory_space<vmem>>, vector<1x8x8xf32>,
    %c0_37 = arith.constant 0 : index
    %c0_38 = arith.constant 0 : index
    %c0_39 = arith.constant 0 : index
    %56 = vector.load %arg9[%c0_37, %c0_38, %c0_39] : memref<4x8x1xf32, #tpu.memory_space<vmem>>, vector<1x8x1xf32>
    %57 = vector.shape_cast %56 : vector<1x8x1xf32> to vector<8x1xf32>
    %58 = vector.shape_cast %31 : vector<8x1xf32> to vector<1x8x1xf32>
    tpu.vector_store %arg9[%c0_37, %c0_38, %c0_39], %58 {strides = array<i32>} : memref<4x8x1xf32, #tpu.memory_space<vmem>>, vector<1x8x1xf32>,
    %59 = vector.extract_strided_slice %6 {offsets = [0, 8], sizes = [8, 8], strides = [1, 1]} : vector<8x32xf32> to vector<8x8xf32>
    %60 = vector.extract_strided_slice %8 {offsets = [0, 8], sizes = [8, 8], strides = [1, 1]} : vector<8x32xf32> to vector<8x8xf32>
    %cst_40 = arith.constant dense<0.000000e+00> : vector<8x8xf32>
    %61 = tpu.matmul %59, %60, %cst_40 {dimension_numbers = #tpu.dot_dimension_numbers<[1], [1], [0], [0], [0, 0, 1, 0], [], []>} : vector<8x8xf32>, vector<8x8xf32>, vector<8x8xf32> -> vector<8x8xf32>
    %cst_41 = arith.constant -1.000000e+09 : f32
    %62 = vector.broadcast %cst_41 : f32 to vector<8x8xf32>
    %63 = arith.select %21, %61, %62 : vector<8x8xi1>, vector<8x8xf32>
    %c1 = arith.constant 1 : index
    %c0_42 = arith.constant 0 : index
    %c0_43 = arith.constant 0 : index
    %64 = vector.load %arg9[%c1, %c0_42, %c0_43] : memref<4x8x1xf32, #tpu.memory_space<vmem>>, vector<1x8x1xf32>
    %65 = vector.shape_cast %64 : vector<1x8x1xf32> to vector<8x1xf32>
    %cst_44 = arith.constant dense<0xFF800000> : vector<8xf32>
    %66 = vector.multi_reduction <maximumf>, %63, %cst_44 [1] : vector<8x8xf32> to vector<8xf32>
    %67 = vector.shape_cast %66 : vector<8xf32> to vector<8x1xf32>
    %68 = arith.maximumf %65, %67 : vector<8x1xf32>
    %69 = arith.subf %65, %68 : vector<8x1xf32>
    %70 = math.exp %69 : vector<8x1xf32>
    %71 = vector.broadcast %68 : vector<8x1xf32> to vector<8x8xf32>
    %72 = arith.subf %63, %71 : vector<8x8xf32>
    %73 = math.exp %72 : vector<8x8xf32>
    %c1_45 = arith.constant 1 : index
    %c0_46 = arith.constant 0 : index
    %c0_47 = arith.constant 0 : index
    %74 = vector.load %arg10[%c1_45, %c0_46, %c0_47] : memref<4x8x1xf32, #tpu.memory_space<vmem>>, vector<1x8x1xf32>
    %75 = vector.shape_cast %74 : vector<1x8x1xf32> to vector<8x1xf32>
    %76 = arith.mulf %70, %75 : vector<8x1xf32>
    %cst_48 = arith.constant dense<0.000000e+00> : vector<8xf32>
    %77 = vector.multi_reduction <add>, %73, %cst_48 [1] : vector<8x8xf32> to vector<8xf32>
    %78 = vector.shape_cast %77 : vector<8xf32> to vector<8x1xf32>
    %79 = arith.addf %76, %78 : vector<8x1xf32>
    %c1_49 = arith.constant 1 : index
    %c0_50 = arith.constant 0 : index
    %c0_51 = arith.constant 0 : index
    %80 = vector.load %arg10[%c1_49, %c0_50, %c0_51] : memref<4x8x1xf32, #tpu.memory_space<vmem>>, vector<1x8x1xf32>
    %81 = vector.shape_cast %80 : vector<1x8x1xf32> to vector<8x1xf32>
    %82 = vector.shape_cast %79 : vector<8x1xf32> to vector<1x8x1xf32>
    tpu.vector_store %arg10[%c1_49, %c0_50, %c0_51], %82 {strides = array<i32>} : memref<4x8x1xf32, #tpu.memory_space<vmem>>, vector<1x8x1xf32>,
    %c1_52 = arith.constant 1 : index
    %c0_53 = arith.constant 0 : index
    %c0_54 = arith.constant 0 : index
    %83 = vector.load %arg11[%c1_52, %c0_53, %c0_54] : memref<4x8x8xf32, #tpu.memory_space<vmem>>, vector<1x8x8xf32>
    %84 = vector.shape_cast %83 : vector<1x8x8xf32> to vector<8x8xf32>
    %85 = vector.broadcast %70 : vector<8x1xf32> to vector<8x8xf32>
    %86 = arith.mulf %85, %84 : vector<8x8xf32>
    %87 = vector.extract_strided_slice %10 {offsets = [0, 8], sizes = [8, 8], strides = [1, 1]} : vector<8x32xf32> to vector<8x8xf32>
    %cst_55 = arith.constant dense<0.000000e+00> : vector<8x8xf32>
    %88 = tpu.matmul %73, %87, %cst_55 {dimension_numbers = #tpu.dot_dimension_numbers<[1], [0], [0], [1], [0, 0, 1, 1], [], []>} : vector<8x8xf32>, vector<8x8xf32>, vector<8x8xf32> -> vector<8x8xf32>
    %89 = arith.addf %86, %88 : vector<8x8xf32>
    %c1_56 = arith.constant 1 : index
    %c0_57 = arith.constant 0 : index
    %c0_58 = arith.constant 0 : index
    %90 = vector.load %arg11[%c1_56, %c0_57, %c0_58] : memref<4x8x8xf32, #tpu.memory_space<vmem>>, vector<1x8x8xf32>
    %91 = vector.shape_cast %90 : vector<1x8x8xf32> to vector<8x8xf32>
    %92 = vector.shape_cast %89 : vector<8x8xf32> to vector<1x8x8xf32>
    tpu.vector_store %arg11[%c1_56, %c0_57, %c0_58], %92 {strides = array<i32>} : memref<4x8x8xf32, #tpu.memory_space<vmem>>, vector<1x8x8xf32>,
    %c1_59 = arith.constant 1 : index
    %c0_60 = arith.constant 0 : index
    %c0_61 = arith.constant 0 : index
    %93 = vector.load %arg9[%c1_59, %c0_60, %c0_61] : memref<4x8x1xf32, #tpu.memory_space<vmem>>, vector<1x8x1xf32>
    %94 = vector.shape_cast %93 : vector<1x8x1xf32> to vector<8x1xf32>
    %95 = vector.shape_cast %68 : vector<8x1xf32> to vector<1x8x1xf32>
    tpu.vector_store %arg9[%c1_59, %c0_60, %c0_61], %95 {strides = array<i32>} : memref<4x8x1xf32, #tpu.memory_space<vmem>>, vector<1x8x1xf32>,
    %96 = vector.extract_strided_slice %6 {offsets = [0, 16], sizes = [8, 8], strides = [1, 1]} : vector<8x32xf32> to vector<8x8xf32>
    %97 = vector.extract_strided_slice %8 {offsets = [0, 16], sizes = [8, 8], strides = [1, 1]} : vector<8x32xf32> to vector<8x8xf32>
    %cst_62 = arith.constant dense<0.000000e+00> : vector<8x8xf32>
    %98 = tpu.matmul %96, %97, %cst_62 {dimension_numbers = #tpu.dot_dimension_numbers<[1], [1], [0], [0], [0, 0, 1, 0], [], []>} : vector<8x8xf32>, vector<8x8xf32>, vector<8x8xf32> -> vector<8x8xf32>
    %cst_63 = arith.constant -1.000000e+09 : f32
    %99 = vector.broadcast %cst_63 : f32 to vector<8x8xf32>
    %100 = arith.select %21, %98, %99 : vector<8x8xi1>, vector<8x8xf32>
    %c2 = arith.constant 2 : index
    %c0_64 = arith.constant 0 : index
    %c0_65 = arith.constant 0 : index
    %101 = vector.load %arg9[%c2, %c0_64, %c0_65] : memref<4x8x1xf32, #tpu.memory_space<vmem>>, vector<1x8x1xf32>
    %102 = vector.shape_cast %101 : vector<1x8x1xf32> to vector<8x1xf32>
    %cst_66 = arith.constant dense<0xFF800000> : vector<8xf32>
    %103 = vector.multi_reduction <maximumf>, %100, %cst_66 [1] : vector<8x8xf32> to vector<8xf32>
    %104 = vector.shape_cast %103 : vector<8xf32> to vector<8x1xf32>
    %105 = arith.maximumf %102, %104 : vector<8x1xf32>
    %106 = arith.subf %102, %105 : vector<8x1xf32>
    %107 = math.exp %106 : vector<8x1xf32>
    %108 = vector.broadcast %105 : vector<8x1xf32> to vector<8x8xf32>
    %109 = arith.subf %100, %108 : vector<8x8xf32>
    %110 = math.exp %109 : vector<8x8xf32>
    %c2_67 = arith.constant 2 : index
    %c0_68 = arith.constant 0 : index
    %c0_69 = arith.constant 0 : index
    %111 = vector.load %arg10[%c2_67, %c0_68, %c0_69] : memref<4x8x1xf32, #tpu.memory_space<vmem>>, vector<1x8x1xf32>
    %112 = vector.shape_cast %111 : vector<1x8x1xf32> to vector<8x1xf32>
    %113 = arith.mulf %107, %112 : vector<8x1xf32>
    %cst_70 = arith.constant dense<0.000000e+00> : vector<8xf32>
    %114 = vector.multi_reduction <add>, %110, %cst_70 [1] : vector<8x8xf32> to vector<8xf32>
    %115 = vector.shape_cast %114 : vector<8xf32> to vector<8x1xf32>
    %116 = arith.addf %113, %115 : vector<8x1xf32>
    %c2_71 = arith.constant 2 : index
    %c0_72 = arith.constant 0 : index
    %c0_73 = arith.constant 0 : index
    %117 = vector.load %arg10[%c2_71, %c0_72, %c0_73] : memref<4x8x1xf32, #tpu.memory_space<vmem>>, vector<1x8x1xf32>
    %118 = vector.shape_cast %117 : vector<1x8x1xf32> to vector<8x1xf32>
    %119 = vector.shape_cast %116 : vector<8x1xf32> to vector<1x8x1xf32>
    tpu.vector_store %arg10[%c2_71, %c0_72, %c0_73], %119 {strides = array<i32>} : memref<4x8x1xf32, #tpu.memory_space<vmem>>, vector<1x8x1xf32>,
    %c2_74 = arith.constant 2 : index
    %c0_75 = arith.constant 0 : index
    %c0_76 = arith.constant 0 : index
    %120 = vector.load %arg11[%c2_74, %c0_75, %c0_76] : memref<4x8x8xf32, #tpu.memory_space<vmem>>, vector<1x8x8xf32>
    %121 = vector.shape_cast %120 : vector<1x8x8xf32> to vector<8x8xf32>
    %122 = vector.broadcast %107 : vector<8x1xf32> to vector<8x8xf32>
    %123 = arith.mulf %122, %121 : vector<8x8xf32>
    %124 = vector.extract_strided_slice %10 {offsets = [0, 16], sizes = [8, 8], strides = [1, 1]} : vector<8x32xf32> to vector<8x8xf32>
    %cst_77 = arith.constant dense<0.000000e+00> : vector<8x8xf32>
    %125 = tpu.matmul %110, %124, %cst_77 {dimension_numbers = #tpu.dot_dimension_numbers<[1], [0], [0], [1], [0, 0, 1, 1], [], []>} : vector<8x8xf32>, vector<8x8xf32>, vector<8x8xf32> -> vector<8x8xf32>
    %126 = arith.addf %123, %125 : vector<8x8xf32>
    %c2_78 = arith.constant 2 : index
    %c0_79 = arith.constant 0 : index
    %c0_80 = arith.constant 0 : index
    %127 = vector.load %arg11[%c2_78, %c0_79, %c0_80] : memref<4x8x8xf32, #tpu.memory_space<vmem>>, vector<1x8x8xf32>
    %128 = vector.shape_cast %127 : vector<1x8x8xf32> to vector<8x8xf32>
    %129 = vector.shape_cast %126 : vector<8x8xf32> to vector<1x8x8xf32>
    tpu.vector_store %arg11[%c2_78, %c0_79, %c0_80], %129 {strides = array<i32>} : memref<4x8x8xf32, #tpu.memory_space<vmem>>, vector<1x8x8xf32>,
    %c2_81 = arith.constant 2 : index
    %c0_82 = arith.constant 0 : index
    %c0_83 = arith.constant 0 : index
    %130 = vector.load %arg9[%c2_81, %c0_82, %c0_83] : memref<4x8x1xf32, #tpu.memory_space<vmem>>, vector<1x8x1xf32>
    %131 = vector.shape_cast %130 : vector<1x8x1xf32> to vector<8x1xf32>
    %132 = vector.shape_cast %105 : vector<8x1xf32> to vector<1x8x1xf32>
    tpu.vector_store %arg9[%c2_81, %c0_82, %c0_83], %132 {strides = array<i32>} : memref<4x8x1xf32, #tpu.memory_space<vmem>>, vector<1x8x1xf32>,
    %133 = vector.extract_strided_slice %6 {offsets = [0, 24], sizes = [8, 8], strides = [1, 1]} : vector<8x32xf32> to vector<8x8xf32>
    %134 = vector.extract_strided_slice %8 {offsets = [0, 24], sizes = [8, 8], strides = [1, 1]} : vector<8x32xf32> to vector<8x8xf32>
    %cst_84 = arith.constant dense<0.000000e+00> : vector<8x8xf32>
    %135 = tpu.matmul %133, %134, %cst_84 {dimension_numbers = #tpu.dot_dimension_numbers<[1], [1], [0], [0], [0, 0, 1, 0], [], []>} : vector<8x8xf32>, vector<8x8xf32>, vector<8x8xf32> -> vector<8x8xf32>
    %cst_85 = arith.constant -1.000000e+09 : f32
    %136 = vector.broadcast %cst_85 : f32 to vector<8x8xf32>
    %137 = arith.select %21, %135, %136 : vector<8x8xi1>, vector<8x8xf32>
    %c3 = arith.constant 3 : index
    %c0_86 = arith.constant 0 : index
    %c0_87 = arith.constant 0 : index
    %138 = vector.load %arg9[%c3, %c0_86, %c0_87] : memref<4x8x1xf32, #tpu.memory_space<vmem>>, vector<1x8x1xf32>
    %139 = vector.shape_cast %138 : vector<1x8x1xf32> to vector<8x1xf32>
    %cst_88 = arith.constant dense<0xFF800000> : vector<8xf32>
    %140 = vector.multi_reduction <maximumf>, %137, %cst_88 [1] : vector<8x8xf32> to vector<8xf32>
    %141 = vector.shape_cast %140 : vector<8xf32> to vector<8x1xf32>
    %142 = arith.maximumf %139, %141 : vector<8x1xf32>
    %143 = arith.subf %139, %142 : vector<8x1xf32>
    %144 = math.exp %143 : vector<8x1xf32>
    %145 = vector.broadcast %142 : vector<8x1xf32> to vector<8x8xf32>
    %146 = arith.subf %137, %145 : vector<8x8xf32>
    %147 = math.exp %146 : vector<8x8xf32>
    %c3_89 = arith.constant 3 : index
    %c0_90 = arith.constant 0 : index
    %c0_91 = arith.constant 0 : index
    %148 = vector.load %arg10[%c3_89, %c0_90, %c0_91] : memref<4x8x1xf32, #tpu.memory_space<vmem>>, vector<1x8x1xf32>
    %149 = vector.shape_cast %148 : vector<1x8x1xf32> to vector<8x1xf32>
    %150 = arith.mulf %144, %149 : vector<8x1xf32>
    %cst_92 = arith.constant dense<0.000000e+00> : vector<8xf32>
    %151 = vector.multi_reduction <add>, %147, %cst_92 [1] : vector<8x8xf32> to vector<8xf32>
    %152 = vector.shape_cast %151 : vector<8xf32> to vector<8x1xf32>
    %153 = arith.addf %150, %152 : vector<8x1xf32>
    %c3_93 = arith.constant 3 : index
    %c0_94 = arith.constant 0 : index
    %c0_95 = arith.constant 0 : index
    %154 = vector.load %arg10[%c3_93, %c0_94, %c0_95] : memref<4x8x1xf32, #tpu.memory_space<vmem>>, vector<1x8x1xf32>
    %155 = vector.shape_cast %154 : vector<1x8x1xf32> to vector<8x1xf32>
    %156 = vector.shape_cast %153 : vector<8x1xf32> to vector<1x8x1xf32>
    tpu.vector_store %arg10[%c3_93, %c0_94, %c0_95], %156 {strides = array<i32>} : memref<4x8x1xf32, #tpu.memory_space<vmem>>, vector<1x8x1xf32>,
    %c3_96 = arith.constant 3 : index
    %c0_97 = arith.constant 0 : index
    %c0_98 = arith.constant 0 : index
    %157 = vector.load %arg11[%c3_96, %c0_97, %c0_98] : memref<4x8x8xf32, #tpu.memory_space<vmem>>, vector<1x8x8xf32>
    %158 = vector.shape_cast %157 : vector<1x8x8xf32> to vector<8x8xf32>
    %159 = vector.broadcast %144 : vector<8x1xf32> to vector<8x8xf32>
    %160 = arith.mulf %159, %158 : vector<8x8xf32>
    %161 = vector.extract_strided_slice %10 {offsets = [0, 24], sizes = [8, 8], strides = [1, 1]} : vector<8x32xf32> to vector<8x8xf32>
    %cst_99 = arith.constant dense<0.000000e+00> : vector<8x8xf32>
    %162 = tpu.matmul %147, %161, %cst_99 {dimension_numbers = #tpu.dot_dimension_numbers<[1], [0], [0], [1], [0, 0, 1, 1], [], []>} : vector<8x8xf32>, vector<8x8xf32>, vector<8x8xf32> -> vector<8x8xf32>
    %163 = arith.addf %160, %162 : vector<8x8xf32>
    %c3_100 = arith.constant 3 : index
    %c0_101 = arith.constant 0 : index
    %c0_102 = arith.constant 0 : index
    %164 = vector.load %arg11[%c3_100, %c0_101, %c0_102] : memref<4x8x8xf32, #tpu.memory_space<vmem>>, vector<1x8x8xf32>
    %165 = vector.shape_cast %164 : vector<1x8x8xf32> to vector<8x8xf32>
    %166 = vector.shape_cast %163 : vector<8x8xf32> to vector<1x8x8xf32>
    tpu.vector_store %arg11[%c3_100, %c0_101, %c0_102], %166 {strides = array<i32>} : memref<4x8x8xf32, #tpu.memory_space<vmem>>, vector<1x8x8xf32>,
    %c3_103 = arith.constant 3 : index
    %c0_104 = arith.constant 0 : index
    %c0_105 = arith.constant 0 : index
    %167 = vector.load %arg9[%c3_103, %c0_104, %c0_105] : memref<4x8x1xf32, #tpu.memory_space<vmem>>, vector<1x8x1xf32>
    %168 = vector.shape_cast %167 : vector<1x8x1xf32> to vector<8x1xf32>
    %169 = vector.shape_cast %142 : vector<8x1xf32> to vector<1x8x1xf32>
    tpu.vector_store %arg9[%c3_103, %c0_104, %c0_105], %169 {strides = array<i32>} : memref<4x8x1xf32, #tpu.memory_space<vmem>>, vector<1x8x1xf32>,
    %c0_i32_106 = arith.constant 0 : i32
    %170 = arith.cmpi eq, %arg2, %c0_i32_106 : i32
    %171 = arith.extui %170 : i1 to i32
    %c0_i32_107 = arith.constant 0 : i32
    %172 = arith.cmpi ne, %171, %c0_i32_107 : i32
    scf.if %172 {
      %c0_108 = arith.constant 0 : index
      %c0_109 = arith.constant 0 : index
      %c0_110 = arith.constant 0 : index
      %173 = vector.load %arg11[%c0_108, %c0_109, %c0_110] : memref<4x8x8xf32, #tpu.memory_space<vmem>>, vector<1x8x8xf32>
      %174 = vector.shape_cast %173 : vector<1x8x8xf32> to vector<8x8xf32>
      %c0_111 = arith.constant 0 : index
      %c0_112 = arith.constant 0 : index
      %c0_113 = arith.constant 0 : index
      %175 = vector.load %arg10[%c0_111, %c0_112, %c0_113] : memref<4x8x1xf32, #tpu.memory_space<vmem>>, vector<1x8x1xf32>
      %176 = vector.shape_cast %175 : vector<1x8x1xf32> to vector<8x1xf32>
      %177 = tpu.reciprocal %176 {approx = true} : vector<8x1xf32> -> vector<8x1xf32>
      %178 = vector.broadcast %177 : vector<8x1xf32> to vector<8x8xf32>
      %179 = arith.mulf %174, %178 : vector<8x8xf32>
      %c1_114 = arith.constant 1 : index
      %c0_115 = arith.constant 0 : index
      %c0_116 = arith.constant 0 : index
      %180 = vector.load %arg11[%c1_114, %c0_115, %c0_116] : memref<4x8x8xf32, #tpu.memory_space<vmem>>, vector<1x8x8xf32>
      %181 = vector.shape_cast %180 : vector<1x8x8xf32> to vector<8x8xf32>
      %c1_117 = arith.constant 1 : index
      %c0_118 = arith.constant 0 : index
      %c0_119 = arith.constant 0 : index
      %182 = vector.load %arg10[%c1_117, %c0_118, %c0_119] : memref<4x8x1xf32, #tpu.memory_space<vmem>>, vector<1x8x1xf32>
      %183 = vector.shape_cast %182 : vector<1x8x1xf32> to vector<8x1xf32>
      %184 = tpu.reciprocal %183 {approx = true} : vector<8x1xf32> -> vector<8x1xf32>
      %185 = vector.broadcast %184 : vector<8x1xf32> to vector<8x8xf32>
      %186 = arith.mulf %181, %185 : vector<8x8xf32>
      %c2_120 = arith.constant 2 : index
      %c0_121 = arith.constant 0 : index
      %c0_122 = arith.constant 0 : index
      %187 = vector.load %arg11[%c2_120, %c0_121, %c0_122] : memref<4x8x8xf32, #tpu.memory_space<vmem>>, vector<1x8x8xf32>
      %188 = vector.shape_cast %187 : vector<1x8x8xf32> to vector<8x8xf32>
      %c2_123 = arith.constant 2 : index
      %c0_124 = arith.constant 0 : index
      %c0_125 = arith.constant 0 : index
      %189 = vector.load %arg10[%c2_123, %c0_124, %c0_125] : memref<4x8x1xf32, #tpu.memory_space<vmem>>, vector<1x8x1xf32>
      %190 = vector.shape_cast %189 : vector<1x8x1xf32> to vector<8x1xf32>
      %191 = tpu.reciprocal %190 {approx = true} : vector<8x1xf32> -> vector<8x1xf32>
      %192 = vector.broadcast %191 : vector<8x1xf32> to vector<8x8xf32>
      %193 = arith.mulf %188, %192 : vector<8x8xf32>
      %c3_126 = arith.constant 3 : index
      %c0_127 = arith.constant 0 : index
      %c0_128 = arith.constant 0 : index
      %194 = vector.load %arg11[%c3_126, %c0_127, %c0_128] : memref<4x8x8xf32, #tpu.memory_space<vmem>>, vector<1x8x8xf32>
      %195 = vector.shape_cast %194 : vector<1x8x8xf32> to vector<8x8xf32>
      %c3_129 = arith.constant 3 : index
      %c0_130 = arith.constant 0 : index
      %c0_131 = arith.constant 0 : index
      %196 = vector.load %arg10[%c3_129, %c0_130, %c0_131] : memref<4x8x1xf32, #tpu.memory_space<vmem>>, vector<1x8x1xf32>
      %197 = vector.shape_cast %196 : vector<1x8x1xf32> to vector<8x1xf32>
      %198 = tpu.reciprocal %197 {approx = true} : vector<8x1xf32> -> vector<8x1xf32>
      %199 = vector.broadcast %198 : vector<8x1xf32> to vector<8x8xf32>
      %200 = arith.mulf %195, %199 : vector<8x8xf32>
      %201 = tpu.concatenate %179, %186, %193, %200 in 1 : vector<8x8xf32>, vector<8x8xf32>, vector<8x8xf32>, vector<8x8xf32> -> vector<8x32xf32>
      %c0_132 = arith.constant 0 : index
      %c0_133 = arith.constant 0 : index
      %c0_134 = arith.constant 0 : index
      %202 = vector.load %arg8[%c0_132, %c0_133, %c0_134] : memref<1x8x32xf32, #tpu.memory_space<vmem>>, vector<1x8x32xf32>
      %203 = vector.shape_cast %202 : vector<1x8x32xf32> to vector<8x32xf32>
      %204 = vector.shape_cast %201 : vector<8x32xf32> to vector<1x8x32xf32>
      tpu.vector_store %arg8[%c0_132, %c0_133, %c0_134], %204 {strides = array<i32>} : memref<1x8x32xf32, #tpu.memory_space<vmem>>, vector<1x8x32xf32>,
    } else {
    }
    return
  }
  func.func @transform_0(%arg0: i32, %arg1: i32, %arg2: i32) -> (i32, i32, i32) {
    %c0_i32 = arith.constant 0 : i32
    %c0_i32_0 = arith.constant 0 : i32
    return %arg0, %arg1, %c0_i32 : i32, i32, i32
  }
  func.func @transform_1(%arg0: i32, %arg1: i32, %arg2: i32) -> (i32, i32, i32) {
    %c0_i32 = arith.constant 0 : i32
    %c0_i32_0 = arith.constant 0 : i32
    return %arg0, %arg2, %c0_i32 : i32, i32, i32
  }
  func.func @transform_2(%arg0: i32, %arg1: i32, %arg2: i32) -> (i32, i32, i32) {
    %c0_i32 = arith.constant 0 : i32
    %c0_i32_0 = arith.constant 0 : i32
    return %arg0, %arg2, %c0_i32 : i32, i32, i32
  }
  func.func @transform_3(%arg0: i32, %arg1: i32, %arg2: i32) -> (i32, i32, i32) {
    %c0_i32 = arith.constant 0 : i32
    %c0_i32_0 = arith.constant 0 : i32
    return %arg0, %arg1, %c0_i32 : i32, i32, i32
  }
  func.func @transform_4(%arg0: i32, %arg1: i32, %arg2: i32) -> (i32, i32, i32) {
    %c0_i32 = arith.constant 0 : i32
    %c0_i32_0 = arith.constant 0 : i32
    return %arg0, %c0_i32, %arg2 : i32, i32, i32
  }
  func.func @transform_5(%arg0: i32, %arg1: i32, %arg2: i32) -> (i32, i32, i32) {
    %c0_i32 = arith.constant 0 : i32
    %c0_i32_0 = arith.constant 0 : i32
    return %arg0, %arg1, %c0_i32 : i32, i32, i32
  }
}

module attributes {stable_mosaic.version = 11 : i64} {
  func.func @_ffn_addnorm_kernel(%arg0: i32, %arg1: memref<16x32xf32, #tpu.memory_space<vmem>>, %arg2: memref<32x64xf32, #tpu.memory_space<vmem>>, %arg3: memref<1x64xf32, #tpu.memory_space<vmem>>, %arg4: memref<64x32xf32, #tpu.memory_space<vmem>>, %arg5: memref<1x32xf32, #tpu.memory_space<vmem>>, %arg6: memref<1x32xf32, #tpu.memory_space<vmem>>, %arg7: memref<1x32xf32, #tpu.memory_space<vmem>>, %arg8: memref<16x32xf32, #tpu.memory_space<vmem>>) attributes {dimension_semantics = [#tpu.dimension_semantics<parallel>], iteration_bounds = array<i64: 1>, scalar_prefetch = 0 : i64, scratch_operands = 0 : i64, tpu.core_type = #tpu.core_type<tc>, window_params = [{transform_indices = @transform_0, window_bounds = array<i64: 16, 32>}, {pipeline_mode = #tpu.pipeline_mode<synchronous>, transform_indices = @transform_1, window_bounds = array<i64: 32, 64>}, {pipeline_mode = #tpu.pipeline_mode<synchronous>, transform_indices = @transform_2, window_bounds = array<i64: 1, 64>}, {pipeline_mode = #tpu.pipeline_mode<synchronous>, transform_indices = @transform_3, window_bounds = array<i64: 64, 32>}, {pipeline_mode = #tpu.pipeline_mode<synchronous>, transform_indices = @transform_4, window_bounds = array<i64: 1, 32>}, {pipeline_mode = #tpu.pipeline_mode<synchronous>, transform_indices = @transform_5, window_bounds = array<i64: 1, 32>}, {pipeline_mode = #tpu.pipeline_mode<synchronous>, transform_indices = @transform_6, window_bounds = array<i64: 1, 32>}, {transform_indices = @transform_7, window_bounds = array<i64: 16, 32>}]} {
    %c0 = arith.constant 0 : index
    %c0_0 = arith.constant 0 : index
    %0 = vector.load %arg1[%c0, %c0_0] : memref<16x32xf32, #tpu.memory_space<vmem>>, vector<16x32xf32>
    %c0_1 = arith.constant 0 : index
    %c0_2 = arith.constant 0 : index
    %1 = vector.load %arg2[%c0_1, %c0_2] : memref<32x64xf32, #tpu.memory_space<vmem>>, vector<32x64xf32>
    %cst = arith.constant dense<0.000000e+00> : vector<16x64xf32>
    %2 = tpu.matmul %0, %1, %cst {dimension_numbers = #tpu.dot_dimension_numbers<[1], [0], [0], [1], [0, 0, 1, 1], [], []>} : vector<16x32xf32>, vector<32x64xf32>, vector<16x64xf32> -> vector<16x64xf32>
    %c0_3 = arith.constant 0 : index
    %c0_4 = arith.constant 0 : index
    %3 = vector.load %arg3[%c0_3, %c0_4] : memref<1x64xf32, #tpu.memory_space<vmem>>, vector<1x64xf32>
    %4 = vector.broadcast %3 : vector<1x64xf32> to vector<16x64xf32>
    %5 = arith.addf %2, %4 : vector<16x64xf32>
    %cst_5 = arith.constant 0.000000e+00 : f32
    %6 = vector.broadcast %cst_5 : f32 to vector<16x64xf32>
    %7 = arith.maximumf %5, %6 : vector<16x64xf32>
    %c0_6 = arith.constant 0 : index
    %c0_7 = arith.constant 0 : index
    %8 = vector.load %arg4[%c0_6, %c0_7] : memref<64x32xf32, #tpu.memory_space<vmem>>, vector<64x32xf32>
    %cst_8 = arith.constant dense<0.000000e+00> : vector<16x32xf32>
    %9 = tpu.matmul %7, %8, %cst_8 {dimension_numbers = #tpu.dot_dimension_numbers<[1], [0], [0], [1], [0, 0, 1, 1], [], []>} : vector<16x64xf32>, vector<64x32xf32>, vector<16x32xf32> -> vector<16x32xf32>
    %10 = arith.addf %0, %9 : vector<16x32xf32>
    %c0_9 = arith.constant 0 : index
    %c0_10 = arith.constant 0 : index
    %11 = vector.load %arg5[%c0_9, %c0_10] : memref<1x32xf32, #tpu.memory_space<vmem>>, vector<1x32xf32>
    %12 = vector.broadcast %11 : vector<1x32xf32> to vector<16x32xf32>
    %13 = arith.addf %10, %12 : vector<16x32xf32>
    %cst_11 = arith.constant dense<0.000000e+00> : vector<16xf32>
    %14 = vector.multi_reduction <add>, %13, %cst_11 [1] : vector<16x32xf32> to vector<16xf32>
    %15 = vector.shape_cast %14 : vector<16xf32> to vector<16x1xf32>
    %cst_12 = arith.constant 3.200000e+01 : f32
    %16 = vector.broadcast %cst_12 : f32 to vector<16x1xf32>
    %17 = arith.divf %15, %16 : vector<16x1xf32>
    %18 = vector.broadcast %17 : vector<16x1xf32> to vector<16x32xf32>
    %19 = arith.subf %13, %18 : vector<16x32xf32>
    %20 = arith.mulf %19, %19 : vector<16x32xf32>
    %cst_13 = arith.constant dense<0.000000e+00> : vector<16xf32>
    %21 = vector.multi_reduction <add>, %20, %cst_13 [1] : vector<16x32xf32> to vector<16xf32>
    %22 = vector.shape_cast %21 : vector<16xf32> to vector<16x1xf32>
    %cst_14 = arith.constant 3.200000e+01 : f32
    %23 = vector.broadcast %cst_14 : f32 to vector<16x1xf32>
    %24 = arith.divf %22, %23 : vector<16x1xf32>
    %25 = vector.broadcast %17 : vector<16x1xf32> to vector<16x32xf32>
    %26 = arith.subf %13, %25 : vector<16x32xf32>
    %cst_15 = arith.constant 9.99999974E-6 : f32
    %27 = vector.broadcast %cst_15 : f32 to vector<16x1xf32>
    %28 = arith.addf %24, %27 : vector<16x1xf32>
    %29 = math.rsqrt %28 : vector<16x1xf32>
    %30 = vector.broadcast %29 : vector<16x1xf32> to vector<16x32xf32>
    %31 = arith.mulf %26, %30 : vector<16x32xf32>
    %c0_16 = arith.constant 0 : index
    %c0_17 = arith.constant 0 : index
    %32 = vector.load %arg6[%c0_16, %c0_17] : memref<1x32xf32, #tpu.memory_space<vmem>>, vector<1x32xf32>
    %33 = vector.broadcast %32 : vector<1x32xf32> to vector<16x32xf32>
    %34 = arith.mulf %31, %33 : vector<16x32xf32>
    %c0_18 = arith.constant 0 : index
    %c0_19 = arith.constant 0 : index
    %35 = vector.load %arg7[%c0_18, %c0_19] : memref<1x32xf32, #tpu.memory_space<vmem>>, vector<1x32xf32>
    %36 = vector.broadcast %35 : vector<1x32xf32> to vector<16x32xf32>
    %37 = arith.addf %34, %36 : vector<16x32xf32>
    %c0_20 = arith.constant 0 : index
    %c0_21 = arith.constant 0 : index
    %38 = vector.load %arg8[%c0_20, %c0_21] : memref<16x32xf32, #tpu.memory_space<vmem>>, vector<16x32xf32>
    tpu.vector_store %arg8[%c0_20, %c0_21], %37 {strides = array<i32>} : memref<16x32xf32, #tpu.memory_space<vmem>>, vector<16x32xf32>,
    return
  }
  func.func @transform_0(%arg0: i32) -> (i32, i32) {
    %c0_i32 = arith.constant 0 : i32
    %c0_i32_0 = arith.constant 0 : i32
    return %arg0, %c0_i32 : i32, i32
  }
  func.func @transform_1(%arg0: i32) -> (i32, i32) {
    %c0_i32 = arith.constant 0 : i32
    %c0_i32_0 = arith.constant 0 : i32
    %c0_i32_1 = arith.constant 0 : i32
    return %c0_i32, %c0_i32_0 : i32, i32
  }
  func.func @transform_2(%arg0: i32) -> (i32, i32) {
    %c0_i32 = arith.constant 0 : i32
    %c0_i32_0 = arith.constant 0 : i32
    %c0_i32_1 = arith.constant 0 : i32
    return %c0_i32, %c0_i32_0 : i32, i32
  }
  func.func @transform_3(%arg0: i32) -> (i32, i32) {
    %c0_i32 = arith.constant 0 : i32
    %c0_i32_0 = arith.constant 0 : i32
    %c0_i32_1 = arith.constant 0 : i32
    return %c0_i32, %c0_i32_0 : i32, i32
  }
  func.func @transform_4(%arg0: i32) -> (i32, i32) {
    %c0_i32 = arith.constant 0 : i32
    %c0_i32_0 = arith.constant 0 : i32
    %c0_i32_1 = arith.constant 0 : i32
    return %c0_i32, %c0_i32_0 : i32, i32
  }
  func.func @transform_5(%arg0: i32) -> (i32, i32) {
    %c0_i32 = arith.constant 0 : i32
    %c0_i32_0 = arith.constant 0 : i32
    %c0_i32_1 = arith.constant 0 : i32
    return %c0_i32, %c0_i32_0 : i32, i32
  }
  func.func @transform_6(%arg0: i32) -> (i32, i32) {
    %c0_i32 = arith.constant 0 : i32
    %c0_i32_0 = arith.constant 0 : i32
    %c0_i32_1 = arith.constant 0 : i32
    return %c0_i32, %c0_i32_0 : i32, i32
  }
  func.func @transform_7(%arg0: i32) -> (i32, i32) {
    %c0_i32 = arith.constant 0 : i32
    %c0_i32_0 = arith.constant 0 : i32
    return %arg0, %c0_i32 : i32, i32
  }
}

module attributes {stable_mosaic.version = 11 : i64} {
  func.func @_linear_kernel(%arg0: i32, %arg1: i32, %arg2: i32, %arg3: memref<16x32xf32, #tpu.memory_space<vmem>>, %arg4: memref<32x64xf32, #tpu.memory_space<vmem>>, %arg5: memref<1x64xf32, #tpu.memory_space<vmem>>, %arg6: memref<16x64xf32, #tpu.memory_space<vmem>>, %arg7: memref<16x64xf32, #tpu.memory_space<vmem>>) attributes {dimension_semantics = [#tpu.dimension_semantics<parallel>, #tpu.dimension_semantics<parallel>, #tpu.dimension_semantics<arbitrary>], iteration_bounds = array<i64: 1, 1, 1>, scalar_prefetch = 0 : i64, scratch_operands = 1 : i64, tpu.core_type = #tpu.core_type<tc>, window_params = [{transform_indices = @transform_0, window_bounds = array<i64: 16, 32>}, {transform_indices = @transform_1, window_bounds = array<i64: 32, 64>}, {transform_indices = @transform_2, window_bounds = array<i64: 1, 64>}, {transform_indices = @transform_3, window_bounds = array<i64: 16, 64>}]} {
    %c0_i32 = arith.constant 0 : i32
    %0 = arith.cmpi eq, %arg2, %c0_i32 : i32
    %1 = arith.extui %0 : i1 to i32
    %c0_i32_0 = arith.constant 0 : i32
    %2 = arith.cmpi ne, %1, %c0_i32_0 : i32
    scf.if %2 {
      %cst_10 = arith.constant 0.000000e+00 : f32
      %12 = vector.broadcast %cst_10 : f32 to vector<16x64xf32>
      %c0_11 = arith.constant 0 : index
      %c0_12 = arith.constant 0 : index
      %13 = vector.load %arg7[%c0_11, %c0_12] : memref<16x64xf32, #tpu.memory_space<vmem>>, vector<16x64xf32>
      tpu.vector_store %arg7[%c0_11, %c0_12], %12 {strides = array<i32>} : memref<16x64xf32, #tpu.memory_space<vmem>>, vector<16x64xf32>,
    } else {
    }
    %c0 = arith.constant 0 : index
    %c0_1 = arith.constant 0 : index
    %3 = vector.load %arg7[%c0, %c0_1] : memref<16x64xf32, #tpu.memory_space<vmem>>, vector<16x64xf32>
    %c0_2 = arith.constant 0 : index
    %c0_3 = arith.constant 0 : index
    %4 = vector.load %arg3[%c0_2, %c0_3] : memref<16x32xf32, #tpu.memory_space<vmem>>, vector<16x32xf32>
    %c0_4 = arith.constant 0 : index
    %c0_5 = arith.constant 0 : index
    %5 = vector.load %arg4[%c0_4, %c0_5] : memref<32x64xf32, #tpu.memory_space<vmem>>, vector<32x64xf32>
    %cst = arith.constant dense<0.000000e+00> : vector<16x64xf32>
    %6 = tpu.matmul %4, %5, %cst {dimension_numbers = #tpu.dot_dimension_numbers<[1], [0], [0], [1], [0, 0, 1, 1], [], []>} : vector<16x32xf32>, vector<32x64xf32>, vector<16x64xf32> -> vector<16x64xf32>
    %7 = arith.addf %3, %6 : vector<16x64xf32>
    %c0_6 = arith.constant 0 : index
    %c0_7 = arith.constant 0 : index
    %8 = vector.load %arg7[%c0_6, %c0_7] : memref<16x64xf32, #tpu.memory_space<vmem>>, vector<16x64xf32>
    tpu.vector_store %arg7[%c0_6, %c0_7], %7 {strides = array<i32>} : memref<16x64xf32, #tpu.memory_space<vmem>>, vector<16x64xf32>,
    %c0_i32_8 = arith.constant 0 : i32
    %9 = arith.cmpi eq, %arg2, %c0_i32_8 : i32
    %10 = arith.extui %9 : i1 to i32
    %c0_i32_9 = arith.constant 0 : i32
    %11 = arith.cmpi ne, %10, %c0_i32_9 : i32
    scf.if %11 {
      %c0_10 = arith.constant 0 : index
      %c0_11 = arith.constant 0 : index
      %12 = vector.load %arg7[%c0_10, %c0_11] : memref<16x64xf32, #tpu.memory_space<vmem>>, vector<16x64xf32>
      %c0_12 = arith.constant 0 : index
      %c0_13 = arith.constant 0 : index
      %13 = vector.load %arg5[%c0_12, %c0_13] : memref<1x64xf32, #tpu.memory_space<vmem>>, vector<1x64xf32>
      %14 = vector.broadcast %13 : vector<1x64xf32> to vector<16x64xf32>
      %15 = arith.addf %12, %14 : vector<16x64xf32>
      %c0_14 = arith.constant 0 : index
      %c0_15 = arith.constant 0 : index
      %16 = vector.load %arg6[%c0_14, %c0_15] : memref<16x64xf32, #tpu.memory_space<vmem>>, vector<16x64xf32>
      tpu.vector_store %arg6[%c0_14, %c0_15], %15 {strides = array<i32>} : memref<16x64xf32, #tpu.memory_space<vmem>>, vector<16x64xf32>,
    } else {
    }
    return
  }
  func.func @transform_0(%arg0: i32, %arg1: i32, %arg2: i32) -> (i32, i32) {
    %c0_i32 = arith.constant 0 : i32
    return %arg0, %arg2 : i32, i32
  }
  func.func @transform_1(%arg0: i32, %arg1: i32, %arg2: i32) -> (i32, i32) {
    %c0_i32 = arith.constant 0 : i32
    return %arg2, %arg1 : i32, i32
  }
  func.func @transform_2(%arg0: i32, %arg1: i32, %arg2: i32) -> (i32, i32) {
    %c0_i32 = arith.constant 0 : i32
    %c0_i32_0 = arith.constant 0 : i32
    return %c0_i32, %arg1 : i32, i32
  }
  func.func @transform_3(%arg0: i32, %arg1: i32, %arg2: i32) -> (i32, i32) {
    %c0_i32 = arith.constant 0 : i32
    return %arg0, %arg1 : i32, i32
  }
}

module attributes {stable_mosaic.version = 11 : i64} {
  func.func @_linear_kernel(%arg0: i32, %arg1: i32, %arg2: i32, %arg3: memref<16x32xf32, #tpu.memory_space<vmem>>, %arg4: memref<32x32xf32, #tpu.memory_space<vmem>>, %arg5: memref<1x32xf32, #tpu.memory_space<vmem>>, %arg6: memref<16x32xf32, #tpu.memory_space<vmem>>, %arg7: memref<16x32xf32, #tpu.memory_space<vmem>>) attributes {dimension_semantics = [#tpu.dimension_semantics<parallel>, #tpu.dimension_semantics<parallel>, #tpu.dimension_semantics<arbitrary>], iteration_bounds = array<i64: 1, 1, 1>, scalar_prefetch = 0 : i64, scratch_operands = 1 : i64, tpu.core_type = #tpu.core_type<tc>, window_params = [{transform_indices = @transform_0, window_bounds = array<i64: 16, 32>}, {transform_indices = @transform_1, window_bounds = array<i64: 32, 32>}, {transform_indices = @transform_2, window_bounds = array<i64: 1, 32>}, {transform_indices = @transform_3, window_bounds = array<i64: 16, 32>}]} {
    %c0_i32 = arith.constant 0 : i32
    %0 = arith.cmpi eq, %arg2, %c0_i32 : i32
    %1 = arith.extui %0 : i1 to i32
    %c0_i32_0 = arith.constant 0 : i32
    %2 = arith.cmpi ne, %1, %c0_i32_0 : i32
    scf.if %2 {
      %cst_10 = arith.constant 0.000000e+00 : f32
      %12 = vector.broadcast %cst_10 : f32 to vector<16x32xf32>
      %c0_11 = arith.constant 0 : index
      %c0_12 = arith.constant 0 : index
      %13 = vector.load %arg7[%c0_11, %c0_12] : memref<16x32xf32, #tpu.memory_space<vmem>>, vector<16x32xf32>
      tpu.vector_store %arg7[%c0_11, %c0_12], %12 {strides = array<i32>} : memref<16x32xf32, #tpu.memory_space<vmem>>, vector<16x32xf32>,
    } else {
    }
    %c0 = arith.constant 0 : index
    %c0_1 = arith.constant 0 : index
    %3 = vector.load %arg7[%c0, %c0_1] : memref<16x32xf32, #tpu.memory_space<vmem>>, vector<16x32xf32>
    %c0_2 = arith.constant 0 : index
    %c0_3 = arith.constant 0 : index
    %4 = vector.load %arg3[%c0_2, %c0_3] : memref<16x32xf32, #tpu.memory_space<vmem>>, vector<16x32xf32>
    %c0_4 = arith.constant 0 : index
    %c0_5 = arith.constant 0 : index
    %5 = vector.load %arg4[%c0_4, %c0_5] : memref<32x32xf32, #tpu.memory_space<vmem>>, vector<32x32xf32>
    %cst = arith.constant dense<0.000000e+00> : vector<16x32xf32>
    %6 = tpu.matmul %4, %5, %cst {dimension_numbers = #tpu.dot_dimension_numbers<[1], [0], [0], [1], [0, 0, 1, 1], [], []>} : vector<16x32xf32>, vector<32x32xf32>, vector<16x32xf32> -> vector<16x32xf32>
    %7 = arith.addf %3, %6 : vector<16x32xf32>
    %c0_6 = arith.constant 0 : index
    %c0_7 = arith.constant 0 : index
    %8 = vector.load %arg7[%c0_6, %c0_7] : memref<16x32xf32, #tpu.memory_space<vmem>>, vector<16x32xf32>
    tpu.vector_store %arg7[%c0_6, %c0_7], %7 {strides = array<i32>} : memref<16x32xf32, #tpu.memory_space<vmem>>, vector<16x32xf32>,
    %c0_i32_8 = arith.constant 0 : i32
    %9 = arith.cmpi eq, %arg2, %c0_i32_8 : i32
    %10 = arith.extui %9 : i1 to i32
    %c0_i32_9 = arith.constant 0 : i32
    %11 = arith.cmpi ne, %10, %c0_i32_9 : i32
    scf.if %11 {
      %c0_10 = arith.constant 0 : index
      %c0_11 = arith.constant 0 : index
      %12 = vector.load %arg7[%c0_10, %c0_11] : memref<16x32xf32, #tpu.memory_space<vmem>>, vector<16x32xf32>
      %c0_12 = arith.constant 0 : index
      %c0_13 = arith.constant 0 : index
      %13 = vector.load %arg5[%c0_12, %c0_13] : memref<1x32xf32, #tpu.memory_space<vmem>>, vector<1x32xf32>
      %14 = vector.broadcast %13 : vector<1x32xf32> to vector<16x32xf32>
      %15 = arith.addf %12, %14 : vector<16x32xf32>
      %c0_14 = arith.constant 0 : index
      %c0_15 = arith.constant 0 : index
      %16 = vector.load %arg6[%c0_14, %c0_15] : memref<16x32xf32, #tpu.memory_space<vmem>>, vector<16x32xf32>
      tpu.vector_store %arg6[%c0_14, %c0_15], %15 {strides = array<i32>} : memref<16x32xf32, #tpu.memory_space<vmem>>, vector<16x32xf32>,
    } else {
    }
    return
  }
  func.func @transform_0(%arg0: i32, %arg1: i32, %arg2: i32) -> (i32, i32) {
    %c0_i32 = arith.constant 0 : i32
    return %arg0, %arg2 : i32, i32
  }
  func.func @transform_1(%arg0: i32, %arg1: i32, %arg2: i32) -> (i32, i32) {
    %c0_i32 = arith.constant 0 : i32
    return %arg2, %arg1 : i32, i32
  }
  func.func @transform_2(%arg0: i32, %arg1: i32, %arg2: i32) -> (i32, i32) {
    %c0_i32 = arith.constant 0 : i32
    %c0_i32_0 = arith.constant 0 : i32
    return %c0_i32, %arg1 : i32, i32
  }
  func.func @transform_3(%arg0: i32, %arg1: i32, %arg2: i32) -> (i32, i32) {
    %c0_i32 = arith.constant 0 : i32
    return %arg0, %arg1 : i32, i32
  }
}

module attributes {stable_mosaic.version = 11 : i64} {
  func.func @_flash_mha_kernel(%arg0: i32, %arg1: i32, %arg2: i32, %arg3: memref<1x8x32xf32, #tpu.memory_space<vmem>>, %arg4: memref<1x8x32xf32, #tpu.memory_space<vmem>>, %arg5: memref<1x8x32xf32, #tpu.memory_space<vmem>>, %arg6: memref<1x8x1xi32, #tpu.memory_space<vmem>>, %arg7: memref<1x1x8xi32, #tpu.memory_space<vmem>>, %arg8: memref<1x8x32xf32, #tpu.memory_space<vmem>>, %arg9: memref<4x8x1xf32, #tpu.memory_space<vmem>>, %arg10: memref<4x8x1xf32, #tpu.memory_space<vmem>>, %arg11: memref<4x8x8xf32, #tpu.memory_space<vmem>>) attributes {dimension_semantics = [#tpu.dimension_semantics<parallel>, #tpu.dimension_semantics<parallel>, #tpu.dimension_semantics<arbitrary>], iteration_bounds = array<i64: 2, 1, 1>, scalar_prefetch = 0 : i64, scratch_operands = 3 : i64, tpu.core_type = #tpu.core_type<tc>, window_params = [{transform_indices = @transform_0, window_bounds = array<i64: 1, 8, 32>}, {transform_indices = @transform_1, window_bounds = array<i64: 1, 8, 32>}, {transform_indices = @transform_2, window_bounds = array<i64: 1, 8, 32>}, {transform_indices = @transform_3, window_bounds = array<i64: 1, 8, 1>}, {transform_indices = @transform_4, window_bounds = array<i64: 1, 1, 8>}, {transform_indices = @transform_5, window_bounds = array<i64: 1, 8, 32>}]} {
    %c0_i32 = arith.constant 0 : i32
    %0 = arith.cmpi eq, %arg2, %c0_i32 : i32
    %1 = arith.extui %0 : i1 to i32
    %c0_i32_0 = arith.constant 0 : i32
    %2 = arith.cmpi ne, %1, %c0_i32_0 : i32
    scf.if %2 {
      %cst_109 = arith.constant 0xFF800000 : f32
      %183 = vector.broadcast %cst_109 : f32 to vector<4x8x1xf32>
      %c0_110 = arith.constant 0 : index
      %c0_111 = arith.constant 0 : index
      %c0_112 = arith.constant 0 : index
      %184 = vector.load %arg9[%c0_110, %c0_111, %c0_112] : memref<4x8x1xf32, #tpu.memory_space<vmem>>, vector<4x8x1xf32>
      tpu.vector_store %arg9[%c0_110, %c0_111, %c0_112], %183 {strides = array<i32>} : memref<4x8x1xf32, #tpu.memory_space<vmem>>, vector<4x8x1xf32>,
      %cst_113 = arith.constant 0.000000e+00 : f32
      %185 = vector.broadcast %cst_113 : f32 to vector<4x8x1xf32>
      %c0_114 = arith.constant 0 : index
      %c0_115 = arith.constant 0 : index
      %c0_116 = arith.constant 0 : index
      %186 = vector.load %arg10[%c0_114, %c0_115, %c0_116] : memref<4x8x1xf32, #tpu.memory_space<vmem>>, vector<4x8x1xf32>
      tpu.vector_store %arg10[%c0_114, %c0_115, %c0_116], %185 {strides = array<i32>} : memref<4x8x1xf32, #tpu.memory_space<vmem>>, vector<4x8x1xf32>,
      %cst_117 = arith.constant 0.000000e+00 : f32
      %187 = vector.broadcast %cst_117 : f32 to vector<4x8x8xf32>
      %c0_118 = arith.constant 0 : index
      %c0_119 = arith.constant 0 : index
      %c0_120 = arith.constant 0 : index
      %188 = vector.load %arg11[%c0_118, %c0_119, %c0_120] : memref<4x8x8xf32, #tpu.memory_space<vmem>>, vector<4x8x8xf32>
      tpu.vector_store %arg11[%c0_118, %c0_119, %c0_120], %187 {strides = array<i32>} : memref<4x8x8xf32, #tpu.memory_space<vmem>>, vector<4x8x8xf32>,
    } else {
    }
    %c0 = arith.constant 0 : index
    %c0_1 = arith.constant 0 : index
    %c0_2 = arith.constant 0 : index
    %3 = vector.load %arg3[%c0, %c0_1, %c0_2] : memref<1x8x32xf32, #tpu.memory_space<vmem>>, vector<1x8x32xf32>
    %4 = vector.shape_cast %3 : vector<1x8x32xf32> to vector<8x32xf32>
    %cst = arith.constant 0.353553385 : f32
    %5 = vector.broadcast %cst : f32 to vector<8x32xf32>
    %6 = arith.mulf %4, %5 : vector<8x32xf32>
    %c0_3 = arith.constant 0 : index
    %c0_4 = arith.constant 0 : index
    %c0_5 = arith.constant 0 : index
    %7 = vector.load %arg4[%c0_3, %c0_4, %c0_5] : memref<1x8x32xf32, #tpu.memory_space<vmem>>, vector<1x8x32xf32>
    %8 = vector.shape_cast %7 : vector<1x8x32xf32> to vector<8x32xf32>
    %c0_6 = arith.constant 0 : index
    %c0_7 = arith.constant 0 : index
    %c0_8 = arith.constant 0 : index
    %9 = vector.load %arg5[%c0_6, %c0_7, %c0_8] : memref<1x8x32xf32, #tpu.memory_space<vmem>>, vector<1x8x32xf32>
    %10 = vector.shape_cast %9 : vector<1x8x32xf32> to vector<8x32xf32>
    %c0_9 = arith.constant 0 : index
    %c0_10 = arith.constant 0 : index
    %c0_11 = arith.constant 0 : index
    %11 = vector.load %arg6[%c0_9, %c0_10, %c0_11] : memref<1x8x1xi32, #tpu.memory_space<vmem>>, vector<1x8x1xi32>
    %12 = vector.shape_cast %11 : vector<1x8x1xi32> to vector<8x1xi32>
    %c0_i32_12 = arith.constant 0 : i32
    %13 = vector.broadcast %c0_i32_12 : i32 to vector<8x1xi32>
    %14 = arith.cmpi ne, %12, %13 : vector<8x1xi32>
    %c0_13 = arith.constant 0 : index
    %c0_14 = arith.constant 0 : index
    %c0_15 = arith.constant 0 : index
    %15 = vector.load %arg7[%c0_13, %c0_14, %c0_15] : memref<1x1x8xi32, #tpu.memory_space<vmem>>, vector<1x1x8xi32>
    %16 = vector.shape_cast %15 : vector<1x1x8xi32> to vector<1x8xi32>
    %c0_i32_16 = arith.constant 0 : i32
    %17 = vector.broadcast %c0_i32_16 : i32 to vector<1x8xi32>
    %18 = arith.cmpi ne, %16, %17 : vector<1x8xi32>
    %19 = vector.broadcast %14 : vector<8x1xi1> to vector<8x8xi1>
    %20 = vector.broadcast %18 : vector<1x8xi1> to vector<8x8xi1>
    %21 = arith.andi %19, %20 : vector<8x8xi1>
    %c8_i32 = arith.constant 8 : i32
    %22 = arith.muli %arg1, %c8_i32 : i32
    %23 = tpu.iota {dimensions = array<i32: 0>} : vector<8x8xi32>
    %24 = vector.broadcast %22 : i32 to vector<8x8xi32>
    %25 = arith.addi %24, %23 : vector<8x8xi32>
    %c8_i32_17 = arith.constant 8 : i32
    %26 = arith.muli %arg2, %c8_i32_17 : i32
    %27 = tpu.iota {dimensions = array<i32: 1>} : vector<8x8xi32>
    %28 = vector.broadcast %26 : i32 to vector<8x8xi32>
    %29 = arith.addi %28, %27 : vector<8x8xi32>
    %30 = arith.cmpi sle, %29, %25 : vector<8x8xi32>
    %31 = arith.andi %21, %30 : vector<8x8xi1>
    %32 = vector.extract_strided_slice %6 {offsets = [0, 0], sizes = [8, 8], strides = [1, 1]} : vector<8x32xf32> to vector<8x8xf32>
    %33 = vector.extract_strided_slice %8 {offsets = [0, 0], sizes = [8, 8], strides = [1, 1]} : vector<8x32xf32> to vector<8x8xf32>
    %cst_18 = arith.constant dense<0.000000e+00> : vector<8x8xf32>
    %34 = tpu.matmul %32, %33, %cst_18 {dimension_numbers = #tpu.dot_dimension_numbers<[1], [1], [0], [0], [0, 0, 1, 0], [], []>} : vector<8x8xf32>, vector<8x8xf32>, vector<8x8xf32> -> vector<8x8xf32>
    %cst_19 = arith.constant -1.000000e+09 : f32
    %35 = vector.broadcast %cst_19 : f32 to vector<8x8xf32>
    %36 = arith.select %31, %34, %35 : vector<8x8xi1>, vector<8x8xf32>
    %c0_20 = arith.constant 0 : index
    %c0_21 = arith.constant 0 : index
    %c0_22 = arith.constant 0 : index
    %37 = vector.load %arg9[%c0_20, %c0_21, %c0_22] : memref<4x8x1xf32, #tpu.memory_space<vmem>>, vector<1x8x1xf32>
    %38 = vector.shape_cast %37 : vector<1x8x1xf32> to vector<8x1xf32>
    %cst_23 = arith.constant dense<0xFF800000> : vector<8xf32>
    %39 = vector.multi_reduction <maximumf>, %36, %cst_23 [1] : vector<8x8xf32> to vector<8xf32>
    %40 = vector.shape_cast %39 : vector<8xf32> to vector<8x1xf32>
    %41 = arith.maximumf %38, %40 : vector<8x1xf32>
    %42 = arith.subf %38, %41 : vector<8x1xf32>
    %43 = math.exp %42 : vector<8x1xf32>
    %44 = vector.broadcast %41 : vector<8x1xf32> to vector<8x8xf32>
    %45 = arith.subf %36, %44 : vector<8x8xf32>
    %46 = math.exp %45 : vector<8x8xf32>
    %c0_24 = arith.constant 0 : index
    %c0_25 = arith.constant 0 : index
    %c0_26 = arith.constant 0 : index
    %47 = vector.load %arg10[%c0_24, %c0_25, %c0_26] : memref<4x8x1xf32, #tpu.memory_space<vmem>>, vector<1x8x1xf32>
    %48 = vector.shape_cast %47 : vector<1x8x1xf32> to vector<8x1xf32>
    %49 = arith.mulf %43, %48 : vector<8x1xf32>
    %cst_27 = arith.constant dense<0.000000e+00> : vector<8xf32>
    %50 = vector.multi_reduction <add>, %46, %cst_27 [1] : vector<8x8xf32> to vector<8xf32>
    %51 = vector.shape_cast %50 : vector<8xf32> to vector<8x1xf32>
    %52 = arith.addf %49, %51 : vector<8x1xf32>
    %c0_28 = arith.constant 0 : index
    %c0_29 = arith.constant 0 : index
    %c0_30 = arith.constant 0 : index
    %53 = vector.load %arg10[%c0_28, %c0_29, %c0_30] : memref<4x8x1xf32, #tpu.memory_space<vmem>>, vector<1x8x1xf32>
    %54 = vector.shape_cast %53 : vector<1x8x1xf32> to vector<8x1xf32>
    %55 = vector.shape_cast %52 : vector<8x1xf32> to vector<1x8x1xf32>
    tpu.vector_store %arg10[%c0_28, %c0_29, %c0_30], %55 {strides = array<i32>} : memref<4x8x1xf32, #tpu.memory_space<vmem>>, vector<1x8x1xf32>,
    %c0_31 = arith.constant 0 : index
    %c0_32 = arith.constant 0 : index
    %c0_33 = arith.constant 0 : index
    %56 = vector.load %arg11[%c0_31, %c0_32, %c0_33] : memref<4x8x8xf32, #tpu.memory_space<vmem>>, vector<1x8x8xf32>
    %57 = vector.shape_cast %56 : vector<1x8x8xf32> to vector<8x8xf32>
    %58 = vector.broadcast %43 : vector<8x1xf32> to vector<8x8xf32>
    %59 = arith.mulf %58, %57 : vector<8x8xf32>
    %60 = vector.extract_strided_slice %10 {offsets = [0, 0], sizes = [8, 8], strides = [1, 1]} : vector<8x32xf32> to vector<8x8xf32>
    %cst_34 = arith.constant dense<0.000000e+00> : vector<8x8xf32>
    %61 = tpu.matmul %46, %60, %cst_34 {dimension_numbers = #tpu.dot_dimension_numbers<[1], [0], [0], [1], [0, 0, 1, 1], [], []>} : vector<8x8xf32>, vector<8x8xf32>, vector<8x8xf32> -> vector<8x8xf32>
    %62 = arith.addf %59, %61 : vector<8x8xf32>
    %c0_35 = arith.constant 0 : index
    %c0_36 = arith.constant 0 : index
    %c0_37 = arith.constant 0 : index
    %63 = vector.load %arg11[%c0_35, %c0_36, %c0_37] : memref<4x8x8xf32, #tpu.memory_space<vmem>>, vector<1x8x8xf32>
    %64 = vector.shape_cast %63 : vector<1x8x8xf32> to vector<8x8xf32>
    %65 = vector.shape_cast %62 : vector<8x8xf32> to vector<1x8x8xf32>
    tpu.vector_store %arg11[%c0_35, %c0_36, %c0_37], %65 {strides = array<i32>} : memref<4x8x8xf32, #tpu.memory_space<vmem>>, vector<1x8x8xf32>,
    %c0_38 = arith.constant 0 : index
    %c0_39 = arith.constant 0 : index
    %c0_40 = arith.constant 0 : index
    %66 = vector.load %arg9[%c0_38, %c0_39, %c0_40] : memref<4x8x1xf32, #tpu.memory_space<vmem>>, vector<1x8x1xf32>
    %67 = vector.shape_cast %66 : vector<1x8x1xf32> to vector<8x1xf32>
    %68 = vector.shape_cast %41 : vector<8x1xf32> to vector<1x8x1xf32>
    tpu.vector_store %arg9[%c0_38, %c0_39, %c0_40], %68 {strides = array<i32>} : memref<4x8x1xf32, #tpu.memory_space<vmem>>, vector<1x8x1xf32>,
    %69 = vector.extract_strided_slice %6 {offsets = [0, 8], sizes = [8, 8], strides = [1, 1]} : vector<8x32xf32> to vector<8x8xf32>
    %70 = vector.extract_strided_slice %8 {offsets = [0, 8], sizes = [8, 8], strides = [1, 1]} : vector<8x32xf32> to vector<8x8xf32>
    %cst_41 = arith.constant dense<0.000000e+00> : vector<8x8xf32>
    %71 = tpu.matmul %69, %70, %cst_41 {dimension_numbers = #tpu.dot_dimension_numbers<[1], [1], [0], [0], [0, 0, 1, 0], [], []>} : vector<8x8xf32>, vector<8x8xf32>, vector<8x8xf32> -> vector<8x8xf32>
    %cst_42 = arith.constant -1.000000e+09 : f32
    %72 = vector.broadcast %cst_42 : f32 to vector<8x8xf32>
    %73 = arith.select %31, %71, %72 : vector<8x8xi1>, vector<8x8xf32>
    %c1 = arith.constant 1 : index
    %c0_43 = arith.constant 0 : index
    %c0_44 = arith.constant 0 : index
    %74 = vector.load %arg9[%c1, %c0_43, %c0_44] : memref<4x8x1xf32, #tpu.memory_space<vmem>>, vector<1x8x1xf32>
    %75 = vector.shape_cast %74 : vector<1x8x1xf32> to vector<8x1xf32>
    %cst_45 = arith.constant dense<0xFF800000> : vector<8xf32>
    %76 = vector.multi_reduction <maximumf>, %73, %cst_45 [1] : vector<8x8xf32> to vector<8xf32>
    %77 = vector.shape_cast %76 : vector<8xf32> to vector<8x1xf32>
    %78 = arith.maximumf %75, %77 : vector<8x1xf32>
    %79 = arith.subf %75, %78 : vector<8x1xf32>
    %80 = math.exp %79 : vector<8x1xf32>
    %81 = vector.broadcast %78 : vector<8x1xf32> to vector<8x8xf32>
    %82 = arith.subf %73, %81 : vector<8x8xf32>
    %83 = math.exp %82 : vector<8x8xf32>
    %c1_46 = arith.constant 1 : index
    %c0_47 = arith.constant 0 : index
    %c0_48 = arith.constant 0 : index
    %84 = vector.load %arg10[%c1_46, %c0_47, %c0_48] : memref<4x8x1xf32, #tpu.memory_space<vmem>>, vector<1x8x1xf32>
    %85 = vector.shape_cast %84 : vector<1x8x1xf32> to vector<8x1xf32>
    %86 = arith.mulf %80, %85 : vector<8x1xf32>
    %cst_49 = arith.constant dense<0.000000e+00> : vector<8xf32>
    %87 = vector.multi_reduction <add>, %83, %cst_49 [1] : vector<8x8xf32> to vector<8xf32>
    %88 = vector.shape_cast %87 : vector<8xf32> to vector<8x1xf32>
    %89 = arith.addf %86, %88 : vector<8x1xf32>
    %c1_50 = arith.constant 1 : index
    %c0_51 = arith.constant 0 : index
    %c0_52 = arith.constant 0 : index
    %90 = vector.load %arg10[%c1_50, %c0_51, %c0_52] : memref<4x8x1xf32, #tpu.memory_space<vmem>>, vector<1x8x1xf32>
    %91 = vector.shape_cast %90 : vector<1x8x1xf32> to vector<8x1xf32>
    %92 = vector.shape_cast %89 : vector<8x1xf32> to vector<1x8x1xf32>
    tpu.vector_store %arg10[%c1_50, %c0_51, %c0_52], %92 {strides = array<i32>} : memref<4x8x1xf32, #tpu.memory_space<vmem>>, vector<1x8x1xf32>,
    %c1_53 = arith.constant 1 : index
    %c0_54 = arith.constant 0 : index
    %c0_55 = arith.constant 0 : index
    %93 = vector.load %arg11[%c1_53, %c0_54, %c0_55] : memref<4x8x8xf32, #tpu.memory_space<vmem>>, vector<1x8x8xf32>
    %94 = vector.shape_cast %93 : vector<1x8x8xf32> to vector<8x8xf32>
    %95 = vector.broadcast %80 : vector<8x1xf32> to vector<8x8xf32>
    %96 = arith.mulf %95, %94 : vector<8x8xf32>
    %97 = vector.extract_strided_slice %10 {offsets = [0, 8], sizes = [8, 8], strides = [1, 1]} : vector<8x32xf32> to vector<8x8xf32>
    %cst_56 = arith.constant dense<0.000000e+00> : vector<8x8xf32>
    %98 = tpu.matmul %83, %97, %cst_56 {dimension_numbers = #tpu.dot_dimension_numbers<[1], [0], [0], [1], [0, 0, 1, 1], [], []>} : vector<8x8xf32>, vector<8x8xf32>, vector<8x8xf32> -> vector<8x8xf32>
    %99 = arith.addf %96, %98 : vector<8x8xf32>
    %c1_57 = arith.constant 1 : index
    %c0_58 = arith.constant 0 : index
    %c0_59 = arith.constant 0 : index
    %100 = vector.load %arg11[%c1_57, %c0_58, %c0_59] : memref<4x8x8xf32, #tpu.memory_space<vmem>>, vector<1x8x8xf32>
    %101 = vector.shape_cast %100 : vector<1x8x8xf32> to vector<8x8xf32>
    %102 = vector.shape_cast %99 : vector<8x8xf32> to vector<1x8x8xf32>
    tpu.vector_store %arg11[%c1_57, %c0_58, %c0_59], %102 {strides = array<i32>} : memref<4x8x8xf32, #tpu.memory_space<vmem>>, vector<1x8x8xf32>,
    %c1_60 = arith.constant 1 : index
    %c0_61 = arith.constant 0 : index
    %c0_62 = arith.constant 0 : index
    %103 = vector.load %arg9[%c1_60, %c0_61, %c0_62] : memref<4x8x1xf32, #tpu.memory_space<vmem>>, vector<1x8x1xf32>
    %104 = vector.shape_cast %103 : vector<1x8x1xf32> to vector<8x1xf32>
    %105 = vector.shape_cast %78 : vector<8x1xf32> to vector<1x8x1xf32>
    tpu.vector_store %arg9[%c1_60, %c0_61, %c0_62], %105 {strides = array<i32>} : memref<4x8x1xf32, #tpu.memory_space<vmem>>, vector<1x8x1xf32>,
    %106 = vector.extract_strided_slice %6 {offsets = [0, 16], sizes = [8, 8], strides = [1, 1]} : vector<8x32xf32> to vector<8x8xf32>
    %107 = vector.extract_strided_slice %8 {offsets = [0, 16], sizes = [8, 8], strides = [1, 1]} : vector<8x32xf32> to vector<8x8xf32>
    %cst_63 = arith.constant dense<0.000000e+00> : vector<8x8xf32>
    %108 = tpu.matmul %106, %107, %cst_63 {dimension_numbers = #tpu.dot_dimension_numbers<[1], [1], [0], [0], [0, 0, 1, 0], [], []>} : vector<8x8xf32>, vector<8x8xf32>, vector<8x8xf32> -> vector<8x8xf32>
    %cst_64 = arith.constant -1.000000e+09 : f32
    %109 = vector.broadcast %cst_64 : f32 to vector<8x8xf32>
    %110 = arith.select %31, %108, %109 : vector<8x8xi1>, vector<8x8xf32>
    %c2 = arith.constant 2 : index
    %c0_65 = arith.constant 0 : index
    %c0_66 = arith.constant 0 : index
    %111 = vector.load %arg9[%c2, %c0_65, %c0_66] : memref<4x8x1xf32, #tpu.memory_space<vmem>>, vector<1x8x1xf32>
    %112 = vector.shape_cast %111 : vector<1x8x1xf32> to vector<8x1xf32>
    %cst_67 = arith.constant dense<0xFF800000> : vector<8xf32>
    %113 = vector.multi_reduction <maximumf>, %110, %cst_67 [1] : vector<8x8xf32> to vector<8xf32>
    %114 = vector.shape_cast %113 : vector<8xf32> to vector<8x1xf32>
    %115 = arith.maximumf %112, %114 : vector<8x1xf32>
    %116 = arith.subf %112, %115 : vector<8x1xf32>
    %117 = math.exp %116 : vector<8x1xf32>
    %118 = vector.broadcast %115 : vector<8x1xf32> to vector<8x8xf32>
    %119 = arith.subf %110, %118 : vector<8x8xf32>
    %120 = math.exp %119 : vector<8x8xf32>
    %c2_68 = arith.constant 2 : index
    %c0_69 = arith.constant 0 : index
    %c0_70 = arith.constant 0 : index
    %121 = vector.load %arg10[%c2_68, %c0_69, %c0_70] : memref<4x8x1xf32, #tpu.memory_space<vmem>>, vector<1x8x1xf32>
    %122 = vector.shape_cast %121 : vector<1x8x1xf32> to vector<8x1xf32>
    %123 = arith.mulf %117, %122 : vector<8x1xf32>
    %cst_71 = arith.constant dense<0.000000e+00> : vector<8xf32>
    %124 = vector.multi_reduction <add>, %120, %cst_71 [1] : vector<8x8xf32> to vector<8xf32>
    %125 = vector.shape_cast %124 : vector<8xf32> to vector<8x1xf32>
    %126 = arith.addf %123, %125 : vector<8x1xf32>
    %c2_72 = arith.constant 2 : index
    %c0_73 = arith.constant 0 : index
    %c0_74 = arith.constant 0 : index
    %127 = vector.load %arg10[%c2_72, %c0_73, %c0_74] : memref<4x8x1xf32, #tpu.memory_space<vmem>>, vector<1x8x1xf32>
    %128 = vector.shape_cast %127 : vector<1x8x1xf32> to vector<8x1xf32>
    %129 = vector.shape_cast %126 : vector<8x1xf32> to vector<1x8x1xf32>
    tpu.vector_store %arg10[%c2_72, %c0_73, %c0_74], %129 {strides = array<i32>} : memref<4x8x1xf32, #tpu.memory_space<vmem>>, vector<1x8x1xf32>,
    %c2_75 = arith.constant 2 : index
    %c0_76 = arith.constant 0 : index
    %c0_77 = arith.constant 0 : index
    %130 = vector.load %arg11[%c2_75, %c0_76, %c0_77] : memref<4x8x8xf32, #tpu.memory_space<vmem>>, vector<1x8x8xf32>
    %131 = vector.shape_cast %130 : vector<1x8x8xf32> to vector<8x8xf32>
    %132 = vector.broadcast %117 : vector<8x1xf32> to vector<8x8xf32>
    %133 = arith.mulf %132, %131 : vector<8x8xf32>
    %134 = vector.extract_strided_slice %10 {offsets = [0, 16], sizes = [8, 8], strides = [1, 1]} : vector<8x32xf32> to vector<8x8xf32>
    %cst_78 = arith.constant dense<0.000000e+00> : vector<8x8xf32>
    %135 = tpu.matmul %120, %134, %cst_78 {dimension_numbers = #tpu.dot_dimension_numbers<[1], [0], [0], [1], [0, 0, 1, 1], [], []>} : vector<8x8xf32>, vector<8x8xf32>, vector<8x8xf32> -> vector<8x8xf32>
    %136 = arith.addf %133, %135 : vector<8x8xf32>
    %c2_79 = arith.constant 2 : index
    %c0_80 = arith.constant 0 : index
    %c0_81 = arith.constant 0 : index
    %137 = vector.load %arg11[%c2_79, %c0_80, %c0_81] : memref<4x8x8xf32, #tpu.memory_space<vmem>>, vector<1x8x8xf32>
    %138 = vector.shape_cast %137 : vector<1x8x8xf32> to vector<8x8xf32>
    %139 = vector.shape_cast %136 : vector<8x8xf32> to vector<1x8x8xf32>
    tpu.vector_store %arg11[%c2_79, %c0_80, %c0_81], %139 {strides = array<i32>} : memref<4x8x8xf32, #tpu.memory_space<vmem>>, vector<1x8x8xf32>,
    %c2_82 = arith.constant 2 : index
    %c0_83 = arith.constant 0 : index
    %c0_84 = arith.constant 0 : index
    %140 = vector.load %arg9[%c2_82, %c0_83, %c0_84] : memref<4x8x1xf32, #tpu.memory_space<vmem>>, vector<1x8x1xf32>
    %141 = vector.shape_cast %140 : vector<1x8x1xf32> to vector<8x1xf32>
    %142 = vector.shape_cast %115 : vector<8x1xf32> to vector<1x8x1xf32>
    tpu.vector_store %arg9[%c2_82, %c0_83, %c0_84], %142 {strides = array<i32>} : memref<4x8x1xf32, #tpu.memory_space<vmem>>, vector<1x8x1xf32>,
    %143 = vector.extract_strided_slice %6 {offsets = [0, 24], sizes = [8, 8], strides = [1, 1]} : vector<8x32xf32> to vector<8x8xf32>
    %144 = vector.extract_strided_slice %8 {offsets = [0, 24], sizes = [8, 8], strides = [1, 1]} : vector<8x32xf32> to vector<8x8xf32>
    %cst_85 = arith.constant dense<0.000000e+00> : vector<8x8xf32>
    %145 = tpu.matmul %143, %144, %cst_85 {dimension_numbers = #tpu.dot_dimension_numbers<[1], [1], [0], [0], [0, 0, 1, 0], [], []>} : vector<8x8xf32>, vector<8x8xf32>, vector<8x8xf32> -> vector<8x8xf32>
    %cst_86 = arith.constant -1.000000e+09 : f32
    %146 = vector.broadcast %cst_86 : f32 to vector<8x8xf32>
    %147 = arith.select %31, %145, %146 : vector<8x8xi1>, vector<8x8xf32>
    %c3 = arith.constant 3 : index
    %c0_87 = arith.constant 0 : index
    %c0_88 = arith.constant 0 : index
    %148 = vector.load %arg9[%c3, %c0_87, %c0_88] : memref<4x8x1xf32, #tpu.memory_space<vmem>>, vector<1x8x1xf32>
    %149 = vector.shape_cast %148 : vector<1x8x1xf32> to vector<8x1xf32>
    %cst_89 = arith.constant dense<0xFF800000> : vector<8xf32>
    %150 = vector.multi_reduction <maximumf>, %147, %cst_89 [1] : vector<8x8xf32> to vector<8xf32>
    %151 = vector.shape_cast %150 : vector<8xf32> to vector<8x1xf32>
    %152 = arith.maximumf %149, %151 : vector<8x1xf32>
    %153 = arith.subf %149, %152 : vector<8x1xf32>
    %154 = math.exp %153 : vector<8x1xf32>
    %155 = vector.broadcast %152 : vector<8x1xf32> to vector<8x8xf32>
    %156 = arith.subf %147, %155 : vector<8x8xf32>
    %157 = math.exp %156 : vector<8x8xf32>
    %c3_90 = arith.constant 3 : index
    %c0_91 = arith.constant 0 : index
    %c0_92 = arith.constant 0 : index
    %158 = vector.load %arg10[%c3_90, %c0_91, %c0_92] : memref<4x8x1xf32, #tpu.memory_space<vmem>>, vector<1x8x1xf32>
    %159 = vector.shape_cast %158 : vector<1x8x1xf32> to vector<8x1xf32>
    %160 = arith.mulf %154, %159 : vector<8x1xf32>
    %cst_93 = arith.constant dense<0.000000e+00> : vector<8xf32>
    %161 = vector.multi_reduction <add>, %157, %cst_93 [1] : vector<8x8xf32> to vector<8xf32>
    %162 = vector.shape_cast %161 : vector<8xf32> to vector<8x1xf32>
    %163 = arith.addf %160, %162 : vector<8x1xf32>
    %c3_94 = arith.constant 3 : index
    %c0_95 = arith.constant 0 : index
    %c0_96 = arith.constant 0 : index
    %164 = vector.load %arg10[%c3_94, %c0_95, %c0_96] : memref<4x8x1xf32, #tpu.memory_space<vmem>>, vector<1x8x1xf32>
    %165 = vector.shape_cast %164 : vector<1x8x1xf32> to vector<8x1xf32>
    %166 = vector.shape_cast %163 : vector<8x1xf32> to vector<1x8x1xf32>
    tpu.vector_store %arg10[%c3_94, %c0_95, %c0_96], %166 {strides = array<i32>} : memref<4x8x1xf32, #tpu.memory_space<vmem>>, vector<1x8x1xf32>,
    %c3_97 = arith.constant 3 : index
    %c0_98 = arith.constant 0 : index
    %c0_99 = arith.constant 0 : index
    %167 = vector.load %arg11[%c3_97, %c0_98, %c0_99] : memref<4x8x8xf32, #tpu.memory_space<vmem>>, vector<1x8x8xf32>
    %168 = vector.shape_cast %167 : vector<1x8x8xf32> to vector<8x8xf32>
    %169 = vector.broadcast %154 : vector<8x1xf32> to vector<8x8xf32>
    %170 = arith.mulf %169, %168 : vector<8x8xf32>
    %171 = vector.extract_strided_slice %10 {offsets = [0, 24], sizes = [8, 8], strides = [1, 1]} : vector<8x32xf32> to vector<8x8xf32>
    %cst_100 = arith.constant dense<0.000000e+00> : vector<8x8xf32>
    %172 = tpu.matmul %157, %171, %cst_100 {dimension_numbers = #tpu.dot_dimension_numbers<[1], [0], [0], [1], [0, 0, 1, 1], [], []>} : vector<8x8xf32>, vector<8x8xf32>, vector<8x8xf32> -> vector<8x8xf32>
    %173 = arith.addf %170, %172 : vector<8x8xf32>
    %c3_101 = arith.constant 3 : index
    %c0_102 = arith.constant 0 : index
    %c0_103 = arith.constant 0 : index
    %174 = vector.load %arg11[%c3_101, %c0_102, %c0_103] : memref<4x8x8xf32, #tpu.memory_space<vmem>>, vector<1x8x8xf32>
    %175 = vector.shape_cast %174 : vector<1x8x8xf32> to vector<8x8xf32>
    %176 = vector.shape_cast %173 : vector<8x8xf32> to vector<1x8x8xf32>
    tpu.vector_store %arg11[%c3_101, %c0_102, %c0_103], %176 {strides = array<i32>} : memref<4x8x8xf32, #tpu.memory_space<vmem>>, vector<1x8x8xf32>,
    %c3_104 = arith.constant 3 : index
    %c0_105 = arith.constant 0 : index
    %c0_106 = arith.constant 0 : index
    %177 = vector.load %arg9[%c3_104, %c0_105, %c0_106] : memref<4x8x1xf32, #tpu.memory_space<vmem>>, vector<1x8x1xf32>
    %178 = vector.shape_cast %177 : vector<1x8x1xf32> to vector<8x1xf32>
    %179 = vector.shape_cast %152 : vector<8x1xf32> to vector<1x8x1xf32>
    tpu.vector_store %arg9[%c3_104, %c0_105, %c0_106], %179 {strides = array<i32>} : memref<4x8x1xf32, #tpu.memory_space<vmem>>, vector<1x8x1xf32>,
    %c0_i32_107 = arith.constant 0 : i32
    %180 = arith.cmpi eq, %arg2, %c0_i32_107 : i32
    %181 = arith.extui %180 : i1 to i32
    %c0_i32_108 = arith.constant 0 : i32
    %182 = arith.cmpi ne, %181, %c0_i32_108 : i32
    scf.if %182 {
      %c0_109 = arith.constant 0 : index
      %c0_110 = arith.constant 0 : index
      %c0_111 = arith.constant 0 : index
      %183 = vector.load %arg11[%c0_109, %c0_110, %c0_111] : memref<4x8x8xf32, #tpu.memory_space<vmem>>, vector<1x8x8xf32>
      %184 = vector.shape_cast %183 : vector<1x8x8xf32> to vector<8x8xf32>
      %c0_112 = arith.constant 0 : index
      %c0_113 = arith.constant 0 : index
      %c0_114 = arith.constant 0 : index
      %185 = vector.load %arg10[%c0_112, %c0_113, %c0_114] : memref<4x8x1xf32, #tpu.memory_space<vmem>>, vector<1x8x1xf32>
      %186 = vector.shape_cast %185 : vector<1x8x1xf32> to vector<8x1xf32>
      %187 = tpu.reciprocal %186 {approx = true} : vector<8x1xf32> -> vector<8x1xf32>
      %188 = vector.broadcast %187 : vector<8x1xf32> to vector<8x8xf32>
      %189 = arith.mulf %184, %188 : vector<8x8xf32>
      %c1_115 = arith.constant 1 : index
      %c0_116 = arith.constant 0 : index
      %c0_117 = arith.constant 0 : index
      %190 = vector.load %arg11[%c1_115, %c0_116, %c0_117] : memref<4x8x8xf32, #tpu.memory_space<vmem>>, vector<1x8x8xf32>
      %191 = vector.shape_cast %190 : vector<1x8x8xf32> to vector<8x8xf32>
      %c1_118 = arith.constant 1 : index
      %c0_119 = arith.constant 0 : index
      %c0_120 = arith.constant 0 : index
      %192 = vector.load %arg10[%c1_118, %c0_119, %c0_120] : memref<4x8x1xf32, #tpu.memory_space<vmem>>, vector<1x8x1xf32>
      %193 = vector.shape_cast %192 : vector<1x8x1xf32> to vector<8x1xf32>
      %194 = tpu.reciprocal %193 {approx = true} : vector<8x1xf32> -> vector<8x1xf32>
      %195 = vector.broadcast %194 : vector<8x1xf32> to vector<8x8xf32>
      %196 = arith.mulf %191, %195 : vector<8x8xf32>
      %c2_121 = arith.constant 2 : index
      %c0_122 = arith.constant 0 : index
      %c0_123 = arith.constant 0 : index
      %197 = vector.load %arg11[%c2_121, %c0_122, %c0_123] : memref<4x8x8xf32, #tpu.memory_space<vmem>>, vector<1x8x8xf32>
      %198 = vector.shape_cast %197 : vector<1x8x8xf32> to vector<8x8xf32>
      %c2_124 = arith.constant 2 : index
      %c0_125 = arith.constant 0 : index
      %c0_126 = arith.constant 0 : index
      %199 = vector.load %arg10[%c2_124, %c0_125, %c0_126] : memref<4x8x1xf32, #tpu.memory_space<vmem>>, vector<1x8x1xf32>
      %200 = vector.shape_cast %199 : vector<1x8x1xf32> to vector<8x1xf32>
      %201 = tpu.reciprocal %200 {approx = true} : vector<8x1xf32> -> vector<8x1xf32>
      %202 = vector.broadcast %201 : vector<8x1xf32> to vector<8x8xf32>
      %203 = arith.mulf %198, %202 : vector<8x8xf32>
      %c3_127 = arith.constant 3 : index
      %c0_128 = arith.constant 0 : index
      %c0_129 = arith.constant 0 : index
      %204 = vector.load %arg11[%c3_127, %c0_128, %c0_129] : memref<4x8x8xf32, #tpu.memory_space<vmem>>, vector<1x8x8xf32>
      %205 = vector.shape_cast %204 : vector<1x8x8xf32> to vector<8x8xf32>
      %c3_130 = arith.constant 3 : index
      %c0_131 = arith.constant 0 : index
      %c0_132 = arith.constant 0 : index
      %206 = vector.load %arg10[%c3_130, %c0_131, %c0_132] : memref<4x8x1xf32, #tpu.memory_space<vmem>>, vector<1x8x1xf32>
      %207 = vector.shape_cast %206 : vector<1x8x1xf32> to vector<8x1xf32>
      %208 = tpu.reciprocal %207 {approx = true} : vector<8x1xf32> -> vector<8x1xf32>
      %209 = vector.broadcast %208 : vector<8x1xf32> to vector<8x8xf32>
      %210 = arith.mulf %205, %209 : vector<8x8xf32>
      %211 = tpu.concatenate %189, %196, %203, %210 in 1 : vector<8x8xf32>, vector<8x8xf32>, vector<8x8xf32>, vector<8x8xf32> -> vector<8x32xf32>
      %c0_133 = arith.constant 0 : index
      %c0_134 = arith.constant 0 : index
      %c0_135 = arith.constant 0 : index
      %212 = vector.load %arg8[%c0_133, %c0_134, %c0_135] : memref<1x8x32xf32, #tpu.memory_space<vmem>>, vector<1x8x32xf32>
      %213 = vector.shape_cast %212 : vector<1x8x32xf32> to vector<8x32xf32>
      %214 = vector.shape_cast %211 : vector<8x32xf32> to vector<1x8x32xf32>
      tpu.vector_store %arg8[%c0_133, %c0_134, %c0_135], %214 {strides = array<i32>} : memref<1x8x32xf32, #tpu.memory_space<vmem>>, vector<1x8x32xf32>,
    } else {
    }
    return
  }
  func.func @transform_0(%arg0: i32, %arg1: i32, %arg2: i32) -> (i32, i32, i32) {
    %c0_i32 = arith.constant 0 : i32
    %c0_i32_0 = arith.constant 0 : i32
    return %arg0, %arg1, %c0_i32 : i32, i32, i32
  }
  func.func @transform_1(%arg0: i32, %arg1: i32, %arg2: i32) -> (i32, i32, i32) {
    %c0_i32 = arith.constant 0 : i32
    %c0_i32_0 = arith.constant 0 : i32
    return %arg0, %arg2, %c0_i32 : i32, i32, i32
  }
  func.func @transform_2(%arg0: i32, %arg1: i32, %arg2: i32) -> (i32, i32, i32) {
    %c0_i32 = arith.constant 0 : i32
    %c0_i32_0 = arith.constant 0 : i32
    return %arg0, %arg2, %c0_i32 : i32, i32, i32
  }
  func.func @transform_3(%arg0: i32, %arg1: i32, %arg2: i32) -> (i32, i32, i32) {
    %c0_i32 = arith.constant 0 : i32
    %c0_i32_0 = arith.constant 0 : i32
    return %arg0, %arg1, %c0_i32 : i32, i32, i32
  }
  func.func @transform_4(%arg0: i32, %arg1: i32, %arg2: i32) -> (i32, i32, i32) {
    %c0_i32 = arith.constant 0 : i32
    %c0_i32_0 = arith.constant 0 : i32
    return %arg0, %c0_i32, %arg2 : i32, i32, i32
  }
  func.func @transform_5(%arg0: i32, %arg1: i32, %arg2: i32) -> (i32, i32, i32) {
    %c0_i32 = arith.constant 0 : i32
    %c0_i32_0 = arith.constant 0 : i32
    return %arg0, %arg1, %c0_i32 : i32, i32, i32
  }
}

module attributes {stable_mosaic.version = 11 : i64} {
  func.func @_linear_kernel(%arg0: i32, %arg1: i32, %arg2: i32, %arg3: memref<16x32xf32, #tpu.memory_space<vmem>>, %arg4: memref<32x16xf32, #tpu.memory_space<vmem>>, %arg5: memref<1x16xf32, #tpu.memory_space<vmem>>, %arg6: memref<16x16xf32, #tpu.memory_space<vmem>>, %arg7: memref<16x16xf32, #tpu.memory_space<vmem>>) attributes {dimension_semantics = [#tpu.dimension_semantics<parallel>, #tpu.dimension_semantics<parallel>, #tpu.dimension_semantics<arbitrary>], iteration_bounds = array<i64: 1, 1, 1>, scalar_prefetch = 0 : i64, scratch_operands = 1 : i64, tpu.core_type = #tpu.core_type<tc>, window_params = [{transform_indices = @transform_0, window_bounds = array<i64: 16, 32>}, {transform_indices = @transform_1, window_bounds = array<i64: 32, 16>}, {transform_indices = @transform_2, window_bounds = array<i64: 1, 16>}, {transform_indices = @transform_3, window_bounds = array<i64: 16, 16>}]} {
    %c0_i32 = arith.constant 0 : i32
    %0 = arith.cmpi eq, %arg2, %c0_i32 : i32
    %1 = arith.extui %0 : i1 to i32
    %c0_i32_0 = arith.constant 0 : i32
    %2 = arith.cmpi ne, %1, %c0_i32_0 : i32
    scf.if %2 {
      %cst_10 = arith.constant 0.000000e+00 : f32
      %12 = vector.broadcast %cst_10 : f32 to vector<16x16xf32>
      %c0_11 = arith.constant 0 : index
      %c0_12 = arith.constant 0 : index
      %13 = vector.load %arg7[%c0_11, %c0_12] : memref<16x16xf32, #tpu.memory_space<vmem>>, vector<16x16xf32>
      tpu.vector_store %arg7[%c0_11, %c0_12], %12 {strides = array<i32>} : memref<16x16xf32, #tpu.memory_space<vmem>>, vector<16x16xf32>,
    } else {
    }
    %c0 = arith.constant 0 : index
    %c0_1 = arith.constant 0 : index
    %3 = vector.load %arg7[%c0, %c0_1] : memref<16x16xf32, #tpu.memory_space<vmem>>, vector<16x16xf32>
    %c0_2 = arith.constant 0 : index
    %c0_3 = arith.constant 0 : index
    %4 = vector.load %arg3[%c0_2, %c0_3] : memref<16x32xf32, #tpu.memory_space<vmem>>, vector<16x32xf32>
    %c0_4 = arith.constant 0 : index
    %c0_5 = arith.constant 0 : index
    %5 = vector.load %arg4[%c0_4, %c0_5] : memref<32x16xf32, #tpu.memory_space<vmem>>, vector<32x16xf32>
    %cst = arith.constant dense<0.000000e+00> : vector<16x16xf32>
    %6 = tpu.matmul %4, %5, %cst {dimension_numbers = #tpu.dot_dimension_numbers<[1], [0], [0], [1], [0, 0, 1, 1], [], []>} : vector<16x32xf32>, vector<32x16xf32>, vector<16x16xf32> -> vector<16x16xf32>
    %7 = arith.addf %3, %6 : vector<16x16xf32>
    %c0_6 = arith.constant 0 : index
    %c0_7 = arith.constant 0 : index
    %8 = vector.load %arg7[%c0_6, %c0_7] : memref<16x16xf32, #tpu.memory_space<vmem>>, vector<16x16xf32>
    tpu.vector_store %arg7[%c0_6, %c0_7], %7 {strides = array<i32>} : memref<16x16xf32, #tpu.memory_space<vmem>>, vector<16x16xf32>,
    %c0_i32_8 = arith.constant 0 : i32
    %9 = arith.cmpi eq, %arg2, %c0_i32_8 : i32
    %10 = arith.extui %9 : i1 to i32
    %c0_i32_9 = arith.constant 0 : i32
    %11 = arith.cmpi ne, %10, %c0_i32_9 : i32
    scf.if %11 {
      %c0_10 = arith.constant 0 : index
      %c0_11 = arith.constant 0 : index
      %12 = vector.load %arg7[%c0_10, %c0_11] : memref<16x16xf32, #tpu.memory_space<vmem>>, vector<16x16xf32>
      %c0_12 = arith.constant 0 : index
      %c0_13 = arith.constant 0 : index
      %13 = vector.load %arg5[%c0_12, %c0_13] : memref<1x16xf32, #tpu.memory_space<vmem>>, vector<1x16xf32>
      %14 = vector.broadcast %13 : vector<1x16xf32> to vector<16x16xf32>
      %15 = arith.addf %12, %14 : vector<16x16xf32>
      %c0_14 = arith.constant 0 : index
      %c0_15 = arith.constant 0 : index
      %16 = vector.load %arg6[%c0_14, %c0_15] : memref<16x16xf32, #tpu.memory_space<vmem>>, vector<16x16xf32>
      tpu.vector_store %arg6[%c0_14, %c0_15], %15 {strides = array<i32>} : memref<16x16xf32, #tpu.memory_space<vmem>>, vector<16x16xf32>,
    } else {
    }
    return
  }
  func.func @transform_0(%arg0: i32, %arg1: i32, %arg2: i32) -> (i32, i32) {
    %c0_i32 = arith.constant 0 : i32
    return %arg0, %arg2 : i32, i32
  }
  func.func @transform_1(%arg0: i32, %arg1: i32, %arg2: i32) -> (i32, i32) {
    %c0_i32 = arith.constant 0 : i32
    return %arg2, %arg1 : i32, i32
  }
  func.func @transform_2(%arg0: i32, %arg1: i32, %arg2: i32) -> (i32, i32) {
    %c0_i32 = arith.constant 0 : i32
    %c0_i32_0 = arith.constant 0 : i32
    return %c0_i32, %arg1 : i32, i32
  }
  func.func @transform_3(%arg0: i32, %arg1: i32, %arg2: i32) -> (i32, i32) {
    %c0_i32 = arith.constant 0 : i32
    return %arg0, %arg1 : i32, i32
  }
}

</mosaic_0001>

<bundles_post_ra>
// kernel: transformer_forward.27
= control target key start
LH: loop header
LB: loop body
LE: loop exit
PB: predicated region body
PF: predicated region fallthrough
CT: control target
= control target key end

     0   :  { %vm27_vm0 = vcmask 261120   ;;  %v228_v3 = vmov 0.0   ;;  %s315_s1 = inlined_call_operand.vmem [shape: f32[32,32], index: 1, kind: input, shape index: {}]   ;;  %s316_s0 = inlined_call_operand.vmem [shape: f32[16,32], index: 0, kind: input, shape index: {}]   ;;  %s317_s2 = inlined_call_operand.vmem [shape: f32[1,32], index: 2, kind: input, shape index: {}]   ;;  %s318_s3 = inlined_call_operand.vmem [shape: f32[16,32], index: 3, kind: input, shape index: {}]   ;;  %s319_s4 = inlined_call_operand.vmem [shape: f32[1,32], index: 4, kind: input, shape index: {}]   ;;  %s320_s5 = inlined_call_operand.vmem [shape: f32[1,32], index: 5, kind: input, shape index: {}]   ;;  %s321_s6 = inlined_call_operand.vmem [shape: f32[16,32], index: 6, kind: output, shape index: {}]  }
   0x1   :  { %v34_v0 = vld [vmem:[%s315_s1] sm:$0xff]  ;;  %v35_v1 = vld [vmem:[%s315_s1 + $0x8] sm:$0xff]  ;;  %v36_v2 = vld [vmem:[%s315_s1 + $0x10] sm:$0xff]  ;;  %29 = vst.msk [vmem:[#allocation2 + $0x8] sm:$0xff] %vm27_vm0, %v228_v3 }
   0x2   :  { %28 = vst.msk [vmem:[#allocation2] sm:$0xff] %vm27_vm0, %v228_v3  ;;  %v215_v4 = vpack.c.bf16 %v35_v1, %v34_v0  ;;  %v37_v5 = vld [vmem:[%s315_s1 + $0x18] sm:$0xff]  ;;  %v32_v6 = vld [vmem:[%s316_s0] sm:$0xff]  ;;  %v33_v8 = vld [vmem:[%s316_s0 + $0x8] sm:$0xff] }
   0x3   :  { %v219_v7 = vpack.c.bf16 %v37_v5, %v36_v2  ;;  %212 = vmatprep.mubr.msk.f32.mxu0 %vm27_vm0, %v32_v6  ;;  %v195_v15 = vld [vmem:[%s317_s2] ss:$0 sm:$0xff]  ;;  %v139_v21 = vld [vmem:[%s318_s3 + $0x8] sm:$0xff] }
   0x4   :  { %216 = vmatprep.subr.bf16.mxu0 %v215_v4  ;;  %v138_v18 = vld [vmem:[%s318_s3] sm:$0xff] }
   0x5   :  { %218 = vmatpush3.bf16.msra.mxu0 %v215_v4  ;;  %v196_v43 = vld [vmem:[%s319_s4] ss:$0 sm:$0xff] }
   0x6   :  { %220 = vmatprep.subr.bf16.mxu0 %v219_v7  ;;  %v197_v45 = vld [vmem:[%s320_s5] ss:$0 sm:$0xff] }
   0x8   :  { %v31_v9 = vld [vmem:[#allocation2 + $0x8] sm:$0xff] }
   0x9   :  { %222 = vmatpush3.bf16.msra.mxu0 %v219_v7  ;;  %v30_v10 = vld [vmem:[#allocation2] sm:$0xff] }
   0xc   :  { %213 = vmatmul.mubr.msk.f32.vlgmr.msra.gmra.mrb[0].mxu0 %vm27_vm0, %v33_v8 }
  0xdf   :  { %v214_v11 = vpop.f32.mrb[0].mxu0 }
  0xe0   :  { %v121_v12 = vadd.f32 %v214_v11, %v31_v9  ;;  %v111_v13 = vpop.f32.mrb[1].mxu0 }
  0xe1   :  { %v120_v14 = vadd.f32 %v111_v13, %v30_v10 }
  0xe2   :  { %123 = vst.msk [vmem:[#allocation2 + $0x8] sm:$0xff] %vm27_vm0, %v121_v12 }
  0xe3   :  { %122 = vst.msk [vmem:[#allocation2] sm:$0xff] %vm27_vm0, %v120_v14 }
  0xe9   :  { %v128_v16 = vld [vmem:[#allocation2 + $0x8] sm:$0xff] }
  0xea   :  { %v127_v17 = vld [vmem:[#allocation2] sm:$0xff]  ;;  %v137_v20 = vadd.f32 %v195_v15, %v128_v16 }
  0xeb   :  { %v136_v19 = vadd.f32 %v195_v15, %v127_v17 }
  0xec   :  { %v141_v24 = vadd.f32 %v139_v21, %v137_v20 }
  0xed   :  { %v140_v22 = vadd.f32 %v138_v18, %v136_v19 }
  0xee   :  { %v145_v25 = vsel %vm27_vm0, %v141_v24, 0.0 }
  0xef   :  { %v142_v23 = vsel %vm27_vm0, %v140_v22, 0.0 }
  0xf0   :  { %143 = vadd.xlane.f32.xlu0 %v142_v23 }
  0xf4   :  { %146 = vadd.xlane.f32.xlu0 %v145_v25 }
 0x17d   :  { %v144_v26 = vpop.xlane.xlu0 %143 }
 0x17e   :  { %v149_v27 = vmul.f32 0.03125, %v144_v26 }
 0x180   :  { %v151_v28 = vsub.f32 %v140_v22, %v149_v27 }
 0x181   :  { %v147_v29 = vpop.xlane.xlu0 %146 }
 0x182   :  { %v150_v30 = vmul.f32 0.03125, %v147_v29  ;;  %v153_v31 = vmul.f32 %v151_v28, %v151_v28 }
 0x184   :  { %v152_v32 = vsub.f32 %v141_v24, %v150_v30  ;;  %v155_v33 = vsel %vm27_vm0, %v153_v31, 0.0 }
 0x185   :  { %156 = vadd.xlane.f32.xlu1 %v155_v33 }
 0x186   :  { %v154_v34 = vmul.f32 %v152_v32, %v152_v32 }
 0x188   :  { %v158_v35 = vsel %vm27_vm0, %v154_v34, 0.0 }
 0x189   :  { %159 = vadd.xlane.f32.xlu1 %v158_v35 }
 0x212   :  { %v157_v36 = vpop.xlane.xlu1 %156 }
 0x213   :  { %v161_v37 = vmul.f32 0.03125, %v157_v36 }
 0x215   :  { %v163_v38 = vadd.f32 1e-05, %v161_v37 }
 0x216   :  { %v160_v39 = vpop.xlane.xlu1 %159 }
 0x217   :  { %224 = vrsqrt.f32 %v163_v38  ;;  %v162_v40 = vmul.f32 0.03125, %v160_v39 }
 0x219   :  { %v164_v41 = vadd.f32 1e-05, %v162_v40 }
 0x21b   :  { %226 = vrsqrt.f32 %v164_v41 }
 0x221   :  { %v225_v42 = vpop.eup %224 }
 0x222   :  { %v167_v44 = vmul.f32 %v225_v42, %v151_v28 }
 0x224   :  { %v176_v46 = vmul.f32 %v196_v43, %v167_v44 }
 0x225   :  { %v227_v47 = vpop.eup %226 }
 0x226   :  { %v185_v48 = vadd.f32 %v197_v45, %v176_v46  ;;  %v168_v49 = vmul.f32 %v227_v47, %v152_v32 }
 0x228   :  { %187 = vst.msk [vmem:[%s321_s6] sm:$0xff] %vm27_vm0, %v185_v48  ;;  %v177_v50 = vmul.f32 %v196_v43, %v168_v49 }
 0x22a   :  { %v186_v51 = vadd.f32 %v197_v45, %v177_v50 }
 0x22c   :  { %188 = vst.msk [vmem:[%s321_s6 + $0x8] sm:$0xff] %vm27_vm0, %v186_v51 }

// kernel: transformer_forward.25
= control target key start
LH: loop header
LB: loop body
LE: loop exit
PB: predicated region body
PF: predicated region fallthrough
CT: control target
= control target key end

     0   :  { %vm29_vm0 = vcmask 261120   ;;  %vm18_vm1 = vcmask 785408   ;;  %v165_v3 = vmov 0.0   ;;  %s221_s1 = inlined_call_operand.vmem [shape: f32[32,96], index: 1, kind: input, shape index: {}]   ;;  %s222_s0 = inlined_call_operand.vmem [shape: f32[16,32], index: 0, kind: input, shape index: {}]   ;;  %s223_s2 = inlined_call_operand.vmem [shape: f32[1,96], index: 2, kind: input, shape index: {}]   ;;  %s224_s3 = inlined_call_operand.vmem [shape: f32[16,96], index: 3, kind: output, shape index: {}]  }
   0x1   :  { %v25_v0 = vld [vmem:[%s221_s1] sm:$0xff]  ;;  %v26_v1 = vld [vmem:[%s221_s1 + $0x8] sm:$0xff]  ;;  %v27_v2 = vld [vmem:[%s221_s1 + $0x10] sm:$0xff]  ;;  %20 = vst.msk [vmem:[#allocation2 + $0x8] sm:$0xff] %vm18_vm1, %v165_v3 }
   0x2   :  { %19 = vst.msk [vmem:[#allocation2] sm:$0xff] %vm18_vm1, %v165_v3  ;;  %v156_v4 = vpack.c.bf16 %v26_v1, %v25_v0  ;;  %v28_v5 = vld [vmem:[%s221_s1 + $0x18] sm:$0xff]  ;;  %v23_v6 = vld [vmem:[%s222_s0] sm:$0xff]  ;;  %v24_v8 = vld [vmem:[%s222_s0 + $0x8] sm:$0xff] }
   0x3   :  { %v160_v7 = vpack.c.bf16 %v28_v5, %v27_v2  ;;  %153 = vmatprep.mubr.msk.f32.mxu0 %vm29_vm0, %v23_v6  ;;  %v138_v15 = vld [vmem:[%s223_s2] ss:$0 sm:$0xff] }
   0x4   :  { %157 = vmatprep.subr.bf16.mxu0 %v156_v4 }
   0x5   :  { %159 = vmatpush3.bf16.msra.mxu0 %v156_v4 }
   0x6   :  { %161 = vmatprep.subr.bf16.mxu0 %v160_v7 }
   0x8   :  { %v22_v9 = vld [vmem:[#allocation2 + $0x8] sm:$0xff] }
   0x9   :  { %163 = vmatpush3.bf16.msra.mxu0 %v160_v7  ;;  %v21_v10 = vld [vmem:[#allocation2] sm:$0xff] }
   0xc   :  { %154 = vmatmul.mubr.msk.f32.vlgmr.msra.gmra.mrb[0].mxu0 %vm29_vm0, %v24_v8 }
  0xdf   :  { %v155_v11 = vpop.f32.mrb[0].mxu0 }
  0xe0   :  { %v112_v12 = vadd.f32 %v155_v11, %v22_v9  ;;  %v102_v13 = vpop.f32.mrb[1].mxu0 }
  0xe1   :  { %v111_v14 = vadd.f32 %v102_v13, %v21_v10 }
  0xe2   :  { %115 = vst.msk [vmem:[#allocation2 + $0x8] sm:$0xff] %vm18_vm1, %v112_v12 }
  0xe3   :  { %114 = vst.msk [vmem:[#allocation2] sm:$0xff] %vm18_vm1, %v111_v14 }
  0xe9   :  { %v120_v16 = vld [vmem:[#allocation2 + $0x8] sm:$0xff] }
  0xea   :  { %v129_v17 = vadd.f32 %v138_v15, %v120_v16  ;;  %v119_v18 = vld [vmem:[#allocation2] sm:$0xff] }
  0xeb   :  { %v128_v19 = vadd.f32 %v138_v15, %v119_v18 }
  0xec   :  { %131 = vst.msk [vmem:[%s224_s3 + $0x8] sm:$0xff] %vm18_vm1, %v129_v17 }
  0xed   :  { %130 = vst.msk [vmem:[%s224_s3] sm:$0xff] %vm18_vm1, %v128_v19 }

// kernel: transformer_forward.28
= control target key start
LH: loop header
LB: loop body
LE: loop exit
PB: predicated region body
PF: predicated region fallthrough
CT: control target
= control target key end

     0   :  { %vm39_vm0 = vcmask 261120   ;;  %vm131_vm1 = vcmask 523264   ;;  %s465_s1 = inlined_call_operand.vmem [shape: f32[32,64], index: 1, kind: input, shape index: {}]   ;;  %s466_s0 = inlined_call_operand.vmem [shape: f32[16,32], index: 0, kind: input, shape index: {}]   ;;  %s467_s3 = inlined_call_operand.vmem [shape: f32[64,32], index: 3, kind: input, shape index: {}]   ;;  %s468_s2 = inlined_call_operand.vmem [shape: f32[1,64], index: 2, kind: input, shape index: {}]   ;;  %s469_s4 = inlined_call_operand.vmem [shape: f32[1,32], index: 4, kind: input, shape index: {}]   ;;  %s470_s5 = inlined_call_operand.vmem [shape: f32[1,32], index: 5, kind: input, shape index: {}]   ;;  %s471_s6 = inlined_call_operand.vmem [shape: f32[1,32], index: 6, kind: input, shape index: {}]   ;;  %s472_s7 = inlined_call_operand.vmem [shape: f32[16,32], index: 7, kind: output, shape index: {}]  }
   0x1   :  { %v28_v0 = vld [vmem:[%s465_s1] sm:$0xff]  ;;  %v29_v1 = vld [vmem:[%s465_s1 + $0x8] sm:$0xff]  ;;  %v30_v2 = vld [vmem:[%s465_s1 + $0x10] sm:$0xff] }
   0x2   :  { %v329_v3 = vpack.c.bf16 %v29_v1, %v28_v0  ;;  %v31_v4 = vld [vmem:[%s465_s1 + $0x18] sm:$0xff]  ;;  %v26_v5 = vld [vmem:[%s466_s0] sm:$0xff]  ;;  %v124_v8 = vld [vmem:[%s467_s3 + $0x8] sm:$0xff] }
   0x3   :  { %v333_v6 = vpack.c.bf16 %v31_v4, %v30_v2  ;;  %307 = vmatprep.mubr.msk.f32.mxu0 %vm39_vm0, %v26_v5  ;;  %v123_v7 = vld [vmem:[%s467_s3] sm:$0xff]  ;;  %v125_v9 = vld [vmem:[%s467_s3 + $0x10] sm:$0xff]  ;;  %v126_v11 = vld [vmem:[%s467_s3 + $0x18] sm:$0xff] }
   0x4   :  { %330 = vmatprep.subr.bf16.mxu0 %v329_v3  ;;  %v337_v10 = vpack.c.bf16 %v124_v8, %v123_v7  ;;  %v341_v12 = vpack.c.bf16 %v126_v11, %v125_v9  ;;  %v127_v13 = vld [vmem:[%s467_s3 + $0x20] sm:$0xff]  ;;  %v128_v14 = vld [vmem:[%s467_s3 + $0x28] sm:$0xff]  ;;  %v129_v17 = vld [vmem:[%s467_s3 + $0x30] sm:$0xff] }
   0x5   :  { %332 = vmatpush3.bf16.msra.mxu0 %v329_v3  ;;  %v345_v15 = vpack.c.bf16 %v128_v14, %v127_v13  ;;  %v27_v16 = vld [vmem:[%s466_s0 + $0x8] sm:$0xff]  ;;  %v130_v18 = vld [vmem:[%s467_s3 + $0x38] sm:$0xff]  ;;  %v275_v20 = vld [vmem:[%s468_s2] ss:$0 sm:$0xff] }
   0x6   :  { %334 = vmatprep.subr.bf16.mxu0 %v333_v6  ;;  %338 = vmatprep.subr.bf16.mxu1 %v337_v10  ;;  %v349_v19 = vpack.c.bf16 %v130_v18, %v129_v17  ;;  %v280_v29 = vld [vmem:[%s469_s4] ss:$0 sm:$0xff] }
   0x7   :  { %340 = vmatpush3.bf16.msra.mxu1 %v337_v10  ;;  %v281_v53 = vld [vmem:[%s470_s5] ss:$0 sm:$0xff] }
   0x8   :  { %342 = vmatprep.subr.bf16.mxu1 %v341_v12  ;;  %v282_v55 = vld [vmem:[%s471_s6] ss:$0 sm:$0xff] }
   0x9   :  { %336 = vmatpush3.bf16.msra.mxu0 %v333_v6 }
   0xb   :  { %344 = vmatpush3.bf16.msra.mxu1 %v341_v12 }
   0xc   :  { %308 = vmatmul.mubr.msk.f32.vlgmr.msra.gmra.mrb[0].mxu0 %vm39_vm0, %v27_v16  ;;  %346 = vmatprep.subr.bf16.mxu1 %v345_v15 }
   0xf   :  { %348 = vmatpush3.bf16.msra.mxu1 %v345_v15 }
  0x10   :  { %350 = vmatprep.subr.bf16.mxu1 %v349_v19 }
  0x13   :  { %352 = vmatpush3.bf16.msra.mxu1 %v349_v19 }
  0xdf   :  { %v309_v21 = vpop.f32.mrb[0].mxu0 }
  0xe0   :  { %v118_v22 = vadd.f32 %v309_v21, %v275_v20  ;;  %v112_v23 = vpop.f32.mrb[1].mxu0 }
  0xe1   :  { %v113_v24 = vadd.f32 %v275_v20, %v112_v23 }
  0xe2   :  { %v122_v26 = vmax.f32 %v118_v22, 0.0 }
  0xe3   :  { %v121_v25 = vmax.f32 %v113_v24, 0.0 }
  0xe5   :  { %326 = vmatprep.mubr.msk.f32.mxu1 %vm131_vm1, %v121_v25 }
  0xe6   :  { %327 = vmatmul.mubr.msk.f32.vlgmr.msra.gmra.mrb[0].mxu1 %vm131_vm1, %v122_v26 }
 0x1b9   :  { %v328_v27 = vpop.f32.mrb[0].mxu1 }
 0x1ba   :  { %v204_v28 = vpop.f32.mrb[1].mxu1  ;;  %v214_v30 = vadd.f32 %v328_v27, %v27_v16 }
 0x1bb   :  { %v213_v31 = vadd.f32 %v204_v28, %v26_v5 }
 0x1bc   :  { %v223_v34 = vadd.f32 %v280_v29, %v214_v30 }
 0x1bd   :  { %v222_v32 = vadd.f32 %v280_v29, %v213_v31 }
 0x1be   :  { %v227_v35 = vsel %vm39_vm0, %v223_v34, 0.0 }
 0x1bf   :  { %v224_v33 = vsel %vm39_vm0, %v222_v32, 0.0 }
 0x1c0   :  { %225 = vadd.xlane.f32.xlu0 %v224_v33 }
 0x1c4   :  { %228 = vadd.xlane.f32.xlu0 %v227_v35 }
 0x24d   :  { %v226_v36 = vpop.xlane.xlu0 %225 }
 0x24e   :  { %v231_v37 = vmul.f32 0.03125, %v226_v36 }
 0x250   :  { %v233_v38 = vsub.f32 %v222_v32, %v231_v37 }
 0x251   :  { %v229_v39 = vpop.xlane.xlu0 %228 }
 0x252   :  { %v232_v40 = vmul.f32 0.03125, %v229_v39  ;;  %v235_v41 = vmul.f32 %v233_v38, %v233_v38 }
 0x254   :  { %v234_v42 = vsub.f32 %v223_v34, %v232_v40  ;;  %v237_v43 = vsel %vm39_vm0, %v235_v41, 0.0 }
 0x255   :  { %238 = vadd.xlane.f32.xlu1 %v237_v43 }
 0x256   :  { %v236_v44 = vmul.f32 %v234_v42, %v234_v42 }
 0x258   :  { %v240_v45 = vsel %vm39_vm0, %v236_v44, 0.0 }
 0x259   :  { %241 = vadd.xlane.f32.xlu1 %v240_v45 }
 0x2e2   :  { %v239_v46 = vpop.xlane.xlu1 %238 }
 0x2e3   :  { %v243_v47 = vmul.f32 0.03125, %v239_v46 }
 0x2e5   :  { %v245_v48 = vadd.f32 1e-05, %v243_v47 }
 0x2e6   :  { %v242_v49 = vpop.xlane.xlu1 %241 }
 0x2e7   :  { %353 = vrsqrt.f32 %v245_v48  ;;  %v244_v50 = vmul.f32 0.03125, %v242_v49 }
 0x2e9   :  { %v246_v51 = vadd.f32 1e-05, %v244_v50 }
 0x2eb   :  { %355 = vrsqrt.f32 %v246_v51 }
 0x2f1   :  { %v354_v52 = vpop.eup %353 }
 0x2f2   :  { %v249_v54 = vmul.f32 %v354_v52, %v233_v38 }
 0x2f4   :  { %v258_v56 = vmul.f32 %v281_v53, %v249_v54 }
 0x2f5   :  { %v356_v57 = vpop.eup %355 }
 0x2f6   :  { %v267_v58 = vadd.f32 %v282_v55, %v258_v56  ;;  %v250_v59 = vmul.f32 %v356_v57, %v234_v42 }
 0x2f8   :  { %269 = vst.msk [vmem:[%s472_s7] sm:$0xff] %vm39_vm0, %v267_v58  ;;  %v259_v60 = vmul.f32 %v281_v53, %v250_v59 }
 0x2fa   :  { %v268_v61 = vadd.f32 %v282_v55, %v259_v60 }
 0x2fc   :  { %270 = vst.msk [vmem:[%s472_s7 + $0x8] sm:$0xff] %vm39_vm0, %v268_v61 }

// kernel: transformer_forward.26
= control target key start
LH: loop header
LB: loop body
LE: loop exit
PB: predicated region body
PF: predicated region fallthrough
CT: control target
= control target key end

     0   :  { %s1560_s18 = smov 0   ;;  %s1562_s19 = smov 0   ;;  %s1735_s0 = inlined_call_operand.vmem [shape: f32[2,8,32], index: 0, kind: input, shape index: {}]   ;;  %s1736_s1 = inlined_call_operand.vmem [shape: f32[2,8,32], index: 1, kind: input, shape index: {}]   ;;  %s1737_s2 = inlined_call_operand.vmem [shape: f32[2,8,32], index: 2, kind: input, shape index: {}]   ;;  %s1738_s3 = inlined_call_operand.vmem [shape: s32[2,8,1], index: 3, kind: input, shape index: {}]   ;;  %s1739_s4 = inlined_call_operand.vmem [shape: s32[2,1,8], index: 4, kind: input, shape index: {}]   ;;  %s1740_s5 = inlined_call_operand.vmem [shape: f32[2,8,32], index: 5, kind: output, shape index: {}]  }
   0x1   :  { %s1564_s20 = smov 0  }
   0x2 LB: > { %s34_s21 = sadd.s32 1, %s1514_s19  ;;  %p1360_p0 = scmp.ge.s32.totalorder %s1518_s20, 1  ;;  %s1518_s20 = sphi %s1564_s20, %s15_s20   ;;  %s1514_s19 = sphi %s1562_s19, %s1744_s19   ;;  %s1510_s18 = sphi %s1560_s18, %s1743_s18  }
   0x3   : > { %p36_p1 = scmp.ge.s32.totalorder %s34_s21, 2  ;;  %p267_p2 = scmp.lt.s32.totalorder %s1518_s20, 3 }
   0x5   : > { %s1746_s21 = smov (%p36_p1, %s34_s21), 0  ;;  %p268_p3 = pnand %p1360_p0, %p267_p2 }
   0x6   : > { %p326_p4 = scmp.lt.s32.totalorder (!%p268_p3), %s1510_s18, 1  ;;  %vm380_vm0 = vcmask (!%p268_p3), 64512   ;;  %v1520_v0 = vmov (!%p268_p3), 0.0   ;;  %vm1521_vm1 = vmmov (!%p268_p3), 0   ;;  %v1522_v1 = vmov (!%p268_p3), 0   ;;  %s1524_s10 = smov (!%p268_p3), 120  }
   0x7   : > { %271 = sbr.rel (%p268_p3) target bundleno = 1446 (0x5a6), region = 40  ;;  %1396 = vmatprep.subr.mxu0 (!%p268_p3), %v1520_v0  ;;  %381 = vst.msk [vmem:[#allocation4] sm:$0xff] (!%p268_p3), %vm380_vm0, %v1520_v0  ;;  %382 = vst.msk [vmem:[#allocation4 + $0x8] sm:$0xff] (!%p268_p3), %vm380_vm0, %v1520_v0  ;;  %1398 = vmatprep.mubr.msk.f32.mxu0 (!%p268_p3), %vm1521_vm1, %v1520_v0  ;;  %vm371_vm4 = vcmask (!%p268_p3), 7168   ;;  %v1523_v9 = vmov (!%p268_p3), -inf   ;;  %v399_v10 = vlaneseq (!%p268_p3)  ;;  %s1525_s14 = smov (!%p268_p3), 112  }
   0x8   : > { %383 = vst.msk [vmem:[#allocation4 + $0x10] sm:$0xff] (!%p268_p3), %vm380_vm0, %v1520_v0  ;;  %384 = vst.msk [vmem:[#allocation4 + $0x18] sm:$0xff] (!%p268_p3), %vm380_vm0, %v1520_v0  ;;  %1470 = vset.pattern.permute.xlu0 (!%p268_p3), %v1522_v1  ;;  %1471 = vset.pattern.permute.xlu1 (!%p268_p3), %v1522_v1  ;;  %s1526_s15 = smov (!%p268_p3), 104   ;;  %s1527_s16 = smov (!%p268_p3), 8   ;;  %vm1216_vm8 = vcmask (!%p268_p3), 130048   ;;  %vm1218_vm9 = vcmask (!%p268_p3), 195584  }
   0x9   : > { %1401 = vmatprep.subr.mxu1 (!%p268_p3), %v1520_v0  ;;  %1403 = vmatprep.mubr.msk.f32.mxu1 (!%p268_p3), %vm1521_vm1, %v1520_v0  ;;  %372 = vst.msk [vmem:[#allocation2] sm:$0xff] (!%p268_p3), %vm371_vm4, %v1523_v9  ;;  %373 = vst.msk [vmem:[#allocation2 + $0x8] sm:$0xff] (!%p268_p3), %vm371_vm4, %v1523_v9  ;;  %v400_v11 = vshrl.u32 (!%p268_p3), %v399_v10, 7  ;;  %s1528_s17 = smov (!%p268_p3), 16   ;;  %vm1220_vm10 = vcmask (!%p268_p3), 261120  }
   0xa   : > { %374 = vst.msk [vmem:[#allocation2 + $0x10] sm:$0xff] (!%p268_p3), %vm371_vm4, %v1523_v9  ;;  %375 = vst.msk [vmem:[#allocation2 + $0x18] sm:$0xff] (!%p268_p3), %vm371_vm4, %v1523_v9 }
   0xb   : > { %376 = vst.msk [vmem:[#allocation3] sm:$0xff] (!%p268_p3), %vm371_vm4, %v1520_v0  ;;  %377 = vst.msk [vmem:[#allocation3 + $0x8] sm:$0xff] (!%p268_p3), %vm371_vm4, %v1520_v0  ;;  %v401_v12 = vsub.s32 (!%p268_p3), 0, %v400_v11 }
   0xc   : > { %378 = vst.msk [vmem:[#allocation3 + $0x10] sm:$0xff] (!%p268_p3), %vm371_vm4, %v1520_v0  ;;  %379 = vst.msk [vmem:[#allocation3 + $0x18] sm:$0xff] (!%p268_p3), %vm371_vm4, %v1520_v0 }
   0xe   : > { %s1748_s18 = smov (!%p326_p4, %s1510_s18), 1 }
   0xf   : > { %s1592_s22 = sshll.u32 %s1748_s18, 3  ;;  %s359_s25 = scalar_lea.vmem %s1739_s4, %s1748_s18 }
  0x10   : > { %s339_s28 = scalar_lea.vmem %s1736_s1, %s1592_s22  ;;  %s332_s6 = scalar_lea.vmem %s1735_s0, %s1592_s22  ;;  %v391_v2 = vld [vmem:[%s359_s25] sm:$0x1]  ;;  %v1683_v49 = vld [vmem:[#allocation2 + $0x8] sm:$0xff] }
  0x11   : > { %v387_v3 = vld [vmem:[%s339_s28] sm:$0xff]  ;;  %s353_s9 = scalar_lea.vmem %s1738_s3, %s1592_s22  ;;  %vm392_vm2 = vcmp.ne.s32.totalorder %v391_v2, 0  ;;  %s346_s13 = scalar_lea.vmem %s1737_s2, %s1592_s22  ;;  %v862_v52 = vld [vmem:[#allocation2 + $0x10] sm:$0xff]  ;;  %v1053_v56 = vld [vmem:[#allocation2 + $0x18] sm:$0xff] }
  0x12   : > { %v385_v4 = vld [vmem:[%s332_s6] sm:$0xff]  ;;  %1397 = vmatpush3.xpose.msk.msra.mxu0 %vm380_vm0, %v387_v3  ;;  %v398_v7 = vsel %vm392_vm2, 1, %v1522_v1  ;;  %s1529_s18 = smov 24   ;;  %s366_s25 = scalar_lea.vmem %s1740_s5, %s1592_s22 }
  0x13   : > { %v386_v5 = vmul.f32 0.35355338, %v385_v4  ;;  %v389_v6 = vld [vmem:[%s353_s9] sm:$0xff]  ;;  %1411 = vmatprep.subr.mxu0 %v1520_v0  ;;  %v402_v13 = vrot.slane %v398_v7, %v401_v12 }
  0x14   : > { %vm390_vm3 = vcmp.ne.s32.totalorder %v389_v6, 0  ;;  %v1633_v20 = vld [vmem:[#allocation2] sm:$0xff] }
  0x15   : > { %v393_v8 = vsel %vm390_vm3, 1, %v1522_v1  ;;  %1399 = vmatmul.mubr.msk.f32.vlgmr.msra.gmra.mrb[0].mxu0 %vm380_vm0, %v386_v5  ;;  %vm403_vm5 = vcmp.eq.s32.totalorder %v402_v13, 1  ;;  %v1648_v24 = vld [vmem:[%s346_s13] sm:$0xff] }
  0x16   : > { %395 = vperm.xlu0 %1470, %v393_v8   ;;  %1413 = vmatprep.mubr.msk.f32.mxu0 %vm1521_vm1, %v1520_v0 }
  0x17   : > { %1402 = vmatpush3.msra.mxu1 %v1648_v24 }
  0x18   : > { %1406 = vmatprep.subr.mxu1 %v1520_v0 }
  0x95   : > { %v396_v14 = vpop.permute.xlu0 %395 }
  0x96   : > { %vm397_vm6 = vcmp.eq.s32.totalorder %v396_v14, 1 }
  0x97   : > { %vm1626_vm7 = vmand %vm397_vm6, %vm403_vm5 }
  0xe8   : > { %v478_v16 = vpop.f32.mrb[0].mxu0 }
  0xe9   : > { %v482_v17 = vsel %vm1626_vm7, %v478_v16, -1e+09  ;;  %v1400_v18 = vpop.f32.mrb[1].mxu0 }
  0xea   : > { %v484_v19 = vsel %vm380_vm0, %v482_v17, -inf }
  0xeb   : > { %485 = vmax.xlane.f32.xlu0 %v484_v19 }
 0x178   : > { %v486_v21 = vpop.xlane.xlu0 %485 }
 0x179   : > { %v1636_v22 = vmax.f32 %v1633_v20, %v486_v21 }
 0x17b   : > { %v488_v23 = vsub.f32 %v1633_v20, %v1636_v22  ;;  %589 = vst.msk [vmem:[#allocation2] sm:$0xff] %vm371_vm4, %v1636_v22  ;;  %493 = vperm.xlu1 %1471, %v1636_v22  }
 0x17d   : > { %v489_v13 = vmul.f32 1.442695, %v488_v23 }
 0x17f   : > { %592 = vrot.lane.b32.xlu1 %v387_v3, %s1524_s10 }
 0x183   : > { %590 = vrot.lane.b32.xlu1 %v386_v5, %s1524_s10 }
 0x187   : > { %784 = vrot.lane.b32.xlu1 %v387_v3, %s1525_s14 }
 0x18b   : > { %782 = vrot.lane.b32.xlu1 %v386_v5, %s1525_s14 }
 0x18f   : > { %975 = vrot.lane.b32.xlu1 %v387_v3, %s1526_s15 }
 0x193   : > { %973 = vrot.lane.b32.xlu1 %v386_v5, %s1526_s15 }
 0x1fa   : > { %v494_v25 = vpop.permute.xlu1 %493 }
 0x1fb   : > { %v496_v26 = vsub.f32 %v482_v17, %v494_v25 }
 0x1fd   : > { %v497_v27 = vmul.f32 1.442695, %v496_v26 }
 0x1fe   : > { %v593_v28 = vpop.permute.xlu1 %592 }
 0x1ff   : > { %1472 = vpow2.f32 %v497_v27 }
 0x202   : > { %v591_v29 = vpop.permute.xlu1 %590 }
 0x206   : > { %v785_v30 = vpop.permute.xlu1 %784 }
 0x209   : > { %v1473_v31 = vpop.eup %1472 }
 0x20a   : > { %1404 = vmatmul.mubr.msk.f32.vlgmr.msra.gmra.mrb[0].mxu1 %vm380_vm0, %v1473_v31  ;;  %v783_v32 = vpop.permute.xlu1 %782  ;;  %v501_v61 = vsel %vm380_vm0, %v1473_v31, 0.0 }
 0x20b   : > { %1407 = vmatpush3.xpose.msk.msra.mxu1 %vm380_vm0, %v593_v28  ;;  %1408 = vmatprep.mubr.msk.f32.mxu1 %vm1521_vm1, %v1520_v0 }
 0x20c   : > { %1416 = vmatprep.subr.mxu1 %v1520_v0 }
 0x20e   : > { %1409 = vmatmul.mubr.msk.f32.vlgmr.msra.gmra.mrb[2].mxu1 %vm380_vm0, %v591_v29  ;;  %v976_v33 = vpop.permute.xlu1 %975 }
 0x20f   : > { %1417 = vmatpush3.xpose.msk.msra.mxu1 %vm380_vm0, %v785_v30  ;;  %1418 = vmatprep.mubr.msk.f32.mxu1 %vm1521_vm1, %v1520_v0  ;;  %v687_v30 = vld [vmem:[#allocation3 + $0x8] sm:$0xff] }
 0x210   : > { %1426 = vmatprep.subr.mxu1 %v1520_v0 }
 0x212   : > { %1419 = vmatmul.mubr.msk.f32.vlgmr.msra.gmra.mrb[4].mxu1 %vm380_vm0, %v783_v32  ;;  %v974_v34 = vpop.permute.xlu1 %973 }
 0x213   : > { %1427 = vmatpush3.xpose.msk.msra.mxu1 %vm380_vm0, %v976_v33  ;;  %1428 = vmatprep.mubr.msk.f32.mxu1 %vm1521_vm1, %v1520_v0  ;;  %v879_v33 = vld [vmem:[#allocation3 + $0x10] sm:$0xff] }
 0x216   : > { %1429 = vmatmul.mubr.msk.f32.vlgmr.msra.gmra.mrb[6].mxu1 %vm380_vm0, %v974_v34 }
 0x2dd   : > { %v1672_v35 = vpop.f32.mrb[0].mxu1 }
 0x2de   : > { %v1405_v36 = vpop.f32.mrb[1].mxu1 }
 0x2df   : > { %v507_v36 = vld [vmem:[#allocation4] sm:$0xff] }
 0x2e1   : > { %v664_v37 = vpop.f32.mrb[2].mxu1 }
 0x2e2   : > { %v668_v38 = vsel %vm1626_vm7, %v664_v37, -1e+09  ;;  %v1410_v39 = vpop.f32.mrb[3].mxu1 }
 0x2e3   : > { %v671_v40 = vsel %vm380_vm0, %v668_v38, -inf }
 0x2e4   : > { %672 = vmax.xlane.f32.xlu1 %v671_v40  ;;  %v1070_v40 = vld [vmem:[#allocation3 + $0x18] sm:$0xff] }
 0x2e5   : > { %v856_v41 = vpop.f32.mrb[4].mxu1 }
 0x2e6   : > { %v860_v42 = vsel %vm1626_vm7, %v856_v41, -1e+09  ;;  %v1420_v43 = vpop.f32.mrb[5].mxu1 }
 0x2e7   : > { %v863_v44 = vsel %vm380_vm0, %v860_v42, -inf }
 0x2e8   : > { %864 = vmax.xlane.f32.xlu0 %v863_v44 }
 0x2e9   : > { %v1047_v45 = vpop.f32.mrb[6].mxu1 }
 0x2ea   : > { %v1051_v46 = vsel %vm1626_vm7, %v1047_v45, -1e+09  ;;  %v1430_v47 = vpop.f32.mrb[7].mxu1 }
 0x2eb   : > { %v1054_v48 = vsel %vm380_vm0, %v1051_v46, -inf }
 0x2ec   : > { %1055 = vmax.xlane.f32.xlu0 %v1054_v48 }
 0x371   : > { %v673_v50 = vpop.xlane.xlu1 %672 }
 0x372   : > { %v674_v51 = vmax.f32 %v1683_v49, %v673_v50 }
 0x374   : > { %v675_v53 = vsub.f32 %v1683_v49, %v674_v51  ;;  %781 = vst.msk [vmem:[#allocation2 + $0x8] sm:$0xff] %vm371_vm4, %v674_v51  ;;  %680 = vperm.xlu0 %1470, %v674_v51  }
 0x375   : > { %v865_v54 = vpop.xlane.xlu0 %864 }
 0x376   : > { %v866_v55 = vmax.f32 %v862_v52, %v865_v54  ;;  %v676_v20 = vmul.f32 1.442695, %v675_v53 }
 0x378   : > { %v867_v57 = vsub.f32 %v862_v52, %v866_v55  ;;  %972 = vst.msk [vmem:[#allocation2 + $0x10] sm:$0xff] %vm371_vm4, %v866_v55  ;;  %872 = vperm.xlu1 %1471, %v866_v55  }
 0x379   : > { %v1056_v58 = vpop.xlane.xlu0 %1055 }
 0x37a   : > { %v1057_v59 = vmax.f32 %v1053_v56, %v1056_v58  ;;  %v868_v17 = vmul.f32 1.442695, %v867_v57 }
 0x37c   : > { %v1058_v60 = vsub.f32 %v1053_v56, %v1057_v59  ;;  %1163 = vst.msk [vmem:[#allocation2 + $0x18] sm:$0xff] %vm371_vm4, %v1057_v59  ;;  %1063 = vperm.xlu0 %1470, %v1057_v59   ;;  %v887_v56 = vld [vmem:[#allocation4 + $0x10] sm:$0xff] }
 0x37e   : > { %v1059_v19 = vmul.f32 1.442695, %v1058_v60 }
 0x380   : > { %703 = vrot.lane.b32.xlu0 %v1648_v24, %s1524_s10 }
 0x384   : > { %894 = vrot.lane.b32.xlu0 %v1648_v24, %s1525_s14 }
 0x388   : > { %1085 = vrot.lane.b32.xlu0 %v1648_v24, %s1526_s15  ;;  %v499_v24 = vld [vmem:[#allocation3] sm:$0xff] }
 0x3a7   : > { %502 = vadd.xlane.f32.xlu0 %v501_v61  ;;  %v1078_v61 = vld [vmem:[#allocation4 + $0x18] sm:$0xff] }
 0x3f3   : > { %v681_v62 = vpop.permute.xlu0 %680 }
 0x3f4   : > { %v683_v63 = vsub.f32 %v668_v38, %v681_v62 }
 0x3f6   : > { %v684_v1 = vmul.f32 1.442695, %v683_v63 }
 0x3f7   : > { %v873_v2 = vpop.permute.xlu1 %872 }
 0x3f8   : > { %1474 = vpow2.f32 %v684_v1  ;;  %v875_v3 = vsub.f32 %v860_v42, %v873_v2 }
 0x3fa   : > { %v876_v4 = vmul.f32 1.442695, %v875_v3 }
 0x3fb   : > { %v1064_v5 = vpop.permute.xlu0 %1063 }
 0x3fc   : > { %1476 = vpow2.f32 %v876_v4  ;;  %v1066_v6 = vsub.f32 %v1051_v46, %v1064_v5 }
 0x3fe   : > { %v1067_v7 = vmul.f32 1.442695, %v1066_v6 }
 0x3ff   : > { %v704_v8 = vpop.permute.xlu0 %703 }
 0x400   : > { %1478 = vpow2.f32 %v1067_v7  ;;  %1412 = vmatpush3.msra.mxu0 %v704_v8 }
 0x401   : > { %1421 = vmatprep.subr.mxu0 %v1520_v0  ;;  %1480 = vpow2.f32 %v489_v13 }
 0x402   : > { %v1475_v9 = vpop.eup %1474  ;;  %1482 = vpow2.f32 %v868_v17 }
 0x403   : > { %1414 = vmatmul.mubr.msk.f32.vlgmr.msra.gmra.mrb[2].mxu0 %vm380_vm0, %v1475_v9  ;;  %v689_v10 = vsel %vm380_vm0, %v1475_v9, 0.0  ;;  %v895_v11 = vpop.permute.xlu0 %894  ;;  %1484 = vpow2.f32 %v1059_v19 }
 0x404   : > { %690 = vadd.xlane.f32.xlu1 %v689_v10  ;;  %1422 = vmatpush3.msra.mxu0 %v895_v11  ;;  %1486 = vpow2.f32 %v676_v20 }
 0x405   : > { %1423 = vmatprep.mubr.msk.f32.mxu0 %vm1521_vm1, %v1520_v0  ;;  %1431 = vmatprep.subr.mxu0 %v1520_v0 }
 0x406   : > { %v1477_v12 = vpop.eup %1476 }
 0x407   : > { %1424 = vmatmul.mubr.msk.f32.vlgmr.msra.gmra.mrb[4].mxu0 %vm380_vm0, %v1477_v12  ;;  %v881_v14 = vsel %vm380_vm0, %v1477_v12, 0.0  ;;  %v1086_v15 = vpop.permute.xlu0 %1085 }
 0x408   : > { %882 = vadd.xlane.f32.xlu0 %v881_v14  ;;  %1432 = vmatpush3.msra.mxu0 %v1086_v15 }
 0x409   : > { %1433 = vmatprep.mubr.msk.f32.mxu0 %vm1521_vm1, %v1520_v0 }
 0x40a   : > { %v1479_v16 = vpop.eup %1478 }
 0x40b   : > { %1434 = vmatmul.mubr.msk.f32.vlgmr.msra.gmra.mrb[6].mxu0 %vm380_vm0, %v1479_v16  ;;  %v1072_v18 = vsel %vm380_vm0, %v1479_v16, 0.0  ;;  %v1481_v21 = vpop.eup %1480 }
 0x40c   : > { %1073 = vadd.xlane.f32.xlu0 %v1072_v18  ;;  %v1483_v22 = vpop.eup %1482  ;;  %v500_v25 = vmul.f32 %v1481_v21, %v499_v24 }
 0x40d   : > { %v1485_v23 = vpop.eup %1484  ;;  %v880_v37 = vmul.f32 %v1483_v22, %v879_v33 }
 0x40e   : > { %v1487_v0 = vpop.eup %1486  ;;  %v1071_v44 = vmul.f32 %v1485_v23, %v1070_v40 }
 0x40f   : > { %v688_v31 = vmul.f32 %v1487_v0, %v687_v30 }
 0x415   : > { %510 = vperm.xlu1 %1471, %v1481_v21  }
 0x419   : > { %890 = vperm.xlu1 %1471, %v1483_v22  }
 0x41d   : > { %1081 = vperm.xlu1 %1471, %v1485_v23  }
 0x422   : > { %698 = vperm.xlu0 %1470, %v1487_v0  }
 0x434   : > { %v503_v26 = vpop.xlane.xlu0 %502 }
 0x435   : > { %v504_v27 = vadd.f32 %v503_v26, %v500_v25 }
 0x437   : > { %506 = vst.msk [vmem:[#allocation3] sm:$0xff] %vm371_vm4, %v504_v27 }
 0x43e   : > { %v1168_v28 = vld [vmem:[#allocation3] sm:$0xff] }
 0x43f   : > { %1488 = vrcp.f32 %v1168_v28 }
 0x449   : > { %v1489_v29 = vpop.eup %1488 }
 0x44a   : > { %1172 = vperm.xlu0 %1470, %v1489_v29  }
 0x491   : > { %v691_v32 = vpop.xlane.xlu1 %690 }
 0x492   : > { %v692_v34 = vadd.f32 %v691_v32, %v688_v31 }
 0x494   : > { %693 = vst.msk [vmem:[#allocation3 + $0x8] sm:$0xff] %vm371_vm4, %v692_v34 }
 0x495   : > { %v883_v38 = vpop.xlane.xlu0 %882  ;;  %v511_v39 = vpop.permute.xlu1 %510 }
 0x496   : > { %v884_v41 = vadd.f32 %v883_v38, %v880_v37  ;;  %v513_v42 = vmul.f32 %v511_v39, %v507_v36 }
 0x498   : > { %885 = vst.msk [vmem:[#allocation3 + $0x10] sm:$0xff] %vm371_vm4, %v884_v41  ;;  %v587_v43 = vadd.f32 %v1672_v35, %v513_v42  ;;  %v695_v35 = vld [vmem:[#allocation4 + $0x8] sm:$0xff] }
 0x499   : > { %v1074_v45 = vpop.xlane.xlu0 %1073  ;;  %v891_v54 = vpop.permute.xlu1 %890 }
 0x49a   : > { %588 = vst.msk [vmem:[#allocation4] sm:$0xff] %vm380_vm0, %v587_v43  ;;  %v1075_v46 = vadd.f32 %v1074_v45, %v1071_v44  ;;  %v893_v60 = vmul.f32 %v891_v54, %v887_v56 }
 0x49b   : > { %v1177_v47 = vld [vmem:[#allocation3 + $0x8] sm:$0xff] }
 0x49c   : > { %1076 = vst.msk [vmem:[#allocation3 + $0x18] sm:$0xff] %vm371_vm4, %v1075_v46  ;;  %1490 = vrcp.f32 %v1177_v47 }
 0x49d   : > { %v1082_v62 = vpop.permute.xlu1 %1081 }
 0x49e   : > { %v1084_v3 = vmul.f32 %v1082_v62, %v1078_v61 }
 0x49f   : > { %v1186_v48 = vld [vmem:[#allocation3 + $0x10] sm:$0xff] }
 0x4a0   : > { %1492 = vrcp.f32 %v1186_v48 }
 0x4a1   : > { %v699_v53 = vpop.permute.xlu0 %698  ;;  %v1167_v17 = vld [vmem:[#allocation4] sm:$0xff] }
 0x4a2   : > { %v701_v55 = vmul.f32 %v699_v53, %v695_v35 }
 0x4a3   : > { %v1195_v49 = vld [vmem:[#allocation3 + $0x18] sm:$0xff] }
 0x4a4   : > { %1494 = vrcp.f32 %v1195_v49 }
 0x4a6   : > { %v1491_v50 = vpop.eup %1490 }
 0x4a7   : > { %1181 = vperm.xlu1 %1471, %v1491_v50  }
 0x4aa   : > { %v1493_v51 = vpop.eup %1492 }
 0x4ab   : > { %1190 = vperm.xlu0 %1470, %v1493_v51  }
 0x4ae   : > { %v1495_v52 = vpop.eup %1494 }
 0x4af   : > { %1199 = vperm.xlu1 %1471, %v1495_v52  }
 0x4c9   : > { %v1173_v7 = vpop.permute.xlu0 %1172 }
 0x4ca   : > { %v1175_v19 = vmul.f32 %v1173_v7, %v1167_v17 }
 0x4d6   : > { %v775_v57 = vpop.f32.mrb[2].mxu0 }
 0x4d7   : > { %v779_v58 = vadd.f32 %v775_v57, %v701_v55  ;;  %v1415_v59 = vpop.f32.mrb[3].mxu0 }
 0x4d9   : > { %780 = vst.msk [vmem:[#allocation4 + $0x8] sm:$0xff] %vm380_vm0, %v779_v58 }
 0x4da   : > { %v966_v63 = vpop.f32.mrb[4].mxu0 }
 0x4db   : > { %v970_v1 = vadd.f32 %v966_v63, %v893_v60  ;;  %v1425_v2 = vpop.f32.mrb[5].mxu0 }
 0x4dd   : > { %971 = vst.msk [vmem:[#allocation4 + $0x10] sm:$0xff] %vm380_vm0, %v970_v1 }
 0x4de   : > { %v1157_v4 = vpop.f32.mrb[6].mxu0 }
 0x4df   : > { %v1161_v5 = vadd.f32 %v1157_v4, %v1084_v3  ;;  %v1435_v6 = vpop.f32.mrb[7].mxu0 }
 0x4e0   : > { %v1176_v9 = vld [vmem:[#allocation4 + $0x8] sm:$0xff] }
 0x4e1   : > { %1162 = vst.msk [vmem:[#allocation4 + $0x18] sm:$0xff] %vm380_vm0, %v1161_v5 }
 0x4e4   : > { %v1185_v12 = vld [vmem:[#allocation4 + $0x10] sm:$0xff] }
 0x4e8   : > { %v1194_v15 = vld [vmem:[#allocation4 + $0x18] sm:$0xff] }
 0x526   : > { %v1182_v8 = vpop.permute.xlu1 %1181 }
 0x527   : > { %v1184_v10 = vmul.f32 %v1182_v8, %v1176_v9 }
 0x529   : > { %1204 = vrot.lane.b32.xlu0 %v1184_v10, %s1527_s16 }
 0x52a   : > { %v1191_v11 = vpop.permute.xlu0 %1190 }
 0x52b   : > { %v1193_v13 = vmul.f32 %v1191_v11, %v1185_v12 }
 0x52d   : > { %1208 = vrot.lane.b32.xlu1 %v1193_v13, %s1528_s17 }
 0x52e   : > { %v1200_v14 = vpop.permute.xlu1 %1199 }
 0x52f   : > { %v1202_v16 = vmul.f32 %v1200_v14, %v1194_v15 }
 0x531   : > { %1212 = vrot.lane.b32.xlu0 %v1202_v16, %s1529_s18 }
 0x59b   : > { %v1205_v18 = vpop.permute.xlu0 %1204 }
 0x59c   : > { %v1215_v21 = vsel %vm380_vm0, %v1175_v19, %v1205_v18 }
 0x59f   : > { %v1209_v20 = vpop.permute.xlu1 %1208 }
 0x5a0   : > { %v1217_v22 = vsel %vm1216_vm8, %v1215_v21, %v1209_v20 }
 0x5a3   : > { %v1213_v23 = vpop.permute.xlu0 %1212 }
 0x5a4   : > { %v1219_v0 = vsel %vm1218_vm9, %v1217_v22, %v1213_v23 }
 0x5a5   : > { %1221 = vst.msk [vmem:[%s366_s25] sm:$0xff] %vm1220_vm10, %v1219_v0 }
 0x5a6 PF: > { %s15_s20 = sadd.s32 1, %s1518_s20   ;;  %s1743_s18 = smov %s1514_s19 }
 0x5a7   : > { %p12_p5 = scmp.ge.s32.totalorder %s15_s20, 4   ;;  %s1744_s19 = smov %s1746_s21 }
 0x5a9   :  { %14 = sbr.rel (!%p12_p5) target bundleno = 2 (0x2), region = 99 }

// kernel: transformer_forward.37
= control target key start
LH: loop header
LB: loop body
LE: loop exit
PB: predicated region body
PF: predicated region fallthrough
CT: control target
= control target key end

     0   :  { %vm29_vm0 = vcmask 261120   ;;  %vm18_vm1 = vcmask 523264   ;;  %v165_v3 = vmov 0.0   ;;  %s221_s1 = inlined_call_operand.vmem [shape: f32[32,64], index: 1, kind: input, shape index: {}]   ;;  %s222_s0 = inlined_call_operand.vmem [shape: f32[16,32], index: 0, kind: input, shape index: {}]   ;;  %s223_s2 = inlined_call_operand.vmem [shape: f32[1,64], index: 2, kind: input, shape index: {}]   ;;  %s224_s3 = inlined_call_operand.vmem [shape: f32[16,64], index: 3, kind: output, shape index: {}]  }
   0x1   :  { %v25_v0 = vld [vmem:[%s221_s1] sm:$0xff]  ;;  %v26_v1 = vld [vmem:[%s221_s1 + $0x8] sm:$0xff]  ;;  %v27_v2 = vld [vmem:[%s221_s1 + $0x10] sm:$0xff]  ;;  %20 = vst.msk [vmem:[#allocation2 + $0x8] sm:$0xff] %vm18_vm1, %v165_v3 }
   0x2   :  { %19 = vst.msk [vmem:[#allocation2] sm:$0xff] %vm18_vm1, %v165_v3  ;;  %v156_v4 = vpack.c.bf16 %v26_v1, %v25_v0  ;;  %v28_v5 = vld [vmem:[%s221_s1 + $0x18] sm:$0xff]  ;;  %v23_v6 = vld [vmem:[%s222_s0] sm:$0xff]  ;;  %v24_v8 = vld [vmem:[%s222_s0 + $0x8] sm:$0xff] }
   0x3   :  { %v160_v7 = vpack.c.bf16 %v28_v5, %v27_v2  ;;  %153 = vmatprep.mubr.msk.f32.mxu0 %vm29_vm0, %v23_v6  ;;  %v138_v15 = vld [vmem:[%s223_s2] ss:$0 sm:$0xff] }
   0x4   :  { %157 = vmatprep.subr.bf16.mxu0 %v156_v4 }
   0x5   :  { %159 = vmatpush3.bf16.msra.mxu0 %v156_v4 }
   0x6   :  { %161 = vmatprep.subr.bf16.mxu0 %v160_v7 }
   0x8   :  { %v22_v9 = vld [vmem:[#allocation2 + $0x8] sm:$0xff] }
   0x9   :  { %163 = vmatpush3.bf16.msra.mxu0 %v160_v7  ;;  %v21_v10 = vld [vmem:[#allocation2] sm:$0xff] }
   0xc   :  { %154 = vmatmul.mubr.msk.f32.vlgmr.msra.gmra.mrb[0].mxu0 %vm29_vm0, %v24_v8 }
  0xdf   :  { %v155_v11 = vpop.f32.mrb[0].mxu0 }
  0xe0   :  { %v112_v12 = vadd.f32 %v155_v11, %v22_v9  ;;  %v102_v13 = vpop.f32.mrb[1].mxu0 }
  0xe1   :  { %v111_v14 = vadd.f32 %v102_v13, %v21_v10 }
  0xe2   :  { %115 = vst.msk [vmem:[#allocation2 + $0x8] sm:$0xff] %vm18_vm1, %v112_v12 }
  0xe3   :  { %114 = vst.msk [vmem:[#allocation2] sm:$0xff] %vm18_vm1, %v111_v14 }
  0xe9   :  { %v120_v16 = vld [vmem:[#allocation2 + $0x8] sm:$0xff] }
  0xea   :  { %v129_v17 = vadd.f32 %v138_v15, %v120_v16  ;;  %v119_v18 = vld [vmem:[#allocation2] sm:$0xff] }
  0xeb   :  { %v128_v19 = vadd.f32 %v138_v15, %v119_v18 }
  0xec   :  { %131 = vst.msk [vmem:[%s224_s3 + $0x8] sm:$0xff] %vm18_vm1, %v129_v17 }
  0xed   :  { %130 = vst.msk [vmem:[%s224_s3] sm:$0xff] %vm18_vm1, %v128_v19 }

// kernel: transformer_forward.36
= control target key start
LH: loop header
LB: loop body
LE: loop exit
PB: predicated region body
PF: predicated region fallthrough
CT: control target
= control target key end

     0   :  { %vm18_vm0 = vcmask 261120   ;;  %v164_v3 = vmov 0.0   ;;  %s220_s1 = inlined_call_operand.vmem [shape: f32[32,32], index: 1, kind: input, shape index: {}]   ;;  %s221_s0 = inlined_call_operand.vmem [shape: f32[16,32], index: 0, kind: input, shape index: {}]   ;;  %s222_s2 = inlined_call_operand.vmem [shape: f32[1,32], index: 2, kind: input, shape index: {}]   ;;  %s223_s3 = inlined_call_operand.vmem [shape: f32[16,32], index: 3, kind: output, shape index: {}]  }
   0x1   :  { %v25_v0 = vld [vmem:[%s220_s1] sm:$0xff]  ;;  %v26_v1 = vld [vmem:[%s220_s1 + $0x8] sm:$0xff]  ;;  %v27_v2 = vld [vmem:[%s220_s1 + $0x10] sm:$0xff]  ;;  %20 = vst.msk [vmem:[#allocation2 + $0x8] sm:$0xff] %vm18_vm0, %v164_v3 }
   0x2   :  { %19 = vst.msk [vmem:[#allocation2] sm:$0xff] %vm18_vm0, %v164_v3  ;;  %v155_v4 = vpack.c.bf16 %v26_v1, %v25_v0  ;;  %v28_v5 = vld [vmem:[%s220_s1 + $0x18] sm:$0xff]  ;;  %v23_v6 = vld [vmem:[%s221_s0] sm:$0xff]  ;;  %v24_v8 = vld [vmem:[%s221_s0 + $0x8] sm:$0xff] }
   0x3   :  { %v159_v7 = vpack.c.bf16 %v28_v5, %v27_v2  ;;  %152 = vmatprep.mubr.msk.f32.mxu0 %vm18_vm0, %v23_v6  ;;  %v137_v15 = vld [vmem:[%s222_s2] ss:$0 sm:$0xff] }
   0x4   :  { %156 = vmatprep.subr.bf16.mxu0 %v155_v4 }
   0x5   :  { %158 = vmatpush3.bf16.msra.mxu0 %v155_v4 }
   0x6   :  { %160 = vmatprep.subr.bf16.mxu0 %v159_v7 }
   0x8   :  { %v22_v9 = vld [vmem:[#allocation2 + $0x8] sm:$0xff] }
   0x9   :  { %162 = vmatpush3.bf16.msra.mxu0 %v159_v7  ;;  %v21_v10 = vld [vmem:[#allocation2] sm:$0xff] }
   0xc   :  { %153 = vmatmul.mubr.msk.f32.vlgmr.msra.gmra.mrb[0].mxu0 %vm18_vm0, %v24_v8 }
  0xdf   :  { %v154_v11 = vpop.f32.mrb[0].mxu0 }
  0xe0   :  { %v112_v12 = vadd.f32 %v154_v11, %v22_v9  ;;  %v102_v13 = vpop.f32.mrb[1].mxu0 }
  0xe1   :  { %v111_v14 = vadd.f32 %v102_v13, %v21_v10 }
  0xe2   :  { %114 = vst.msk [vmem:[#allocation2 + $0x8] sm:$0xff] %vm18_vm0, %v112_v12 }
  0xe3   :  { %113 = vst.msk [vmem:[#allocation2] sm:$0xff] %vm18_vm0, %v111_v14 }
  0xe9   :  { %v119_v16 = vld [vmem:[#allocation2 + $0x8] sm:$0xff] }
  0xea   :  { %v128_v17 = vadd.f32 %v137_v15, %v119_v16  ;;  %v118_v18 = vld [vmem:[#allocation2] sm:$0xff] }
  0xeb   :  { %v127_v19 = vadd.f32 %v137_v15, %v118_v18 }
  0xec   :  { %130 = vst.msk [vmem:[%s223_s3 + $0x8] sm:$0xff] %vm18_vm0, %v128_v17 }
  0xed   :  { %129 = vst.msk [vmem:[%s223_s3] sm:$0xff] %vm18_vm0, %v127_v19 }

// kernel: transformer_forward.49
= control target key start
LH: loop header
LB: loop body
LE: loop exit
PB: predicated region body
PF: predicated region fallthrough
CT: control target
= control target key end

     0   :  { %vm30_vm0 = vcmask 261120   ;;  %vm19_vm1 = vcmask 130048   ;;  %v205_v6 = vmov 0.0   ;;  %s270_s0 = inlined_call_operand.vmem [shape: f32[16,32], index: 0, kind: input, shape index: {}]   ;;  %s271_s1 = inlined_call_operand.vmem [shape: f32[32,16], index: 1, kind: input, shape index: {}]   ;;  %s272_s2 = inlined_call_operand.vmem [shape: f32[1,16], index: 2, kind: input, shape index: {}]   ;;  %s273_s3 = inlined_call_operand.hbm [shape: f32[16,16], index: 3, kind: output, shape index: {}]  }
   0x1   :  { %v26_v0 = vld [vmem:[%s271_s1] sm:$0xff]  ;;  %v27_v1 = vld [vmem:[%s271_s1 + $0x8] sm:$0xff]  ;;  %v28_v2 = vld [vmem:[%s271_s1 + $0x10] sm:$0xff]  ;;  %21 = vst.msk [vmem:[#allocation2 + $0x8] sm:$0xff] %vm19_vm1, %v205_v6 }
   0x2   :  { %v169_v3 = vpack.c.bf16 %v27_v1, %v26_v0  ;;  %v29_v4 = vld [vmem:[%s271_s1 + $0x18] sm:$0xff]  ;;  %v24_v5 = vld [vmem:[%s270_s0] sm:$0xff]  ;;  %20 = vst.msk [vmem:[#allocation2] sm:$0xff] %vm19_vm1, %v205_v6 }
   0x3   :  { %v173_v7 = vpack.c.bf16 %v29_v4, %v28_v2  ;;  %166 = vmatprep.mubr.msk.f32.mxu0 %vm30_vm0, %v24_v5 }
   0x4   :  { %8 = vsyncpa [#allocation4], 0  ;;  %170 = vmatprep.subr.bf16.mxu0 %v169_v3  ;;  %v25_v8 = vld [vmem:[%s270_s0 + $0x8] sm:$0xff]  ;;  %v151_v15 = vld [vmem:[%s272_s2] ss:$0 sm:$0xff]  ;;  %s206_s25 = smov [#allocation3]  }
   0x5   :  { %172 = vmatpush3.bf16.msra.mxu0 %v169_v3  ;;  %s138_s26 = sshll.u32 %s206_s25, 4  ;;  %s139_s26 = int_to_ptr.vmem [resolvable:$true] %s138_s26 }
   0x6   :  { %174 = vmatprep.subr.bf16.mxu0 %v173_v7  ;;  %s181_s0 = scalar_lea.vmem %s139_s26, 256  ;;  %p186_p1 = scmp.lt.s32.totalorder %s139_s26, %s139_s26 }
   0x7   :  { %p182_p0 = scmp.ne.s32.totalorder %s139_s26, %s181_s0  ;;  %p187_p2 = scmp.lt.s32.totalorder %s181_s0, %s181_s0 }
   0x8   :  { %v23_v9 = vld [vmem:[#allocation2 + $0x8] sm:$0xff] }
   0x9   :  { %176 = vmatpush3.bf16.msra.mxu0 %v173_v7  ;;  %v22_v10 = vld [vmem:[#allocation2] sm:$0xff]  ;;  %p188_p3 = por %p187_p2, %p186_p1 }
   0xb   :  { %p189_p4 = pnand %p188_p3, %p182_p0 }
   0xc   :  { %167 = vmatmul.mubr.msk.f32.vlgmr.msra.gmra.mrb[0].mxu0 %vm30_vm0, %v25_v8 }
  0xdf   :  { %v168_v11 = vpop.f32.mrb[0].mxu0 }
  0xe0   :  { %v113_v12 = vadd.f32 %v168_v11, %v23_v9  ;;  %v103_v13 = vpop.f32.mrb[1].mxu0 }
  0xe1   :  { %v112_v14 = vadd.f32 %v103_v13, %v22_v10 }
  0xe2   :  { %116 = vst.msk [vmem:[#allocation2 + $0x8] sm:$0xff] %vm19_vm1, %v113_v12 }
  0xe3   :  { %115 = vst.msk [vmem:[#allocation2] sm:$0xff] %vm19_vm1, %v112_v14 }
  0xe9   :  { %v121_v16 = vld [vmem:[#allocation2 + $0x8] sm:$0xff] }
  0xea   :  { %v120_v17 = vld [vmem:[#allocation2] sm:$0xff]  ;;  %v130_v18 = vadd.f32 %v151_v15, %v121_v16 }
  0xeb   :  { %v129_v19 = vadd.f32 %v151_v15, %v120_v17 }
  0xec   :  { %132 = vst.msk [vmem:[#allocation3 + $0x8] sm:$0xff] %vm19_vm1, %v130_v18 }
  0xed   :  { %131 = vst.msk [vmem:[#allocation3] sm:$0xff] %vm19_vm1, %v129_v19 }
  0xee   :  { %192 = shalt.err (!%p189_p4)
}
  0xef   :  { %s193_s28 = scalar_lea.hbm %s273_s3, 256 }
  0xf0   :  { %p194_p5 = scmp.ne.s32.totalorder %s273_s3, %s193_s28  ;;  %p197_p6 = scmp.lt.u32.totalorder %s193_s28, %s273_s3 }
  0xf2   :  { %p199_p7 = pnand %p197_p6, %p194_p5 }
  0xf4   :  { %202 = shalt.err (!%p199_p7)
}
  0xf5   :  { %s207_s6 = smov 128   ;;  %s208_s7 = smov 8  }
  0xf6   :  { %144 = dma.vmem_to_hbm [thread:$0]  %s139_s26, 256, %s273_s3, [#allocation4], %s207_s6, %s207_s6, %s208_s7  }
  0xf7   :  { %203 = dma.done.wait [#allocation4], 256  }
  0xf8   :  { %204 = vsyncadd [#allocation4], 4294967040 }
  0xf9   :  { %148 = vsyncpa [#allocation4], 1 }

// kernel: transformer_forward.34
= control target key start
LH: loop header
LB: loop body
LE: loop exit
PB: predicated region body
PF: predicated region fallthrough
CT: control target
= control target key end

     0   :  { %s1572_s18 = smov 0   ;;  %s1574_s19 = smov 0   ;;  %s1747_s0 = inlined_call_operand.vmem [shape: f32[2,8,32], index: 0, kind: input, shape index: {}]   ;;  %s1748_s1 = inlined_call_operand.vmem [shape: f32[2,8,32], index: 1, kind: input, shape index: {}]   ;;  %s1749_s2 = inlined_call_operand.vmem [shape: f32[2,8,32], index: 2, kind: input, shape index: {}]   ;;  %s1750_s3 = inlined_call_operand.vmem [shape: s32[2,8,1], index: 3, kind: input, shape index: {}]   ;;  %s1751_s4 = inlined_call_operand.vmem [shape: s32[2,1,8], index: 4, kind: input, shape index: {}]   ;;  %s1752_s5 = inlined_call_operand.vmem [shape: f32[2,8,32], index: 5, kind: output, shape index: {}]  }
   0x1   :  { %s1576_s20 = smov 0  }
   0x2 LB: > { %s34_s21 = sadd.s32 1, %s1526_s19  ;;  %p1372_p0 = scmp.ge.s32.totalorder %s1530_s20, 1  ;;  %s1530_s20 = sphi %s1576_s20, %s15_s20   ;;  %s1526_s19 = sphi %s1574_s19, %s1756_s19   ;;  %s1522_s18 = sphi %s1572_s18, %s1755_s18  }
   0x3   : > { %p36_p1 = scmp.ge.s32.totalorder %s34_s21, 2  ;;  %p267_p2 = scmp.lt.s32.totalorder %s1530_s20, 3 }
   0x5   : > { %s1758_s21 = smov (%p36_p1, %s34_s21), 0  ;;  %p268_p3 = pnand %p1372_p0, %p267_p2 }
   0x6   : > { %p326_p4 = scmp.lt.s32.totalorder (!%p268_p3), %s1522_s18, 1  ;;  %vm380_vm0 = vcmask (!%p268_p3), 64512   ;;  %v1532_v0 = vmov (!%p268_p3), 0.0   ;;  %vm1533_vm1 = vmmov (!%p268_p3), 0   ;;  %v1534_v1 = vmov (!%p268_p3), 0   ;;  %s1536_s10 = smov (!%p268_p3), 120  }
   0x7   : > { %271 = sbr.rel (%p268_p3) target bundleno = 1446 (0x5a6), region = 40  ;;  %1408 = vmatprep.subr.mxu0 (!%p268_p3), %v1532_v0  ;;  %381 = vst.msk [vmem:[#allocation4] sm:$0xff] (!%p268_p3), %vm380_vm0, %v1532_v0  ;;  %382 = vst.msk [vmem:[#allocation4 + $0x8] sm:$0xff] (!%p268_p3), %vm380_vm0, %v1532_v0  ;;  %1410 = vmatprep.mubr.msk.f32.mxu0 (!%p268_p3), %vm1533_vm1, %v1532_v0  ;;  %vm371_vm4 = vcmask (!%p268_p3), 7168   ;;  %v1535_v9 = vmov (!%p268_p3), -inf   ;;  %v399_v10 = vlaneseq (!%p268_p3)  ;;  %s1537_s14 = smov (!%p268_p3), 112  }
   0x8   : > { %383 = vst.msk [vmem:[#allocation4 + $0x10] sm:$0xff] (!%p268_p3), %vm380_vm0, %v1532_v0  ;;  %384 = vst.msk [vmem:[#allocation4 + $0x18] sm:$0xff] (!%p268_p3), %vm380_vm0, %v1532_v0  ;;  %1482 = vset.pattern.permute.xlu0 (!%p268_p3), %v1534_v1  ;;  %1483 = vset.pattern.permute.xlu1 (!%p268_p3), %v1534_v1  ;;  %s1538_s15 = smov (!%p268_p3), 104   ;;  %s1539_s16 = smov (!%p268_p3), 8   ;;  %vm1228_vm10 = vcmask (!%p268_p3), 130048   ;;  %vm1230_vm11 = vcmask (!%p268_p3), 195584  }
   0x9   : > { %1413 = vmatprep.subr.mxu1 (!%p268_p3), %v1532_v0  ;;  %1415 = vmatprep.mubr.msk.f32.mxu1 (!%p268_p3), %vm1533_vm1, %v1532_v0  ;;  %372 = vst.msk [vmem:[#allocation2] sm:$0xff] (!%p268_p3), %vm371_vm4, %v1535_v9  ;;  %373 = vst.msk [vmem:[#allocation2 + $0x8] sm:$0xff] (!%p268_p3), %vm371_vm4, %v1535_v9  ;;  %v400_v11 = vshrl.u32 (!%p268_p3), %v399_v10, 7  ;;  %v412_v15 = vand.u32 (!%p268_p3), 127, %v399_v10  ;;  %s1540_s17 = smov (!%p268_p3), 16   ;;  %vm1232_vm12 = vcmask (!%p268_p3), 261120  }
   0xa   : > { %374 = vst.msk [vmem:[#allocation2 + $0x10] sm:$0xff] (!%p268_p3), %vm371_vm4, %v1535_v9  ;;  %375 = vst.msk [vmem:[#allocation2 + $0x18] sm:$0xff] (!%p268_p3), %vm371_vm4, %v1535_v9 }
   0xb   : > { %376 = vst.msk [vmem:[#allocation3] sm:$0xff] (!%p268_p3), %vm371_vm4, %v1532_v0  ;;  %377 = vst.msk [vmem:[#allocation3 + $0x8] sm:$0xff] (!%p268_p3), %vm371_vm4, %v1532_v0  ;;  %v401_v12 = vsub.s32 (!%p268_p3), 0, %v400_v11  ;;  %vm415_vm7 = vcmp.le.s32.totalorder (!%p268_p3), %v412_v15, %v400_v11 }
   0xc   : > { %378 = vst.msk [vmem:[#allocation3 + $0x10] sm:$0xff] (!%p268_p3), %vm371_vm4, %v1532_v0  ;;  %379 = vst.msk [vmem:[#allocation3 + $0x18] sm:$0xff] (!%p268_p3), %vm371_vm4, %v1532_v0 }
   0xe   : > { %s1760_s18 = smov (!%p326_p4, %s1522_s18), 1 }
   0xf   : > { %s1604_s22 = sshll.u32 %s1760_s18, 3  ;;  %s359_s25 = scalar_lea.vmem %s1751_s4, %s1760_s18 }
  0x10   : > { %s339_s28 = scalar_lea.vmem %s1748_s1, %s1604_s22  ;;  %s332_s6 = scalar_lea.vmem %s1747_s0, %s1604_s22  ;;  %v391_v2 = vld [vmem:[%s359_s25] sm:$0x1]  ;;  %v1695_v50 = vld [vmem:[#allocation2 + $0x8] sm:$0xff] }
  0x11   : > { %v387_v3 = vld [vmem:[%s339_s28] sm:$0xff]  ;;  %s353_s9 = scalar_lea.vmem %s1750_s3, %s1604_s22  ;;  %vm392_vm2 = vcmp.ne.s32.totalorder %v391_v2, 0  ;;  %s346_s13 = scalar_lea.vmem %s1749_s2, %s1604_s22  ;;  %v874_v53 = vld [vmem:[#allocation2 + $0x10] sm:$0xff]  ;;  %v1065_v57 = vld [vmem:[#allocation2 + $0x18] sm:$0xff] }
  0x12   : > { %v385_v4 = vld [vmem:[%s332_s6] sm:$0xff]  ;;  %1409 = vmatpush3.xpose.msk.msra.mxu0 %vm380_vm0, %v387_v3  ;;  %v398_v7 = vsel %vm392_vm2, 1, %v1534_v1  ;;  %s1541_s18 = smov 24   ;;  %s366_s25 = scalar_lea.vmem %s1752_s5, %s1604_s22 }
  0x13   : > { %v386_v5 = vmul.f32 0.35355338, %v385_v4  ;;  %v389_v6 = vld [vmem:[%s353_s9] sm:$0xff]  ;;  %1423 = vmatprep.subr.mxu0 %v1532_v0  ;;  %v402_v13 = vrot.slane %v398_v7, %v401_v12 }
  0x14   : > { %vm390_vm3 = vcmp.ne.s32.totalorder %v389_v6, 0  ;;  %v1645_v21 = vld [vmem:[#allocation2] sm:$0xff] }
  0x15   : > { %v393_v8 = vsel %vm390_vm3, 1, %v1534_v1  ;;  %1411 = vmatmul.mubr.msk.f32.vlgmr.msra.gmra.mrb[0].mxu0 %vm380_vm0, %v386_v5  ;;  %vm403_vm5 = vcmp.eq.s32.totalorder %v402_v13, 1  ;;  %v1660_v25 = vld [vmem:[%s346_s13] sm:$0xff] }
  0x16   : > { %395 = vperm.xlu0 %1482, %v393_v8   ;;  %1425 = vmatprep.mubr.msk.f32.mxu0 %vm1533_vm1, %v1532_v0 }
  0x17   : > { %1414 = vmatpush3.msra.mxu1 %v1660_v25 }
  0x18   : > { %1418 = vmatprep.subr.mxu1 %v1532_v0 }
  0x95   : > { %v396_v14 = vpop.permute.xlu0 %395 }
  0x96   : > { %vm397_vm6 = vcmp.eq.s32.totalorder %v396_v14, 1 }
  0x97   : > { %vm404_vm8 = vmand %vm397_vm6, %vm403_vm5 }
  0x98   : > { %vm1638_vm9 = vmand %vm404_vm8, %vm415_vm7 }
  0xe8   : > { %v490_v17 = vpop.f32.mrb[0].mxu0 }
  0xe9   : > { %v494_v18 = vsel %vm1638_vm9, %v490_v17, -1e+09  ;;  %v1412_v19 = vpop.f32.mrb[1].mxu0 }
  0xea   : > { %v496_v20 = vsel %vm380_vm0, %v494_v18, -inf }
  0xeb   : > { %497 = vmax.xlane.f32.xlu0 %v496_v20 }
 0x178   : > { %v498_v22 = vpop.xlane.xlu0 %497 }
 0x179   : > { %v1648_v23 = vmax.f32 %v1645_v21, %v498_v22 }
 0x17b   : > { %v500_v24 = vsub.f32 %v1645_v21, %v1648_v23  ;;  %601 = vst.msk [vmem:[#allocation2] sm:$0xff] %vm371_vm4, %v1648_v23  ;;  %505 = vperm.xlu1 %1483, %v1648_v23  }
 0x17d   : > { %v501_v14 = vmul.f32 1.442695, %v500_v24 }
 0x17f   : > { %604 = vrot.lane.b32.xlu1 %v387_v3, %s1536_s10 }
 0x183   : > { %602 = vrot.lane.b32.xlu1 %v386_v5, %s1536_s10 }
 0x187   : > { %796 = vrot.lane.b32.xlu1 %v387_v3, %s1537_s14 }
 0x18b   : > { %794 = vrot.lane.b32.xlu1 %v386_v5, %s1537_s14 }
 0x18f   : > { %987 = vrot.lane.b32.xlu1 %v387_v3, %s1538_s15 }
 0x193   : > { %985 = vrot.lane.b32.xlu1 %v386_v5, %s1538_s15 }
 0x1fa   : > { %v506_v26 = vpop.permute.xlu1 %505 }
 0x1fb   : > { %v508_v27 = vsub.f32 %v494_v18, %v506_v26 }
 0x1fd   : > { %v509_v28 = vmul.f32 1.442695, %v508_v27 }
 0x1fe   : > { %v605_v29 = vpop.permute.xlu1 %604 }
 0x1ff   : > { %1484 = vpow2.f32 %v509_v28 }
 0x202   : > { %v603_v30 = vpop.permute.xlu1 %602 }
 0x206   : > { %v797_v31 = vpop.permute.xlu1 %796 }
 0x209   : > { %v1485_v32 = vpop.eup %1484 }
 0x20a   : > { %1416 = vmatmul.mubr.msk.f32.vlgmr.msra.gmra.mrb[0].mxu1 %vm380_vm0, %v1485_v32  ;;  %v795_v33 = vpop.permute.xlu1 %794  ;;  %v513_v62 = vsel %vm380_vm0, %v1485_v32, 0.0 }
 0x20b   : > { %1419 = vmatpush3.xpose.msk.msra.mxu1 %vm380_vm0, %v605_v29  ;;  %1420 = vmatprep.mubr.msk.f32.mxu1 %vm1533_vm1, %v1532_v0 }
 0x20c   : > { %1428 = vmatprep.subr.mxu1 %v1532_v0 }
 0x20e   : > { %1421 = vmatmul.mubr.msk.f32.vlgmr.msra.gmra.mrb[2].mxu1 %vm380_vm0, %v603_v30  ;;  %v988_v34 = vpop.permute.xlu1 %987 }
 0x20f   : > { %1429 = vmatpush3.xpose.msk.msra.mxu1 %vm380_vm0, %v797_v31  ;;  %1430 = vmatprep.mubr.msk.f32.mxu1 %vm1533_vm1, %v1532_v0  ;;  %v699_v31 = vld [vmem:[#allocation3 + $0x8] sm:$0xff] }
 0x210   : > { %1438 = vmatprep.subr.mxu1 %v1532_v0 }
 0x212   : > { %1431 = vmatmul.mubr.msk.f32.vlgmr.msra.gmra.mrb[4].mxu1 %vm380_vm0, %v795_v33  ;;  %v986_v35 = vpop.permute.xlu1 %985 }
 0x213   : > { %1439 = vmatpush3.xpose.msk.msra.mxu1 %vm380_vm0, %v988_v34  ;;  %1440 = vmatprep.mubr.msk.f32.mxu1 %vm1533_vm1, %v1532_v0  ;;  %v891_v34 = vld [vmem:[#allocation3 + $0x10] sm:$0xff] }
 0x216   : > { %1441 = vmatmul.mubr.msk.f32.vlgmr.msra.gmra.mrb[6].mxu1 %vm380_vm0, %v986_v35 }
 0x2dd   : > { %v1684_v36 = vpop.f32.mrb[0].mxu1 }
 0x2de   : > { %v1417_v37 = vpop.f32.mrb[1].mxu1 }
 0x2df   : > { %v519_v37 = vld [vmem:[#allocation4] sm:$0xff] }
 0x2e1   : > { %v676_v38 = vpop.f32.mrb[2].mxu1 }
 0x2e2   : > { %v680_v39 = vsel %vm1638_vm9, %v676_v38, -1e+09  ;;  %v1422_v40 = vpop.f32.mrb[3].mxu1 }
 0x2e3   : > { %v683_v41 = vsel %vm380_vm0, %v680_v39, -inf }
 0x2e4   : > { %684 = vmax.xlane.f32.xlu1 %v683_v41  ;;  %v1082_v41 = vld [vmem:[#allocation3 + $0x18] sm:$0xff] }
 0x2e5   : > { %v868_v42 = vpop.f32.mrb[4].mxu1 }
 0x2e6   : > { %v872_v43 = vsel %vm1638_vm9, %v868_v42, -1e+09  ;;  %v1432_v44 = vpop.f32.mrb[5].mxu1 }
 0x2e7   : > { %v875_v45 = vsel %vm380_vm0, %v872_v43, -inf }
 0x2e8   : > { %876 = vmax.xlane.f32.xlu0 %v875_v45 }
 0x2e9   : > { %v1059_v46 = vpop.f32.mrb[6].mxu1 }
 0x2ea   : > { %v1063_v47 = vsel %vm1638_vm9, %v1059_v46, -1e+09  ;;  %v1442_v48 = vpop.f32.mrb[7].mxu1 }
 0x2eb   : > { %v1066_v49 = vsel %vm380_vm0, %v1063_v47, -inf }
 0x2ec   : > { %1067 = vmax.xlane.f32.xlu0 %v1066_v49 }
 0x371   : > { %v685_v51 = vpop.xlane.xlu1 %684 }
 0x372   : > { %v686_v52 = vmax.f32 %v1695_v50, %v685_v51 }
 0x374   : > { %v687_v54 = vsub.f32 %v1695_v50, %v686_v52  ;;  %793 = vst.msk [vmem:[#allocation2 + $0x8] sm:$0xff] %vm371_vm4, %v686_v52  ;;  %692 = vperm.xlu0 %1482, %v686_v52  }
 0x375   : > { %v877_v55 = vpop.xlane.xlu0 %876 }
 0x376   : > { %v878_v56 = vmax.f32 %v874_v53, %v877_v55  ;;  %v688_v21 = vmul.f32 1.442695, %v687_v54 }
 0x378   : > { %v879_v58 = vsub.f32 %v874_v53, %v878_v56  ;;  %984 = vst.msk [vmem:[#allocation2 + $0x10] sm:$0xff] %vm371_vm4, %v878_v56  ;;  %884 = vperm.xlu1 %1483, %v878_v56  }
 0x379   : > { %v1068_v59 = vpop.xlane.xlu0 %1067 }
 0x37a   : > { %v1069_v60 = vmax.f32 %v1065_v57, %v1068_v59  ;;  %v880_v18 = vmul.f32 1.442695, %v879_v58 }
 0x37c   : > { %v1070_v61 = vsub.f32 %v1065_v57, %v1069_v60  ;;  %1175 = vst.msk [vmem:[#allocation2 + $0x18] sm:$0xff] %vm371_vm4, %v1069_v60  ;;  %1075 = vperm.xlu0 %1482, %v1069_v60   ;;  %v899_v57 = vld [vmem:[#allocation4 + $0x10] sm:$0xff] }
 0x37e   : > { %v1071_v20 = vmul.f32 1.442695, %v1070_v61 }
 0x380   : > { %715 = vrot.lane.b32.xlu0 %v1660_v25, %s1536_s10 }
 0x384   : > { %906 = vrot.lane.b32.xlu0 %v1660_v25, %s1537_s14 }
 0x388   : > { %1097 = vrot.lane.b32.xlu0 %v1660_v25, %s1538_s15  ;;  %v511_v25 = vld [vmem:[#allocation3] sm:$0xff] }
 0x3a7   : > { %514 = vadd.xlane.f32.xlu0 %v513_v62  ;;  %v1090_v62 = vld [vmem:[#allocation4 + $0x18] sm:$0xff] }
 0x3f3   : > { %v693_v63 = vpop.permute.xlu0 %692 }
 0x3f4   : > { %v695_v1 = vsub.f32 %v680_v39, %v693_v63 }
 0x3f6   : > { %v696_v2 = vmul.f32 1.442695, %v695_v1 }
 0x3f7   : > { %v885_v3 = vpop.permute.xlu1 %884 }
 0x3f8   : > { %1486 = vpow2.f32 %v696_v2  ;;  %v887_v4 = vsub.f32 %v872_v43, %v885_v3 }
 0x3fa   : > { %v888_v5 = vmul.f32 1.442695, %v887_v4 }
 0x3fb   : > { %v1076_v6 = vpop.permute.xlu0 %1075 }
 0x3fc   : > { %1488 = vpow2.f32 %v888_v5  ;;  %v1078_v7 = vsub.f32 %v1063_v47, %v1076_v6 }
 0x3fe   : > { %v1079_v8 = vmul.f32 1.442695, %v1078_v7 }
 0x3ff   : > { %v716_v9 = vpop.permute.xlu0 %715 }
 0x400   : > { %1490 = vpow2.f32 %v1079_v8  ;;  %1424 = vmatpush3.msra.mxu0 %v716_v9 }
 0x401   : > { %1433 = vmatprep.subr.mxu0 %v1532_v0  ;;  %1492 = vpow2.f32 %v501_v14 }
 0x402   : > { %v1487_v10 = vpop.eup %1486  ;;  %1494 = vpow2.f32 %v880_v18 }
 0x403   : > { %1426 = vmatmul.mubr.msk.f32.vlgmr.msra.gmra.mrb[2].mxu0 %vm380_vm0, %v1487_v10  ;;  %v701_v11 = vsel %vm380_vm0, %v1487_v10, 0.0  ;;  %v907_v12 = vpop.permute.xlu0 %906  ;;  %1496 = vpow2.f32 %v1071_v20 }
 0x404   : > { %702 = vadd.xlane.f32.xlu1 %v701_v11  ;;  %1434 = vmatpush3.msra.mxu0 %v907_v12  ;;  %1498 = vpow2.f32 %v688_v21 }
 0x405   : > { %1435 = vmatprep.mubr.msk.f32.mxu0 %vm1533_vm1, %v1532_v0  ;;  %1443 = vmatprep.subr.mxu0 %v1532_v0 }
 0x406   : > { %v1489_v13 = vpop.eup %1488 }
 0x407   : > { %1436 = vmatmul.mubr.msk.f32.vlgmr.msra.gmra.mrb[4].mxu0 %vm380_vm0, %v1489_v13  ;;  %v893_v15 = vsel %vm380_vm0, %v1489_v13, 0.0  ;;  %v1098_v16 = vpop.permute.xlu0 %1097 }
 0x408   : > { %894 = vadd.xlane.f32.xlu0 %v893_v15  ;;  %1444 = vmatpush3.msra.mxu0 %v1098_v16 }
 0x409   : > { %1445 = vmatprep.mubr.msk.f32.mxu0 %vm1533_vm1, %v1532_v0 }
 0x40a   : > { %v1491_v17 = vpop.eup %1490 }
 0x40b   : > { %1446 = vmatmul.mubr.msk.f32.vlgmr.msra.gmra.mrb[6].mxu0 %vm380_vm0, %v1491_v17  ;;  %v1084_v19 = vsel %vm380_vm0, %v1491_v17, 0.0  ;;  %v1493_v22 = vpop.eup %1492 }
 0x40c   : > { %1085 = vadd.xlane.f32.xlu0 %v1084_v19  ;;  %v1495_v23 = vpop.eup %1494  ;;  %v512_v26 = vmul.f32 %v1493_v22, %v511_v25 }
 0x40d   : > { %v1497_v24 = vpop.eup %1496  ;;  %v892_v38 = vmul.f32 %v1495_v23, %v891_v34 }
 0x40e   : > { %v1499_v0 = vpop.eup %1498  ;;  %v1083_v45 = vmul.f32 %v1497_v24, %v1082_v41 }
 0x40f   : > { %v700_v32 = vmul.f32 %v1499_v0, %v699_v31 }
 0x415   : > { %522 = vperm.xlu1 %1483, %v1493_v22  }
 0x419   : > { %902 = vperm.xlu1 %1483, %v1495_v23  }
 0x41d   : > { %1093 = vperm.xlu1 %1483, %v1497_v24  }
 0x422   : > { %710 = vperm.xlu0 %1482, %v1499_v0  }
 0x434   : > { %v515_v27 = vpop.xlane.xlu0 %514 }
 0x435   : > { %v516_v28 = vadd.f32 %v515_v27, %v512_v26 }
 0x437   : > { %518 = vst.msk [vmem:[#allocation3] sm:$0xff] %vm371_vm4, %v516_v28 }
 0x43e   : > { %v1180_v29 = vld [vmem:[#allocation3] sm:$0xff] }
 0x43f   : > { %1500 = vrcp.f32 %v1180_v29 }
 0x449   : > { %v1501_v30 = vpop.eup %1500 }
 0x44a   : > { %1184 = vperm.xlu0 %1482, %v1501_v30  }
 0x491   : > { %v703_v33 = vpop.xlane.xlu1 %702 }
 0x492   : > { %v704_v35 = vadd.f32 %v703_v33, %v700_v32 }
 0x494   : > { %705 = vst.msk [vmem:[#allocation3 + $0x8] sm:$0xff] %vm371_vm4, %v704_v35 }
 0x495   : > { %v895_v39 = vpop.xlane.xlu0 %894  ;;  %v523_v40 = vpop.permute.xlu1 %522 }
 0x496   : > { %v896_v42 = vadd.f32 %v895_v39, %v892_v38  ;;  %v525_v43 = vmul.f32 %v523_v40, %v519_v37 }
 0x498   : > { %897 = vst.msk [vmem:[#allocation3 + $0x10] sm:$0xff] %vm371_vm4, %v896_v42  ;;  %v599_v44 = vadd.f32 %v1684_v36, %v525_v43  ;;  %v707_v36 = vld [vmem:[#allocation4 + $0x8] sm:$0xff] }
 0x499   : > { %v1086_v46 = vpop.xlane.xlu0 %1085  ;;  %v903_v55 = vpop.permute.xlu1 %902 }
 0x49a   : > { %600 = vst.msk [vmem:[#allocation4] sm:$0xff] %vm380_vm0, %v599_v44  ;;  %v1087_v47 = vadd.f32 %v1086_v46, %v1083_v45  ;;  %v905_v61 = vmul.f32 %v903_v55, %v899_v57 }
 0x49b   : > { %v1189_v48 = vld [vmem:[#allocation3 + $0x8] sm:$0xff] }
 0x49c   : > { %1088 = vst.msk [vmem:[#allocation3 + $0x18] sm:$0xff] %vm371_vm4, %v1087_v47  ;;  %1502 = vrcp.f32 %v1189_v48 }
 0x49d   : > { %v1094_v63 = vpop.permute.xlu1 %1093 }
 0x49e   : > { %v1096_v4 = vmul.f32 %v1094_v63, %v1090_v62 }
 0x49f   : > { %v1198_v49 = vld [vmem:[#allocation3 + $0x10] sm:$0xff] }
 0x4a0   : > { %1504 = vrcp.f32 %v1198_v49 }
 0x4a1   : > { %v711_v54 = vpop.permute.xlu0 %710  ;;  %v1179_v18 = vld [vmem:[#allocation4] sm:$0xff] }
 0x4a2   : > { %v713_v56 = vmul.f32 %v711_v54, %v707_v36 }
 0x4a3   : > { %v1207_v50 = vld [vmem:[#allocation3 + $0x18] sm:$0xff] }
 0x4a4   : > { %1506 = vrcp.f32 %v1207_v50 }
 0x4a6   : > { %v1503_v51 = vpop.eup %1502 }
 0x4a7   : > { %1193 = vperm.xlu1 %1483, %v1503_v51  }
 0x4aa   : > { %v1505_v52 = vpop.eup %1504 }
 0x4ab   : > { %1202 = vperm.xlu0 %1482, %v1505_v52  }
 0x4ae   : > { %v1507_v53 = vpop.eup %1506 }
 0x4af   : > { %1211 = vperm.xlu1 %1483, %v1507_v53  }
 0x4c9   : > { %v1185_v8 = vpop.permute.xlu0 %1184 }
 0x4ca   : > { %v1187_v20 = vmul.f32 %v1185_v8, %v1179_v18 }
 0x4d6   : > { %v787_v58 = vpop.f32.mrb[2].mxu0 }
 0x4d7   : > { %v791_v59 = vadd.f32 %v787_v58, %v713_v56  ;;  %v1427_v60 = vpop.f32.mrb[3].mxu0 }
 0x4d9   : > { %792 = vst.msk [vmem:[#allocation4 + $0x8] sm:$0xff] %vm380_vm0, %v791_v59 }
 0x4da   : > { %v978_v1 = vpop.f32.mrb[4].mxu0 }
 0x4db   : > { %v982_v2 = vadd.f32 %v978_v1, %v905_v61  ;;  %v1437_v3 = vpop.f32.mrb[5].mxu0 }
 0x4dd   : > { %983 = vst.msk [vmem:[#allocation4 + $0x10] sm:$0xff] %vm380_vm0, %v982_v2 }
 0x4de   : > { %v1169_v5 = vpop.f32.mrb[6].mxu0 }
 0x4df   : > { %v1173_v6 = vadd.f32 %v1169_v5, %v1096_v4  ;;  %v1447_v7 = vpop.f32.mrb[7].mxu0 }
 0x4e0   : > { %v1188_v10 = vld [vmem:[#allocation4 + $0x8] sm:$0xff] }
 0x4e1   : > { %1174 = vst.msk [vmem:[#allocation4 + $0x18] sm:$0xff] %vm380_vm0, %v1173_v6 }
 0x4e4   : > { %v1197_v13 = vld [vmem:[#allocation4 + $0x10] sm:$0xff] }
 0x4e8   : > { %v1206_v16 = vld [vmem:[#allocation4 + $0x18] sm:$0xff] }
 0x526   : > { %v1194_v9 = vpop.permute.xlu1 %1193 }
 0x527   : > { %v1196_v11 = vmul.f32 %v1194_v9, %v1188_v10 }
 0x529   : > { %1216 = vrot.lane.b32.xlu0 %v1196_v11, %s1539_s16 }
 0x52a   : > { %v1203_v12 = vpop.permute.xlu0 %1202 }
 0x52b   : > { %v1205_v14 = vmul.f32 %v1203_v12, %v1197_v13 }
 0x52d   : > { %1220 = vrot.lane.b32.xlu1 %v1205_v14, %s1540_s17 }
 0x52e   : > { %v1212_v15 = vpop.permute.xlu1 %1211 }
 0x52f   : > { %v1214_v17 = vmul.f32 %v1212_v15, %v1206_v16 }
 0x531   : > { %1224 = vrot.lane.b32.xlu0 %v1214_v17, %s1541_s18 }
 0x59b   : > { %v1217_v19 = vpop.permute.xlu0 %1216 }
 0x59c   : > { %v1227_v22 = vsel %vm380_vm0, %v1187_v20, %v1217_v19 }
 0x59f   : > { %v1221_v21 = vpop.permute.xlu1 %1220 }
 0x5a0   : > { %v1229_v23 = vsel %vm1228_vm10, %v1227_v22, %v1221_v21 }
 0x5a3   : > { %v1225_v24 = vpop.permute.xlu0 %1224 }
 0x5a4   : > { %v1231_v0 = vsel %vm1230_vm11, %v1229_v23, %v1225_v24 }
 0x5a5   : > { %1233 = vst.msk [vmem:[%s366_s25] sm:$0xff] %vm1232_vm12, %v1231_v0 }
 0x5a6 PF: > { %s15_s20 = sadd.s32 1, %s1530_s20   ;;  %s1755_s18 = smov %s1526_s19 }
 0x5a7   : > { %p12_p5 = scmp.ge.s32.totalorder %s15_s20, 4   ;;  %s1756_s19 = smov %s1758_s21 }
 0x5a9   :  { %14 = sbr.rel (!%p12_p5) target bundleno = 2 (0x2), region = 99 }

</bundles_post_ra>
